<compile_context>
chip_gen: v6e
topology: v6e:2x2x1
jax: 0.10.0
libtpu: 0.0.40
codegen_flags: <defaults>
</compile_context>

<pallas_src>
import functools

import jax
import jax.numpy as jnp
from jax.experimental import pallas as pl
from jax.experimental.pallas import tpu as pltpu


def _vqvae_kernel(x_ref, w_ref, wsq_ref, q_ref, sse_ref, enc_ref, *,
                  n_true, tile_n, use_bf16_distances):
    x = x_ref[...].astype(jnp.float32)          # (TN, D) pipelined tile
    w = w_ref[...].astype(jnp.float32)          # (K, D)  resident codebook
    TN, D = x.shape
    K = w.shape[0]

    # Distance matmul on the MXU, contracting the feature dim directly
    # (no explicit transpose of w).
    contract = (((1,), (1,)), ((), ()))
    if use_bf16_distances:
        xw = jax.lax.dot_general(
            x.astype(jnp.bfloat16), w.astype(jnp.bfloat16),
            contract, preferred_element_type=jnp.float32)        # (TN, K)
    else:
        xw = jax.lax.dot_general(
            x, w, contract, preferred_element_type=jnp.float32)  # (TN, K)

    # argmin(||x||^2 + ||w||^2 - 2 x.w) == argmin(0.5*||w||^2 - x.w):
    # per-row constant dropped, 2x scale folded into the precomputed constant.
    d = wsq_ref[...] - xw                                        # (TN, K)

    # argmin over codes with first-occurrence tie break (torch.argmin),
    # expressed directly as a one-hot matrix (stays 2-D throughout).
    min_d = jnp.min(d, axis=1, keepdims=True)                    # (TN, 1)
    col = jax.lax.broadcasted_iota(jnp.int32, (TN, K), 1)        # (TN, K)
    idx = jnp.min(jnp.where(d == min_d, col, K), axis=1, keepdims=True)
    encodings = (col == idx).astype(jnp.float32)                 # (TN, K)

    # Ragged tail: rows past the true N read undefined data from the partial
    # trailing block; mask them out (jnp.where, not multiply, so NaN garbage
    # cannot propagate). Only traced when N % tile_n != 0.
    needs_mask = (n_true % tile_n) != 0
    if needs_mask:
        i = pl.program_id(0)
        row = jax.lax.broadcasted_iota(jnp.int32, (TN, 1), 0) + i * tile_n
        valid = row < n_true                                     # (TN, 1) bool
        encodings = jnp.where(valid, encodings, 0.0)

    # One-hot gather of code vectors on the MXU.
    quantized = jnp.dot(encodings, w, preferred_element_type=jnp.float32)

    diff = quantized - x
    if needs_mask:
        diff = jnp.where(valid, diff, 0.0)

    # Forward value of inputs + (quantized - inputs).detach() is just quantized.
    q_ref[...] = quantized.astype(q_ref.dtype)

    # Per-tile partial reductions (no cross-step carry -> grid axis can be
    # "parallel"). Sum over rows only; the final lane reduce happens once in
    # the wrapper.
    sse_ref[0] = jnp.sum(diff * diff, axis=0, keepdims=True)     # (1, D)
    enc_ref[0] = jnp.sum(encodings, axis=0, keepdims=True)       # (1, K)


def vqvae_forward(inputs, embedding_weight, commitment_cost, *,
                  block_n=512, use_bf16_distances=False):
    """inputs: (N, D) float32; embedding_weight: (K, D) float32.

    Returns (loss, quantized, perplexity) like the PyTorch module (eval mode).
    """
    N, D = inputs.shape
    K, D2 = embedding_weight.shape
    assert D == D2

    tn = N if N <= block_n else block_n
    grid_n = pl.cdiv(N, tn)

    # Loop-invariant codebook term, computed once outside the grid loop.
    w_f32 = embedding_weight.astype(jnp.float32)
    half_w_sq = (0.5 * jnp.sum(w_f32 * w_f32, axis=1))[None, :]   # (1, K)

    kernel = functools.partial(
        _vqvae_kernel,
        n_true=N,
        tile_n=tn,
        use_bf16_distances=bool(use_bf16_distances),
    )

    # Scoped-VMEM budget: x/q double-buffered tiles, resident codebook,
    # (TN, K) distance/encoding intermediates; cap leaves headroom on v7x.
    itemsize = 4
    vmem_est = itemsize * (
        2 * tn * D          # x (double-buffered)
        + 2 * tn * D        # quantized out (double-buffered)
        + 2 * K * D         # codebook
        + 2 * K             # half_w_sq
        + 2 * (D + K)       # per-tile partial outputs
        + 3 * tn * K        # distances / iota / encodings intermediates
        + 2 * tn * D        # quantized / diff intermediates
    )
    vmem_limit_bytes = int(min(max(2 * vmem_est, 32 * 1024 * 1024),
                               48 * 1024 * 1024))

    q, sse_part, enc_part = pl.pallas_call(
        kernel,
        out_shape=(
            jax.ShapeDtypeStruct((N, D), inputs.dtype),
            jax.ShapeDtypeStruct((grid_n, 1, D), jnp.float32),
            jax.ShapeDtypeStruct((grid_n, 1, K), jnp.float32),
        ),
        grid_spec=pltpu.PrefetchScalarGridSpec(
            num_scalar_prefetch=0,
            grid=(grid_n,),
            in_specs=[
                pl.BlockSpec((tn, D), lambda i: (i, 0)),   # x tile, pipelined
                pl.BlockSpec((K, D), lambda i: (0, 0)),    # codebook, resident
                pl.BlockSpec((1, K), lambda i: (0, 0)),    # 0.5*||w||^2, resident
            ],
            out_specs=(
                pl.BlockSpec((tn, D), lambda i: (i, 0)),     # quantized tile
                pl.BlockSpec((1, 1, D), lambda i: (i, 0, 0)),  # partial SSE
                pl.BlockSpec((1, 1, K), lambda i: (i, 0, 0)),  # partial counts
            ),
        ),
        compiler_params=pltpu.CompilerParams(
            # No cross-step carry: safe to shard the N axis across cores.
            dimension_semantics=("parallel",),
            vmem_limit_bytes=vmem_limit_bytes,
        ),
    )(inputs, embedding_weight, half_w_sq)

    # Tiny final reductions in plain XLA.
    mse = jnp.sum(sse_part) / jnp.float32(N * D)
    loss = (1.0 + jnp.float32(commitment_cost)) * mse
    avg_probs = jnp.sum(enc_part, axis=(0, 1)) / jnp.float32(N)   # (K,)
    perplexity = jnp.exp(-jnp.sum(avg_probs * jnp.log(avg_probs + 1e-10)))
    return loss, q, perplexity


def _reference(inputs, w, commitment_cost):
    # Pure-JAX reference mirroring the PyTorch forward (eval mode).
    distances = (jnp.sum(inputs**2, axis=1, keepdims=True)
                 + jnp.sum(w**2, axis=1)
                 - 2.0 * inputs @ w.T)
    idx = jnp.argmin(distances, axis=1)
    enc = jax.nn.one_hot(idx, w.shape[0], dtype=jnp.float32)
    quantized = enc @ w
    e_latent = jnp.mean((quantized - inputs) ** 2)
    q_latent = jnp.mean((quantized - inputs) ** 2)
    loss = q_latent + commitment_cost * e_latent
    q_out = inputs + (quantized - inputs)
    avg_probs = jnp.mean(enc, axis=0)
    perplexity = jnp.exp(-jnp.sum(avg_probs * jnp.log(avg_probs + 1e-10)))
    return loss, q_out, perplexity


if __name__ == "__main__":
    num_embeddings = 128          # K
    embedding_dim = 128           # D (multiple of 128 -> lane-dense tiles/stores)
    commitment_cost = 0.25

    key = jax.random.PRNGKey(0)
    k_x, k_w, k_x2 = jax.random.split(key, 3)

    # embedding.weight ~ U(-1/K, 1/K), matching the module's __init__.
    embedding_weight = jax.random.uniform(
        k_w, (num_embeddings, embedding_dim),
        minval=-1.0 / num_embeddings, maxval=1.0 / num_embeddings,
        dtype=jnp.float32)

    # Main check: N divisible by the tile (2 grid steps of 512).
    N = 1024
    inputs = jax.random.normal(k_x, (N, embedding_dim), dtype=jnp.float32) * 0.05
    loss, quantized, perplexity = vqvae_forward(inputs, embedding_weight,
                                                commitment_cost)
    jax.block_until_ready((loss, quantized, perplexity))

    ref_loss, ref_q, ref_p = _reference(inputs, embedding_weight, commitment_cost)
    assert jnp.allclose(loss, ref_loss, atol=1e-6, rtol=1e-5), (loss, ref_loss)
    assert jnp.allclose(quantized, ref_q, atol=1e-6, rtol=1e-5)
    assert jnp.allclose(perplexity, ref_p, atol=1e-4, rtol=1e-5), (perplexity, ref_p)

    # Ragged check: N not divisible by block_n (trailing partial block, no pad).
    N2 = 200
    inputs2 = jax.random.normal(k_x2, (N2, embedding_dim), dtype=jnp.float32) * 0.05
    loss2, q2, p2 = vqvae_forward(inputs2, embedding_weight, commitment_cost,
                                  block_n=128)
    jax.block_until_ready((loss2, q2, p2))
    r_loss2, r_q2, r_p2 = _reference(inputs2, embedding_weight, commitment_cost)
    assert jnp.allclose(loss2, r_loss2, atol=1e-6, rtol=1e-5), (loss2, r_loss2)
    assert jnp.allclose(q2, r_q2, atol=1e-6, rtol=1e-5)
    assert jnp.allclose(p2, r_p2, atol=1e-4, rtol=1e-5), (p2, r_p2)

    print("KERNEL_OK")
</pallas_src>

<mosaic_0001>
module attributes {stable_mosaic.version = 11 : i64} {
  func.func @_vqvae_kernel(%arg0: i32, %arg1: memref<512x128xf32, #tpu.memory_space<vmem>>, %arg2: memref<128x128xf32, #tpu.memory_space<vmem>>, %arg3: memref<1x128xf32, #tpu.memory_space<vmem>>, %arg4: memref<512x128xf32, #tpu.memory_space<vmem>>, %arg5: memref<1x1x128xf32, #tpu.memory_space<vmem>>, %arg6: memref<1x1x128xf32, #tpu.memory_space<vmem>>) attributes {dimension_semantics = [#tpu.dimension_semantics<parallel>], iteration_bounds = array<i64: 2>, scalar_prefetch = 0 : i64, scratch_operands = 0 : i64, tpu.core_type = #tpu.core_type<tc>, window_params = [{transform_indices = @transform_0, window_bounds = array<i64: 512, 128>}, {pipeline_mode = #tpu.pipeline_mode<synchronous>, transform_indices = @transform_1, window_bounds = array<i64: 128, 128>}, {pipeline_mode = #tpu.pipeline_mode<synchronous>, transform_indices = @transform_2, window_bounds = array<i64: 1, 128>}, {transform_indices = @transform_3, window_bounds = array<i64: 512, 128>}, {transform_indices = @transform_4, window_bounds = array<i64: 1, 1, 128>}, {transform_indices = @transform_5, window_bounds = array<i64: 1, 1, 128>}]} {
    %c0 = arith.constant 0 : index
    %c0_0 = arith.constant 0 : index
    %0 = vector.load %arg1[%c0, %c0_0] : memref<512x128xf32, #tpu.memory_space<vmem>>, vector<512x128xf32>
    %c0_1 = arith.constant 0 : index
    %c0_2 = arith.constant 0 : index
    %1 = vector.load %arg2[%c0_1, %c0_2] : memref<128x128xf32, #tpu.memory_space<vmem>>, vector<128x128xf32>
    %cst = arith.constant dense<0.000000e+00> : vector<512x128xf32>
    %2 = tpu.matmul %0, %1, %cst {dimension_numbers = #tpu.dot_dimension_numbers<[1], [1], [0], [0], [0, 0, 1, 0], [], []>} : vector<512x128xf32>, vector<128x128xf32>, vector<512x128xf32> -> vector<512x128xf32>
    %c0_3 = arith.constant 0 : index
    %c0_4 = arith.constant 0 : index
    %3 = vector.load %arg3[%c0_3, %c0_4] : memref<1x128xf32, #tpu.memory_space<vmem>>, vector<1x128xf32>
    %4 = vector.broadcast %3 : vector<1x128xf32> to vector<512x128xf32>
    %5 = arith.subf %4, %2 : vector<512x128xf32>
    %cst_5 = arith.constant dense<0x7F800000> : vector<512xf32>
    %6 = vector.multi_reduction <minimumf>, %5, %cst_5 [1] : vector<512x128xf32> to vector<512xf32>
    %7 = vector.shape_cast %6 : vector<512xf32> to vector<512x1xf32>
    %8 = tpu.iota {dimensions = array<i32: 1>} : vector<512x128xi32>
    %9 = vector.broadcast %7 : vector<512x1xf32> to vector<512x128xf32>
    %10 = arith.cmpf oeq, %5, %9 : vector<512x128xf32>
    %c128_i32 = arith.constant 128 : i32
    %11 = vector.broadcast %c128_i32 : i32 to vector<512x128xi32>
    %12 = arith.select %10, %8, %11 : vector<512x128xi1>, vector<512x128xi32>
    %cst_6 = arith.constant dense<2147483647> : vector<512xi32>
    %13 = vector.multi_reduction <minsi>, %12, %cst_6 [1] : vector<512x128xi32> to vector<512xi32>
    %14 = vector.shape_cast %13 : vector<512xi32> to vector<512x1xi32>
    %15 = vector.broadcast %14 : vector<512x1xi32> to vector<512x128xi32>
    %16 = arith.cmpi eq, %8, %15 : vector<512x128xi32>
    %17 = arith.extui %16 : vector<512x128xi1> to vector<512x128xi32>
    %18 = arith.sitofp %17 : vector<512x128xi32> to vector<512x128xf32>
    %cst_7 = arith.constant dense<0.000000e+00> : vector<512x128xf32>
    %19 = tpu.matmul %18, %1, %cst_7 {dimension_numbers = #tpu.dot_dimension_numbers<[1], [0], [0], [1], [0, 0, 1, 1], [], []>} : vector<512x128xf32>, vector<128x128xf32>, vector<512x128xf32> -> vector<512x128xf32>
    %20 = arith.subf %19, %0 : vector<512x128xf32>
    %c0_8 = arith.constant 0 : index
    %c0_9 = arith.constant 0 : index
    %21 = vector.load %arg4[%c0_8, %c0_9] : memref<512x128xf32, #tpu.memory_space<vmem>>, vector<512x128xf32>
    tpu.vector_store %arg4[%c0_8, %c0_9], %19 {strides = array<i32>} : memref<512x128xf32, #tpu.memory_space<vmem>>, vector<512x128xf32>,
    %22 = arith.mulf %20, %20 : vector<512x128xf32>
    %cst_10 = arith.constant dense<0.000000e+00> : vector<128xf32>
    %23 = vector.multi_reduction <add>, %22, %cst_10 [0] : vector<512x128xf32> to vector<128xf32>
    %24 = vector.shape_cast %23 : vector<128xf32> to vector<1x128xf32>
    %c0_11 = arith.constant 0 : index
    %c0_12 = arith.constant 0 : index
    %c0_13 = arith.constant 0 : index
    %25 = vector.load %arg5[%c0_11, %c0_12, %c0_13] : memref<1x1x128xf32, #tpu.memory_space<vmem>>, vector<1x1x128xf32>
    %26 = vector.shape_cast %25 : vector<1x1x128xf32> to vector<1x128xf32>
    %27 = vector.shape_cast %24 : vector<1x128xf32> to vector<1x1x128xf32>
    tpu.vector_store %arg5[%c0_11, %c0_12, %c0_13], %27 {strides = array<i32>} : memref<1x1x128xf32, #tpu.memory_space<vmem>>, vector<1x1x128xf32>,
    %cst_14 = arith.constant dense<0.000000e+00> : vector<128xf32>
    %28 = vector.multi_reduction <add>, %18, %cst_14 [0] : vector<512x128xf32> to vector<128xf32>
    %29 = vector.shape_cast %28 : vector<128xf32> to vector<1x128xf32>
    %c0_15 = arith.constant 0 : index
    %c0_16 = arith.constant 0 : index
    %c0_17 = arith.constant 0 : index
    %30 = vector.load %arg6[%c0_15, %c0_16, %c0_17] : memref<1x1x128xf32, #tpu.memory_space<vmem>>, vector<1x1x128xf32>
    %31 = vector.shape_cast %30 : vector<1x1x128xf32> to vector<1x128xf32>
    %32 = vector.shape_cast %29 : vector<1x128xf32> to vector<1x1x128xf32>
    tpu.vector_store %arg6[%c0_15, %c0_16, %c0_17], %32 {strides = array<i32>} : memref<1x1x128xf32, #tpu.memory_space<vmem>>, vector<1x1x128xf32>,
    return
  }
  func.func @transform_0(%arg0: i32) -> (i32, i32) {
    %c0_i32 = arith.constant 0 : i32
    %c0_i32_0 = arith.constant 0 : i32
    return %arg0, %c0_i32 : i32, i32
  }
  func.func @transform_1(%arg0: i32) -> (i32, i32) {
    %c0_i32 = arith.constant 0 : i32
    %c0_i32_0 = arith.constant 0 : i32
    %c0_i32_1 = arith.constant 0 : i32
    return %c0_i32, %c0_i32_0 : i32, i32
  }
  func.func @transform_2(%arg0: i32) -> (i32, i32) {
    %c0_i32 = arith.constant 0 : i32
    %c0_i32_0 = arith.constant 0 : i32
    %c0_i32_1 = arith.constant 0 : i32
    return %c0_i32, %c0_i32_0 : i32, i32
  }
  func.func @transform_3(%arg0: i32) -> (i32, i32) {
    %c0_i32 = arith.constant 0 : i32
    %c0_i32_0 = arith.constant 0 : i32
    return %arg0, %c0_i32 : i32, i32
  }
  func.func @transform_4(%arg0: i32) -> (i32, i32, i32) {
    %c0_i32 = arith.constant 0 : i32
    %c0_i32_0 = arith.constant 0 : i32
    %c0_i32_1 = arith.constant 0 : i32
    return %arg0, %c0_i32, %c0_i32_0 : i32, i32, i32
  }
  func.func @transform_5(%arg0: i32) -> (i32, i32, i32) {
    %c0_i32 = arith.constant 0 : i32
    %c0_i32_0 = arith.constant 0 : i32
    %c0_i32_1 = arith.constant 0 : i32
    return %arg0, %c0_i32, %c0_i32_0 : i32, i32, i32
  }
}

</mosaic_0001>

<bundles_post_ra>
// kernel: tpu_custom_call.1
= control target key start
LH: loop header
LB: loop body
LE: loop exit
PB: predicated region body
PF: predicated region fallthrough
CT: control target
= control target key end

     0   :  { %11 = vsyncpa [#allocation3], 0  ;;  %s5873_s0 = inlined_call_operand.hbm [shape: f32[1024,128], index: 0, kind: input, shape index: {}]   ;;  %s5874_s1 = inlined_call_operand.hbm [shape: f32[128,128], index: 1, kind: input, shape index: {}]   ;;  %s5875_s2 = inlined_call_operand.vmem [shape: f32[1,128], index: 2, kind: input, shape index: {}]   ;;  %s5876_s3 = inlined_call_operand.hbm [shape: f32[1024,128], index: 3, kind: output, shape index: {0}]   ;;  %s5877_s4 = inlined_call_operand.hbm [shape: f32[2,1,128], index: 4, kind: output, shape index: {1}]   ;;  %s5878_s5 = inlined_call_operand.hbm [shape: f32[2,1,128], index: 5, kind: output, shape index: {2}]  }
   0x1   :  { %13 = vsyncpa [#allocation3 + $0x1], 0 }
   0x2   :  { %14 = vsyncpa [#allocation6], 0 }
   0x3   :  { %15 = vsyncpa [#allocation4], 0 }
   0x4   :  { %17 = vsyncpa [#allocation4 + $0x1], 0 }
   0x5   :  { %18 = vsyncpa [#allocation9], 0 }
   0x6   :  { %20 = vsyncpa [#allocation9 + $0x1], 0  ;;  %s3982_s18 = smov 0   ;;  %s3984_s19 = smov 0  }
   0x7   :  { %s3986_s20 = smov 0   ;;  %s3988_s21 = smov 0  }
   0x8 LB: > { %s4003_s22 = sadd.s32 4294967295, %s3939_s21   ;;  %s5880_s23 = sadd.s32 4294967294, %s3939_s21   ;;  %s3939_s21 = sphi %s3988_s21, %s6210_s21   ;;  %s3935_s20 = sphi %s3986_s20, %s6209_s20   ;;  %s3931_s19 = sphi %s3984_s19, %s6208_s19   ;;  %s3927_s18 = sphi %s3982_s18, %s6207_s18  }
   0x9   : > { %p46_p0 = scmp.ne.s32.totalorder %s3931_s19, %s3927_s18  ;;  %p5879_p1 = scmp.eq.s32.totalorder %s4003_s22, 0 }
   0xa   : > { %p118_p3 = scmp.eq.s32.totalorder %s5880_s23, 1  ;;  %p3060_p5 = scmp.ge.s32.totalorder %s3939_s21, 1 }
   0xb   : > { %p4014_p4 = por %p5879_p1, %p46_p0  ;;  %p177_p7 = scmp.lt.s32.totalorder %s3939_s21, 3 }
   0xc   : > { %p4019_p6 = por %p118_p3, %p46_p0  ;;  %s3941_s27 = smov [#allocation5]  }
   0xd   : > { %s5989_s24 = scalar_select %p4014_p4, 1, 0 }
   0xe   : > { %s5990_s25 = scalar_select %p4019_p6, 1, 0 }
   0xf   : > { %p4024_p8 = pnand %p3060_p5, %p177_p7  ;;  %s189_s28 = sshll.u32 %s3941_s27, 4  ;;  %s190_s28 = int_to_ptr.vmem [resolvable:$true] %s189_s28 }
  0x10   : > { %s4038_s30 = sadd.s32 1, %s3939_s21   ;;  %s33_s6 = sadd.s32 1, %s3935_s20 }
  0x11   : > { %s5991_s26 = scalar_select %p4024_p8, 1, 0 }
  0x12   : > { %p3636_p9 = pneg %p4024_p8  ;;  %s30_s7 = ssub.s32 %s3939_s21, %s4038_s30 }
  0x13   : > { %s3772_s8 = scalar_lea.vmem %s190_s28, 2048  ;;  %p3780_p5 = scmp.lt.s32.totalorder %s190_s28, %s190_s28 }
  0x14   : > { %p4033_p11 = pnand %p3636_p9, %p5879_p1  ;;  %p3773_p13 = scmp.ne.s32.totalorder %s190_s28, %s3772_s8 }
  0x15   : > { %p3781_p7 = scmp.lt.s32.totalorder %s3772_s8, %s3772_s8 }
  0x16   : > { %p3763_p12 = pneg %p4033_p11 }
  0x17   : > { %p3782_p10 = por %p3781_p7, %p3780_p5 }
  0x18   : > { %p3775_p0 = pnand %p3773_p13, %p3763_p12 }
  0x1a   : > { %p3776_p3 = pneg %p3775_p0 }
  0x1c   : > { %p3783_p2 = pnand %p3782_p10, %p3776_p3 }
  0x1e   : > { %3786 = shalt.err (!%p3783_p2)
}
  0x1f   : > { %s5881_s9 = smov 128   ;;  %s3943_s10 = smov 8  }
  0x20   : > { %3639 = dma.hbm_to_vmem [thread:$0]  (!%p4033_p11), %s5874_s1, 2048, %s190_s28, [#allocation6], %s5881_s9, %s5881_s9, %s3943_s10  }
  0x21   : > { %p31_p2 = scmp.eq.s32.totalorder %s30_s7, 0  ;;  %p40_p9 = scmp.ne.s32.totalorder %s3935_s20, %s3931_s19 }
  0x22   : > { %p41_p10 = scmp.eq.s32.totalorder %s3939_s21, 0  ;;  %p3655_p12 = scmp.lt.s32.totalorder %s3939_s21, 2 }
  0x23   : > { %s4058_s13 = scalar_select %p31_p2, %s3935_s20, %s33_s6  }
  0x24   : > { %p42_p13 = por %p41_p10, %p40_p9  ;;  %p5993_p0 = scmp.eq.s32.totalorder %s4003_s22, 1 }
  0x25   : > { %s206_s15 = sand.u32 1, %s3935_s20   ;;  %s3206_s16 = sshll.u32 %s3939_s21, 13 }
  0x26   : > { %p4062_p3 = por %p5993_p0, %p40_p9  ;;  %s3063_s17 = sshll.u32 %s206_s15, 9 }
  0x27   : > { %s4071_s8 = scalar_lea.hbm %s5873_s0, %s3206_s16  ;;  %s210_s28 = scalar_lea.vmem [#allocation2], %s3063_s17 }
  0x28   : > { %s5994_s14 = scalar_select %p4062_p3, 1, 0 }
  0x29   : > { %s217_s6 = sshll.u32 %s210_s28, 4  ;;  %p4073_p11 = pnand %p3655_p12, %p42_p13  ;;  %s4077_s6 = int_to_ptr.vmem [resolvable:$true] %s217_s6 }
  0x2a   : > { %s4079_s11 = scalar_lea.sflag [#allocation3], %s206_s15  ;;  %s3787_s12 = scalar_lea.hbm %s4071_s8, 8192 }
  0x2b   : > { %p3788_p5 = scmp.ne.s32.totalorder %s4071_s8, %s3787_s12  ;;  %p3789_p7 = pneg %p4073_p11 }
  0x2c   : > { %s3792_s17 = scalar_lea.hbm %s5873_s0, 16384  ;;  %p3793_p10 = scmp.lt.s32.totalorder %s4071_s8, %s5873_s0 }
  0x2d   : > { %p3790_p2 = pnand %p3789_p7, %p3788_p5  ;;  %p3794_p12 = scmp.lt.s32.totalorder %s3792_s17, %s3787_s12 }
  0x2f   : > { %p3791_p9 = pneg %p3790_p2  ;;  %p3795_p13 = por %p3794_p12, %p3793_p10 }
  0x31   : > { %p3796_p0 = pnand %p3795_p13, %p3791_p9 }
  0x33   : > { %3799 = shalt.err (!%p3796_p0)
}
  0x34   : > { %s3800_s15 = scalar_lea.vmem %s4077_s6, 8192  ;;  %s3944_s23 = smov [#allocation2]  }
  0x35   : > { %p3801_p1 = scmp.ne.s32.totalorder %s4077_s6, %s3800_s15  ;;  %s3805_s9 = sshll.u32 %s3944_s23, 4  ;;  %s3806_s9 = int_to_ptr.vmem [resolvable:$false] %s3805_s9 }
  0x36   : > { %s3807_s16 = scalar_lea.vmem %s3806_s9, 16384  ;;  %p3808_p2 = scmp.lt.s32.totalorder %s4077_s6, %s3806_s9 }
  0x37   : > { %p3803_p6 = pnand %p3801_p1, %p3789_p7  ;;  %p3809_p3 = scmp.lt.s32.totalorder %s3807_s16, %s3800_s15 }
  0x39   : > { %p3804_p5 = pneg %p3803_p6  ;;  %p3810_p4 = por %p3809_p3, %p3808_p2 }
  0x3b   : > { %p3811_p8 = pnand %p3810_p4, %p3804_p5 }
  0x3d   : > { %3814 = shalt.err (!%p3811_p8)
}
  0x3e   : > { %s5996_s12 = smov 128   ;;  %p5997_p1 = scmp.ne.s32.totalorder %s5991_s26, 0 }
  0x3f   : > { %3643 = dma.hbm_to_vmem [thread:$0]  (!%p4073_p11), %s4071_s8, 8192, %s4077_s6, %s4079_s11, %s5996_s12, %s5996_s12, %s3943_s10  }
  0x40   : > { %229 = sbr.rel (%p5997_p1) target bundleno = 1254 (0x4e6), region = 32 }
  0x45   : > { %s4106_s23 = sand.u32 1, %s3931_s19   ;;  %p5998_p4 = scmp.ne.s32.totalorder %s5989_s24, 0 }
  0x46   : > { %s3067_s9 = sshll.u32 %s4106_s23, 9  ;;  %s232_s27 = scalar_lea.sflag [#allocation3], %s4106_s23 }
  0x47   : > { %s4112_s7 = scalar_lea.vmem [#allocation2], %s3067_s9 }
  0x48   : > { %3910 = dma.done.wait (%p5998_p4), %s232_s27, 8192  }
  0x49   : > { %3912 = vsyncadd (%p5998_p4), %s232_s27, 4294959104  ;;  %p5999_p6 = scmp.eq.s32.totalorder %s4003_s22, 0 }
  0x4b   : > { %3914 = dma.done.wait (%p5999_p6), [#allocation6], 2048   ;;  %p6000_p8 = pmov %p5999_p6 }
  0x4c   : > { %v355_v0 = vld [vmem:[#allocation5 + $0x78] sm:$0xff]  ;;  %v354_v1 = vld [vmem:[#allocation5 + $0x70] sm:$0xff]  ;;  %v353_v2 = vld [vmem:[#allocation5 + $0x68] sm:$0xff]  ;;  %s5589_s10 = scalar_lea.vmem [#allocation7], %s3067_s9  ;;  %s273_s8 = scalar_lea.vmem [#allocation10], %s4106_s23 }
  0x4d   : > { %3916 = vsyncadd (%p6000_p8), [#allocation6], 4294965248  ;;  %3368 = vmatprep.subr.mxu0 %v355_v0  ;;  %3496 = vmatprep.subr.mxu1 %v355_v0  ;;  %v276_v3 = vld [vmem:[%s4112_s7] sm:$0xff]  ;;  %v351_v5 = vld [vmem:[#allocation5 + $0x58] sm:$0xff]  ;;  %s3207_s6 = sshll.u32 %s4003_s22, 13  ;;  %s2897_s11 = sshll.u32 %s5589_s10, 4  ;;  %s5761_s11 = int_to_ptr.vmem [resolvable:$true] %s2897_s11 }
  0x4e   : > { %3369 = vmatpush3.xpose.msra.mxu0 %v355_v0  ;;  %3497 = vmatpush3.msra.mxu1 %v355_v0  ;;  %v352_v4 = vld [vmem:[#allocation5 + $0x60] sm:$0xff]  ;;  %v350_v6 = vld [vmem:[#allocation5 + $0x50] sm:$0xff]  ;;  %v349_v7 = vld [vmem:[#allocation5 + $0x48] sm:$0xff]  ;;  %s5759_s28 = scalar_lea.hbm %s5876_s3, %s3207_s6  ;;  %s2876_s15 = scalar_lea.sflag [#allocation4], %s4106_s23 }
  0x4f   : > { %3370 = vmatprep.subr.mxu0 %v354_v1  ;;  %3498 = vmatprep.subr.mxu1 %v354_v1  ;;  %v348_v8 = vld [vmem:[#allocation5 + $0x40] sm:$0xff]  ;;  %v347_v9 = vld [vmem:[#allocation5 + $0x38] sm:$0xff]  ;;  %v346_v10 = vld [vmem:[#allocation5 + $0x30] sm:$0xff]  ;;  %s3815_s16 = scalar_lea.vmem %s5761_s11, 8192  ;;  %p6203_p11 = scmp.ne.s32.totalorder %s5994_s14, 0 }
  0x50   : > { %3499 = vmatpush3.msra.mxu1 %v354_v1  ;;  %3400 = vmatprep.mubr.f32.mxu0 %v276_v3  ;;  %v345_v11 = vld [vmem:[#allocation5 + $0x28] sm:$0xff]  ;;  %v344_v12 = vld [vmem:[#allocation5 + $0x20] sm:$0xff]  ;;  %v343_v13 = vld [vmem:[#allocation5 + $0x18] sm:$0xff]  ;;  %p3816_p3 = scmp.ne.s32.totalorder %s5761_s11, %s3815_s16  ;;  %s3947_s12 = smov [#allocation7]  }
  0x51   : > { %3500 = vmatprep.subr.mxu1 %v353_v2  ;;  %v342_v14 = vld [vmem:[#allocation5 + $0x10] sm:$0xff]  ;;  %v341_v15 = vld [vmem:[#allocation5 + $0x8] sm:$0xff]  ;;  %v340_v16 = vld [vmem:[#allocation5] sm:$0xff]  ;;  %s3819_s9 = sshll.u32 %s3947_s12, 4  ;;  %s3820_s9 = int_to_ptr.vmem [resolvable:$false] %s3819_s9 }
  0x52   : > { %3371 = vmatpush3.xpose.msra.mxu0 %v354_v1  ;;  %3501 = vmatpush3.msra.mxu1 %v353_v2  ;;  %v277_v17 = vld [vmem:[%s4112_s7 + $0x8] sm:$0xff]  ;;  %v278_v18 = vld [vmem:[%s4112_s7 + $0x10] sm:$0xff]  ;;  %v279_v19 = vld [vmem:[%s4112_s7 + $0x18] sm:$0xff]  ;;  %p3817_p7 = pnand %p3816_p3, %p6203_p11  ;;  %s3821_s27 = scalar_lea.vmem %s3820_s9, 16384 }
  0x53   : > { %3372 = vmatprep.subr.mxu0 %v353_v2  ;;  %3502 = vmatprep.subr.mxu1 %v352_v4  ;;  %v280_v20 = vld [vmem:[%s4112_s7 + $0x20] sm:$0xff]  ;;  %v281_v21 = vld [vmem:[%s4112_s7 + $0x28] sm:$0xff]  ;;  %v282_v22 = vld [vmem:[%s4112_s7 + $0x30] sm:$0xff]  ;;  %p3822_p10 = scmp.lt.s32.totalorder %s5761_s11, %s3820_s9  ;;  %p3823_p12 = scmp.lt.s32.totalorder %s3821_s27, %s3815_s16 }
  0x54   : > { %3503 = vmatpush3.msra.mxu1 %v352_v4  ;;  %v283_v23 = vld [vmem:[%s4112_s7 + $0x38] sm:$0xff]  ;;  %v284_v24 = vld [vmem:[%s4112_s7 + $0x40] sm:$0xff]  ;;  %v285_v25 = vld [vmem:[%s4112_s7 + $0x48] sm:$0xff]  ;;  %p3818_p9 = pneg %p3817_p7 }
  0x55   : > { %3504 = vmatprep.subr.mxu1 %v351_v5  ;;  %v286_v26 = vld [vmem:[%s4112_s7 + $0x50] sm:$0xff]  ;;  %v287_v27 = vld [vmem:[%s4112_s7 + $0x58] sm:$0xff]  ;;  %v288_v28 = vld [vmem:[%s4112_s7 + $0x60] sm:$0xff]  ;;  %p3824_p13 = por %p3823_p12, %p3822_p10 }
  0x56   : > { %3373 = vmatpush3.xpose.msra.mxu0 %v353_v2  ;;  %3505 = vmatpush3.msra.mxu1 %v351_v5  ;;  %v289_v29 = vld [vmem:[%s4112_s7 + $0x68] sm:$0xff]  ;;  %v290_v30 = vld [vmem:[%s4112_s7 + $0x70] sm:$0xff]  ;;  %v291_v31 = vld [vmem:[%s4112_s7 + $0x78] sm:$0xff] }
  0x57   : > { %3374 = vmatprep.subr.mxu0 %v352_v4  ;;  %3506 = vmatprep.subr.mxu1 %v350_v6  ;;  %v292_v32 = vld [vmem:[%s4112_s7 + $0x80] sm:$0xff]  ;;  %v293_v33 = vld [vmem:[%s4112_s7 + $0x88] sm:$0xff]  ;;  %v294_v34 = vld [vmem:[%s4112_s7 + $0x90] sm:$0xff]  ;;  %p3825_p0 = pnand %p3824_p13, %p3818_p9 }
  0x58   : > { %3507 = vmatpush3.msra.mxu1 %v350_v6  ;;  %v295_v35 = vld [vmem:[%s4112_s7 + $0x98] sm:$0xff]  ;;  %v296_v36 = vld [vmem:[%s4112_s7 + $0xa0] sm:$0xff]  ;;  %v297_v37 = vld [vmem:[%s4112_s7 + $0xa8] sm:$0xff] }
  0x59   : > { %3508 = vmatprep.subr.mxu1 %v349_v7  ;;  %v298_v38 = vld [vmem:[%s4112_s7 + $0xb0] sm:$0xff]  ;;  %v299_v39 = vld [vmem:[%s4112_s7 + $0xb8] sm:$0xff]  ;;  %v300_v40 = vld [vmem:[%s4112_s7 + $0xc0] sm:$0xff] }
  0x5a   : > { %3375 = vmatpush3.xpose.msra.mxu0 %v352_v4  ;;  %3509 = vmatpush3.msra.mxu1 %v349_v7  ;;  %v301_v41 = vld [vmem:[%s4112_s7 + $0xc8] sm:$0xff]  ;;  %v302_v42 = vld [vmem:[%s4112_s7 + $0xd0] sm:$0xff]  ;;  %v303_v43 = vld [vmem:[%s4112_s7 + $0xd8] sm:$0xff] }
  0x5b   : > { %3376 = vmatprep.subr.mxu0 %v351_v5  ;;  %3510 = vmatprep.subr.mxu1 %v348_v8  ;;  %v304_v44 = vld [vmem:[%s4112_s7 + $0xe0] sm:$0xff]  ;;  %v305_v45 = vld [vmem:[%s4112_s7 + $0xe8] sm:$0xff]  ;;  %v306_v46 = vld [vmem:[%s4112_s7 + $0xf0] sm:$0xff] }
  0x5c   : > { %3511 = vmatpush3.msra.mxu1 %v348_v8  ;;  %v307_v47 = vld [vmem:[%s4112_s7 + $0xf8] sm:$0xff]  ;;  %v308_v48 = vld [vmem:[%s4112_s7 + $0x100] sm:$0xff]  ;;  %v309_v49 = vld [vmem:[%s4112_s7 + $0x108] sm:$0xff] }
  0x5d   : > { %3512 = vmatprep.subr.mxu1 %v347_v9  ;;  %v310_v50 = vld [vmem:[%s4112_s7 + $0x110] sm:$0xff]  ;;  %v311_v51 = vld [vmem:[%s4112_s7 + $0x118] sm:$0xff]  ;;  %v312_v52 = vld [vmem:[%s4112_s7 + $0x120] sm:$0xff] }
  0x5e   : > { %3377 = vmatpush3.xpose.msra.mxu0 %v351_v5  ;;  %3513 = vmatpush3.msra.mxu1 %v347_v9  ;;  %v313_v53 = vld [vmem:[%s4112_s7 + $0x128] sm:$0xff]  ;;  %v314_v54 = vld [vmem:[%s4112_s7 + $0x130] sm:$0xff]  ;;  %v315_v55 = vld [vmem:[%s4112_s7 + $0x138] sm:$0xff] }
  0x5f   : > { %3378 = vmatprep.subr.mxu0 %v350_v6  ;;  %3514 = vmatprep.subr.mxu1 %v346_v10  ;;  %v316_v56 = vld [vmem:[%s4112_s7 + $0x140] sm:$0xff]  ;;  %v317_v57 = vld [vmem:[%s4112_s7 + $0x148] sm:$0xff]  ;;  %v318_v58 = vld [vmem:[%s4112_s7 + $0x150] sm:$0xff] }
  0x60   : > { %3515 = vmatpush3.msra.mxu1 %v346_v10  ;;  %v319_v59 = vld [vmem:[%s4112_s7 + $0x158] sm:$0xff]  ;;  %v320_v60 = vld [vmem:[%s4112_s7 + $0x160] sm:$0xff]  ;;  %v321_v61 = vld [vmem:[%s4112_s7 + $0x168] sm:$0xff] }
  0x61   : > { %3516 = vmatprep.subr.mxu1 %v345_v11  ;;  %v322_v62 = vld [vmem:[%s4112_s7 + $0x170] sm:$0xff]  ;;  %v323_v63 = vld [vmem:[%s4112_s7 + $0x178] sm:$0xff]  ;;  %v324_v0 = vld [vmem:[%s4112_s7 + $0x180] sm:$0xff] }
  0x62   : > { %3379 = vmatpush3.xpose.msra.mxu0 %v350_v6  ;;  %3517 = vmatpush3.msra.mxu1 %v345_v11  ;;  %v325_v1 = vld [vmem:[%s4112_s7 + $0x188] sm:$0xff]  ;;  %v326_v2 = vld [vmem:[%s4112_s7 + $0x190] sm:$0xff]  ;;  %v327_v3 = vld [vmem:[%s4112_s7 + $0x198] sm:$0xff] }
  0x63   : > { %3380 = vmatprep.subr.mxu0 %v349_v7  ;;  %3518 = vmatprep.subr.mxu1 %v344_v12  ;;  %v328_v4 = vld [vmem:[%s4112_s7 + $0x1a0] sm:$0xff]  ;;  %v329_v5 = vld [vmem:[%s4112_s7 + $0x1a8] sm:$0xff]  ;;  %v330_v6 = vld [vmem:[%s4112_s7 + $0x1b0] sm:$0xff] }
  0x64   : > { %3519 = vmatpush3.msra.mxu1 %v344_v12 }
  0x65   : > { %3520 = vmatprep.subr.mxu1 %v343_v13 }
  0x66   : > { %3381 = vmatpush3.xpose.msra.mxu0 %v349_v7  ;;  %3521 = vmatpush3.msra.mxu1 %v343_v13  ;;  %v331_v7 = vld [vmem:[%s4112_s7 + $0x1b8] sm:$0xff] }
  0x67   : > { %3382 = vmatprep.subr.mxu0 %v348_v8  ;;  %3522 = vmatprep.subr.mxu1 %v342_v14 }
  0x68   : > { %3523 = vmatpush3.msra.mxu1 %v342_v14 }
  0x69   : > { %3524 = vmatprep.subr.mxu1 %v341_v15 }
  0x6a   : > { %3383 = vmatpush3.xpose.msra.mxu0 %v348_v8  ;;  %3525 = vmatpush3.msra.mxu1 %v341_v15  ;;  %v332_v8 = vld [vmem:[%s4112_s7 + $0x1c0] sm:$0xff] }
  0x6b   : > { %3384 = vmatprep.subr.mxu0 %v347_v9  ;;  %3526 = vmatprep.subr.mxu1 %v340_v16 }
  0x6c   : > { %3527 = vmatpush3.msra.mxu1 %v340_v16 }
  0x6e   : > { %3385 = vmatpush3.xpose.msra.mxu0 %v347_v9  ;;  %v333_v9 = vld [vmem:[%s4112_s7 + $0x1c8] sm:$0xff] }
  0x6f   : > { %3386 = vmatprep.subr.mxu0 %v346_v10 }
  0x72   : > { %3387 = vmatpush3.xpose.msra.mxu0 %v346_v10  ;;  %v334_v10 = vld [vmem:[%s4112_s7 + $0x1d0] sm:$0xff] }
  0x73   : > { %3388 = vmatprep.subr.mxu0 %v345_v11 }
  0x76   : > { %3389 = vmatpush3.xpose.msra.mxu0 %v345_v11  ;;  %v335_v11 = vld [vmem:[%s4112_s7 + $0x1d8] sm:$0xff] }
  0x77   : > { %3390 = vmatprep.subr.mxu0 %v344_v12 }
  0x7a   : > { %3391 = vmatpush3.xpose.msra.mxu0 %v344_v12  ;;  %v336_v12 = vld [vmem:[%s4112_s7 + $0x1e0] sm:$0xff] }
  0x7b   : > { %3392 = vmatprep.subr.mxu0 %v343_v13 }
  0x7e   : > { %3393 = vmatpush3.xpose.msra.mxu0 %v343_v13  ;;  %v337_v13 = vld [vmem:[%s4112_s7 + $0x1e8] sm:$0xff] }
  0x7f   : > { %3394 = vmatprep.subr.mxu0 %v342_v14 }
  0x82   : > { %3395 = vmatpush3.xpose.msra.mxu0 %v342_v14  ;;  %v338_v14 = vld [vmem:[%s4112_s7 + $0x1f0] sm:$0xff] }
  0x83   : > { %3396 = vmatprep.subr.mxu0 %v341_v15 }
  0x86   : > { %3397 = vmatpush3.xpose.msra.mxu0 %v341_v15  ;;  %v339_v15 = vld [vmem:[%s4112_s7 + $0x1f8] sm:$0xff] }
  0x87   : > { %3398 = vmatprep.subr.mxu0 %v340_v16 }
  0x8a   : > { %3399 = vmatpush3.xpose.msra.mxu0 %v340_v16  ;;  %v4189_v16 = vld [vmem:[%s5875_s2] ss:$0 sm:$0xff] }
  0x8d   : > { %3401 = vmatmul.mubr.f32.vlgmr.msra.gmra.mxu0 %v277_v17 }
  0x8e   : > { %3403 = vmatprep.mubr.f32.mxu0 %v278_v18 }
  0x91   : > { %3404 = vmatmul.mubr.f32.gmra.mxu0 %v279_v19 }
  0x92   : > { %3406 = vmatprep.mubr.f32.mxu0 %v280_v20 }
  0x95   : > { %3407 = vmatmul.mubr.f32.gmra.mxu0 %v281_v21 }
  0x96   : > { %3409 = vmatprep.mubr.f32.mxu0 %v282_v22 }
  0x99   : > { %3410 = vmatmul.mubr.f32.gmra.mxu0 %v283_v23 }
  0x9a   : > { %3412 = vmatprep.mubr.f32.mxu0 %v284_v24 }
  0x9d   : > { %3413 = vmatmul.mubr.f32.gmra.mxu0 %v285_v25 }
  0x9e   : > { %3415 = vmatprep.mubr.f32.mxu0 %v286_v26 }
  0xa1   : > { %3416 = vmatmul.mubr.f32.gmra.mxu0 %v287_v27 }
  0xa2   : > { %3418 = vmatprep.mubr.f32.mxu0 %v288_v28 }
  0xa5   : > { %3419 = vmatmul.mubr.f32.gmra.mxu0 %v289_v29 }
  0xa6   : > { %3421 = vmatprep.mubr.f32.mxu0 %v290_v30 }
  0xa9   : > { %3422 = vmatmul.mubr.f32.gmra.mxu0 %v291_v31 }
  0xaa   : > { %3424 = vmatprep.mubr.f32.mxu0 %v292_v32 }
  0xad   : > { %3425 = vmatmul.mubr.f32.gmra.mxu0 %v293_v33 }
  0xae   : > { %3427 = vmatprep.mubr.f32.mxu0 %v294_v34 }
  0xb1   : > { %3428 = vmatmul.mubr.f32.gmra.mxu0 %v295_v35 }
  0xb2   : > { %3430 = vmatprep.mubr.f32.mxu0 %v296_v36 }
  0xb5   : > { %3431 = vmatmul.mubr.f32.gmra.mxu0 %v297_v37 }
  0xb6   : > { %3433 = vmatprep.mubr.f32.mxu0 %v298_v38 }
  0xb9   : > { %3434 = vmatmul.mubr.f32.gmra.mxu0 %v299_v39 }
  0xba   : > { %3436 = vmatprep.mubr.f32.mxu0 %v300_v40 }
  0xbd   : > { %3437 = vmatmul.mubr.f32.gmra.mxu0 %v301_v41 }
  0xbe   : > { %3439 = vmatprep.mubr.f32.mxu0 %v302_v42 }
  0xc1   : > { %3440 = vmatmul.mubr.f32.gmra.mxu0 %v303_v43 }
  0xc2   : > { %3442 = vmatprep.mubr.f32.mxu0 %v304_v44 }
  0xc5   : > { %3443 = vmatmul.mubr.f32.gmra.mxu0 %v305_v45 }
  0xc6   : > { %3445 = vmatprep.mubr.f32.mxu0 %v306_v46 }
  0xc9   : > { %3446 = vmatmul.mubr.f32.gmra.mxu0 %v307_v47 }
  0xca   : > { %3448 = vmatprep.mubr.f32.mxu0 %v308_v48 }
  0xcd   : > { %3449 = vmatmul.mubr.f32.gmra.mxu0 %v309_v49 }
  0xce   : > { %3451 = vmatprep.mubr.f32.mxu0 %v310_v50 }
  0xd1   : > { %3452 = vmatmul.mubr.f32.gmra.mxu0 %v311_v51 }
  0xd2   : > { %3454 = vmatprep.mubr.f32.mxu0 %v312_v52 }
  0xd5   : > { %3455 = vmatmul.mubr.f32.gmra.mxu0 %v313_v53 }
  0xd6   : > { %3457 = vmatprep.mubr.f32.mxu0 %v314_v54 }
  0xd9   : > { %3458 = vmatmul.mubr.f32.gmra.mxu0 %v315_v55 }
  0xda   : > { %3460 = vmatprep.mubr.f32.mxu0 %v316_v56 }
  0xdd   : > { %3461 = vmatmul.mubr.f32.gmra.mxu0 %v317_v57 }
  0xde   : > { %3463 = vmatprep.mubr.f32.mxu0 %v318_v58 }
  0xe1   : > { %3464 = vmatmul.mubr.f32.gmra.mxu0 %v319_v59 }
  0xe2   : > { %3466 = vmatprep.mubr.f32.mxu0 %v320_v60 }
  0xe5   : > { %3467 = vmatmul.mubr.f32.gmra.mxu0 %v321_v61 }
  0xe6   : > { %3469 = vmatprep.mubr.f32.mxu0 %v322_v62 }
  0xe9   : > { %3470 = vmatmul.mubr.f32.gmra.mxu0 %v323_v63 }
  0xea   : > { %3472 = vmatprep.mubr.f32.mxu0 %v324_v0 }
  0xed   : > { %3473 = vmatmul.mubr.f32.gmra.mxu0 %v325_v1 }
  0xee   : > { %3475 = vmatprep.mubr.f32.mxu0 %v326_v2 }
  0xf1   : > { %3476 = vmatmul.mubr.f32.gmra.mxu0 %v327_v3 }
  0xf2   : > { %3478 = vmatprep.mubr.f32.mxu0 %v328_v4 }
  0xf5   : > { %3479 = vmatmul.mubr.f32.gmra.mxu0 %v329_v5 }
  0xf6   : > { %3481 = vmatprep.mubr.f32.mxu0 %v330_v6 }
  0xf9   : > { %3482 = vmatmul.mubr.f32.gmra.mxu0 %v331_v7 }
  0xfa   : > { %3484 = vmatprep.mubr.f32.mxu0 %v332_v8 }
  0xfd   : > { %3485 = vmatmul.mubr.f32.gmra.mxu0 %v333_v9 }
  0xfe   : > { %3487 = vmatprep.mubr.f32.mxu0 %v334_v10 }
 0x101   : > { %3488 = vmatmul.mubr.f32.gmra.mxu0 %v335_v11 }
 0x102   : > { %3490 = vmatprep.mubr.f32.mxu0 %v336_v12 }
 0x105   : > { %3491 = vmatmul.mubr.f32.gmra.mxu0 %v337_v13 }
 0x106   : > { %3493 = vmatprep.mubr.f32.mxu0 %v338_v14 }
 0x109   : > { %3494 = vmatmul.mubr.f32.gmra.mxu0 %v339_v15 }
 0x14d   : > { %v3402_v17 = vpop.f32.mrf.mxu0 }
 0x14e   : > { %v4192_v18 = vsub.f32 %v4189_v16, %v3402_v17 }
 0x14f   : > { %v422_v19 = vpop.f32.mrf.mxu0 }
 0x150   : > { %814 = vmin.xlane.f32.xlu0 %v4192_v18  ;;  %v4196_v21 = vsub.f32 %v4189_v16, %v422_v19 }
 0x151   : > { %v3405_v20 = vpop.f32.mrf.mxu0 }
 0x152   : > { %v4199_v22 = vsub.f32 %v4189_v16, %v3405_v20 }
 0x153   : > { %v432_v23 = vpop.f32.mrf.mxu0 }
 0x154   : > { %v4202_v24 = vsub.f32 %v4189_v16, %v432_v23  ;;  %812 = vmin.xlane.f32.xlu0 %v4196_v21  ;;  %818 = vmin.xlane.f32.xlu1 %v4199_v22 }
 0x155   : > { %v3408_v25 = vpop.f32.mrf.mxu0 }
 0x156   : > { %v4207_v27 = vsub.f32 %v4189_v16, %v3408_v25 }
 0x157   : > { %v442_v26 = vpop.f32.mrf.mxu0 }
 0x158   : > { %v4210_v28 = vsub.f32 %v4189_v16, %v442_v26  ;;  %816 = vmin.xlane.f32.xlu1 %v4202_v24 }
 0x159   : > { %v3411_v29 = vpop.f32.mrf.mxu0 }
 0x15a   : > { %820 = vmin.xlane.f32.xlu0 %v4210_v28  ;;  %v4215_v31 = vsub.f32 %v4189_v16, %v3411_v29 }
 0x15b   : > { %v452_v30 = vpop.f32.mrf.mxu0 }
 0x15c   : > { %v4218_v32 = vsub.f32 %v4189_v16, %v452_v30  ;;  %822 = vmin.xlane.f32.xlu1 %v4207_v27 }
 0x15d   : > { %v3414_v33 = vpop.f32.mrf.mxu0 }
 0x15e   : > { %824 = vmin.xlane.f32.xlu0 %v4218_v32  ;;  %v4223_v35 = vsub.f32 %v4189_v16, %v3414_v33 }
 0x15f   : > { %v462_v34 = vpop.f32.mrf.mxu0 }
 0x160   : > { %v4226_v36 = vsub.f32 %v4189_v16, %v462_v34  ;;  %826 = vmin.xlane.f32.xlu1 %v4215_v31 }
 0x161   : > { %v3417_v37 = vpop.f32.mrf.mxu0 }
 0x162   : > { %828 = vmin.xlane.f32.xlu0 %v4226_v36  ;;  %v4231_v39 = vsub.f32 %v4189_v16, %v3417_v37 }
 0x163   : > { %v472_v38 = vpop.f32.mrf.mxu0 }
 0x164   : > { %v4234_v40 = vsub.f32 %v4189_v16, %v472_v38  ;;  %830 = vmin.xlane.f32.xlu1 %v4223_v35 }
 0x165   : > { %v3420_v41 = vpop.f32.mrf.mxu0 }
 0x166   : > { %832 = vmin.xlane.f32.xlu0 %v4234_v40  ;;  %v4239_v43 = vsub.f32 %v4189_v16, %v3420_v41 }
 0x167   : > { %v482_v42 = vpop.f32.mrf.mxu0 }
 0x168   : > { %v4242_v44 = vsub.f32 %v4189_v16, %v482_v42  ;;  %834 = vmin.xlane.f32.xlu1 %v4231_v39 }
 0x169   : > { %v3423_v45 = vpop.f32.mrf.mxu0 }
 0x16a   : > { %836 = vmin.xlane.f32.xlu0 %v4242_v44  ;;  %v4247_v47 = vsub.f32 %v4189_v16, %v3423_v45 }
 0x16b   : > { %v492_v46 = vpop.f32.mrf.mxu0 }
 0x16c   : > { %v4250_v48 = vsub.f32 %v4189_v16, %v492_v46  ;;  %838 = vmin.xlane.f32.xlu1 %v4239_v43 }
 0x16d   : > { %v3426_v49 = vpop.f32.mrf.mxu0 }
 0x16e   : > { %840 = vmin.xlane.f32.xlu0 %v4250_v48  ;;  %v4255_v51 = vsub.f32 %v4189_v16, %v3426_v49 }
 0x16f   : > { %v502_v50 = vpop.f32.mrf.mxu0 }
 0x170   : > { %v4258_v52 = vsub.f32 %v4189_v16, %v502_v50  ;;  %842 = vmin.xlane.f32.xlu1 %v4247_v47 }
 0x171   : > { %v3429_v53 = vpop.f32.mrf.mxu0 }
 0x172   : > { %844 = vmin.xlane.f32.xlu0 %v4258_v52  ;;  %v4263_v55 = vsub.f32 %v4189_v16, %v3429_v53 }
 0x173   : > { %v512_v54 = vpop.f32.mrf.mxu0 }
 0x174   : > { %v4266_v56 = vsub.f32 %v4189_v16, %v512_v54  ;;  %846 = vmin.xlane.f32.xlu1 %v4255_v51 }
 0x175   : > { %v3432_v57 = vpop.f32.mrf.mxu0 }
 0x176   : > { %848 = vmin.xlane.f32.xlu0 %v4266_v56  ;;  %v4271_v59 = vsub.f32 %v4189_v16, %v3432_v57 }
 0x177   : > { %v522_v58 = vpop.f32.mrf.mxu0 }
 0x178   : > { %v4274_v60 = vsub.f32 %v4189_v16, %v522_v58  ;;  %850 = vmin.xlane.f32.xlu1 %v4263_v55 }
 0x179   : > { %v3435_v61 = vpop.f32.mrf.mxu0 }
 0x17a   : > { %852 = vmin.xlane.f32.xlu0 %v4274_v60  ;;  %v4279_v63 = vsub.f32 %v4189_v16, %v3435_v61 }
 0x17b   : > { %v532_v62 = vpop.f32.mrf.mxu0 }
 0x17c   : > { %v4282_v0 = vsub.f32 %v4189_v16, %v532_v62  ;;  %854 = vmin.xlane.f32.xlu1 %v4271_v59 }
 0x17d   : > { %v3438_v1 = vpop.f32.mrf.mxu0 }
 0x17e   : > { %856 = vmin.xlane.f32.xlu0 %v4282_v0  ;;  %v4287_v3 = vsub.f32 %v4189_v16, %v3438_v1 }
 0x17f   : > { %v542_v2 = vpop.f32.mrf.mxu0 }
 0x180   : > { %v4290_v4 = vsub.f32 %v4189_v16, %v542_v2  ;;  %858 = vmin.xlane.f32.xlu1 %v4279_v63 }
 0x181   : > { %v3441_v5 = vpop.f32.mrf.mxu0 }
 0x182   : > { %860 = vmin.xlane.f32.xlu0 %v4290_v4  ;;  %v4295_v7 = vsub.f32 %v4189_v16, %v3441_v5 }
 0x183   : > { %v552_v6 = vpop.f32.mrf.mxu0 }
 0x184   : > { %v4298_v8 = vsub.f32 %v4189_v16, %v552_v6  ;;  %862 = vmin.xlane.f32.xlu1 %v4287_v3 }
 0x185   : > { %v3444_v9 = vpop.f32.mrf.mxu0 }
 0x186   : > { %864 = vmin.xlane.f32.xlu0 %v4298_v8  ;;  %v4303_v11 = vsub.f32 %v4189_v16, %v3444_v9 }
 0x187   : > { %v562_v10 = vpop.f32.mrf.mxu0 }
 0x188   : > { %v4306_v12 = vsub.f32 %v4189_v16, %v562_v10  ;;  %866 = vmin.xlane.f32.xlu1 %v4295_v7 }
 0x189   : > { %v3447_v13 = vpop.f32.mrf.mxu0 }
 0x18a   : > { %868 = vmin.xlane.f32.xlu0 %v4306_v12  ;;  %v4311_v15 = vsub.f32 %v4189_v16, %v3447_v13 }
 0x18b   : > { %v572_v14 = vpop.f32.mrf.mxu0 }
 0x18c   : > { %v4314_v17 = vsub.f32 %v4189_v16, %v572_v14  ;;  %870 = vmin.xlane.f32.xlu1 %v4303_v11 }
 0x18d   : > { %v3450_v19 = vpop.f32.mrf.mxu0 }
 0x18e   : > { %872 = vmin.xlane.f32.xlu0 %v4314_v17  ;;  %v4319_v23 = vsub.f32 %v4189_v16, %v3450_v19 }
 0x18f   : > { %v582_v20 = vpop.f32.mrf.mxu0 }
 0x190   : > { %v4322_v25 = vsub.f32 %v4189_v16, %v582_v20  ;;  %874 = vmin.xlane.f32.xlu1 %v4311_v15 }
 0x191   : > { %v3453_v26 = vpop.f32.mrf.mxu0 }
 0x192   : > { %876 = vmin.xlane.f32.xlu0 %v4322_v25  ;;  %v4327_v30 = vsub.f32 %v4189_v16, %v3453_v26 }
 0x193   : > { %v592_v29 = vpop.f32.mrf.mxu0 }
 0x194   : > { %v4330_v33 = vsub.f32 %v4189_v16, %v592_v29  ;;  %878 = vmin.xlane.f32.xlu1 %v4319_v23 }
 0x195   : > { %v3456_v34 = vpop.f32.mrf.mxu0 }
 0x196   : > { %880 = vmin.xlane.f32.xlu0 %v4330_v33  ;;  %v4335_v38 = vsub.f32 %v4189_v16, %v3456_v34 }
 0x197   : > { %v602_v37 = vpop.f32.mrf.mxu0 }
 0x198   : > { %v4338_v41 = vsub.f32 %v4189_v16, %v602_v37  ;;  %882 = vmin.xlane.f32.xlu1 %v4327_v30 }
 0x199   : > { %v3459_v42 = vpop.f32.mrf.mxu0 }
 0x19a   : > { %884 = vmin.xlane.f32.xlu0 %v4338_v41  ;;  %v4343_v45 = vsub.f32 %v4189_v16, %v3459_v42 }
 0x19b   : > { %v612_v46 = vpop.f32.mrf.mxu0 }
 0x19c   : > { %886 = vmin.xlane.f32.xlu1 %v4335_v38  ;;  %v4348_v49 = vsub.f32 %v4189_v16, %v612_v46 }
 0x19d   : > { %v3462_v50 = vpop.f32.mrf.mxu0 }
 0x19e   : > { %890 = vmin.xlane.f32.xlu0 %v4343_v45  ;;  %v4352_v53 = vsub.f32 %v4189_v16, %v3462_v50 }
 0x19f   : > { %v622_v54 = vpop.f32.mrf.mxu0 }
 0x1a0   : > { %v4356_v57 = vsub.f32 %v4189_v16, %v622_v54 }
 0x1a1   : > { %v3465_v58 = vpop.f32.mrf.mxu0 }
 0x1a2   : > { %888 = vmin.xlane.f32.xlu0 %v4348_v49  ;;  %v4360_v61 = vsub.f32 %v4189_v16, %v3465_v58 }
 0x1a3   : > { %v632_v62 = vpop.f32.mrf.mxu0 }
 0x1a4   : > { %v4364_v1 = vsub.f32 %v4189_v16, %v632_v62 }
 0x1a5   : > { %v3468_v2 = vpop.f32.mrf.mxu0 }
 0x1a6   : > { %894 = vmin.xlane.f32.xlu0 %v4352_v53  ;;  %v4368_v5 = vsub.f32 %v4189_v16, %v3468_v2  ;;  %v940_v2 = vlaneseq }
 0x1a7   : > { %v642_v6 = vpop.f32.mrf.mxu0 }
 0x1a8   : > { %v4372_v9 = vsub.f32 %v4189_v16, %v642_v6 }
 0x1a9   : > { %v3471_v10 = vpop.f32.mrf.mxu0 }
 0x1aa   : > { %892 = vmin.xlane.f32.xlu0 %v4356_v57  ;;  %v4376_v13 = vsub.f32 %v4189_v16, %v3471_v10  ;;  %v4406_v10 = vand.u32 127, %v940_v2 }
 0x1ab   : > { %v652_v14 = vpop.f32.mrf.mxu0 }
 0x1ac   : > { %6001 = vst [vmem:[#allocation15_spill] sm:$0xff] %v4376_v13  ;;  %v4380_v19 = vsub.f32 %v4189_v16, %v652_v14 }
 0x1ad   : > { %v3474_v20 = vpop.f32.mrf.mxu0 }
 0x1ae   : > { %898 = vmin.xlane.f32.xlu0 %v4360_v61  ;;  %6002 = vst [vmem:[#allocation16_spill] sm:$0xff] %v4380_v19  ;;  %v4384_v26 = vsub.f32 %v4189_v16, %v3474_v20 }
 0x1af   : > { %v662_v29 = vpop.f32.mrf.mxu0 }
 0x1b0   : > { %6003 = vst [vmem:[#allocation17_spill] sm:$0xff] %v4384_v26  ;;  %v4388_v34 = vsub.f32 %v4189_v16, %v662_v29 }
 0x1b1   : > { %v3477_v37 = vpop.f32.mrf.mxu0 }
 0x1b2   : > { %896 = vmin.xlane.f32.xlu0 %v4364_v1  ;;  %6004 = vst [vmem:[#allocation18_spill] sm:$0xff] %v4388_v34  ;;  %v4392_v42 = vsub.f32 %v4189_v16, %v3477_v37 }
 0x1b3   : > { %v672_v46 = vpop.f32.mrf.mxu0 }
 0x1b4   : > { %6005 = vst [vmem:[#allocation19_spill] sm:$0xff] %v4392_v42  ;;  %v4396_v50 = vsub.f32 %v4189_v16, %v672_v46 }
 0x1b5   : > { %v3480_v54 = vpop.f32.mrf.mxu0 }
 0x1b6   : > { %902 = vmin.xlane.f32.xlu0 %v4368_v5  ;;  %6006 = vst [vmem:[#allocation20_spill] sm:$0xff] %v4396_v50  ;;  %v4400_v58 = vsub.f32 %v4189_v16, %v3480_v54 }
 0x1b7   : > { %v682_v62 = vpop.f32.mrf.mxu0 }
 0x1b8   : > { %6007 = vst [vmem:[#allocation21_spill] sm:$0xff] %v4400_v58  ;;  %v4404_v6 = vsub.f32 %v4189_v16, %v682_v62 }
 0x1b9   : > { %v3483_v14 = vpop.f32.mrf.mxu0 }
 0x1ba   : > { %900 = vmin.xlane.f32.xlu0 %v4372_v9  ;;  %6008 = vst [vmem:[#allocation22_spill] sm:$0xff] %v4404_v6  ;;  %v4411_v29 = vsub.f32 %v4189_v16, %v3483_v14 }
 0x1bb   : > { %v692_v46 = vpop.f32.mrf.mxu0 }
 0x1bc   : > { %6009 = vst [vmem:[#allocation23_spill] sm:$0xff] %v4411_v29 }
 0x1be   : > { %906 = vmin.xlane.f32.xlu0 %v4376_v13 }
 0x1c2   : > { %904 = vmin.xlane.f32.xlu0 %v4380_v19 }
 0x1c6   : > { %910 = vmin.xlane.f32.xlu0 %v4384_v26 }
 0x1ca   : > { %908 = vmin.xlane.f32.xlu0 %v4388_v34 }
 0x1ce   : > { %914 = vmin.xlane.f32.xlu0 %v4392_v42 }
 0x1d2   : > { %912 = vmin.xlane.f32.xlu0 %v4396_v50 }
 0x1d6   : > { %918 = vmin.xlane.f32.xlu0 %v4400_v58 }
 0x1d9   : > { %v815_v20 = vpop.xlane.xlu0 %814 }
 0x1da   : > { %vm943_vm0 = vcmp.eq.f32.partialorder %v4192_v18, %v815_v20  ;;  %916 = vmin.xlane.f32.xlu0 %v4404_v6  ;;  %v4421_v18 = vsub.f32 %v4189_v16, %v692_v46  ;;  %v3486_v6 = vpop.f32.mrf.mxu0 }
 0x1db   : > { %v4414_v37 = vsel %vm943_vm0, %v4406_v10, 128 }
 0x1dc   : > { %v1085_v54 = vshra.s32 %v4414_v37, 16  ;;  %6010 = vst [vmem:[#allocation24_spill] sm:$0xff] %v4421_v18  ;;  %v702_v50 = vpop.f32.mrf.mxu0 }
 0x1dd   : > { %v813_v58 = vpop.xlane.xlu0 %812  ;;  %v819_v62 = vpop.xlane.xlu1 %818 }
 0x1de   : > { %vm942_vm1 = vcmp.eq.f32.partialorder %v4196_v21, %v813_v58  ;;  %vm945_vm2 = vcmp.eq.f32.partialorder %v4199_v22, %v819_v62  ;;  %922 = vmin.xlane.f32.xlu0 %v4411_v29  ;;  %v4423_v2 = vcvt.s32.f32 %v1085_v54  ;;  %v4436_v22 = vsub.f32 %v4189_v16, %v3486_v6  ;;  %v3489_v34 = vpop.f32.mrf.mxu0 }
 0x1df   : > { %v4426_v14 = vsel %vm942_vm1, %v4406_v10, 128  ;;  %v4429_v20 = vsel %vm945_vm2, %v4406_v10, 128 }
 0x1e0   : > { %1088 = vmin.xlane.f32.xlu1 %v4423_v2  ;;  %v1071_v21 = vshra.s32 %v4426_v14, 16  ;;  %6011 = vst [vmem:[#allocation25_spill] sm:$0xff] %v4436_v22  ;;  %v1113_v54 = vshra.s32 %v4429_v20, 16  ;;  %v712_v19 = vpop.f32.mrf.mxu0 }
 0x1e1   : > { %v817_v58 = vpop.xlane.xlu1 %816 }
 0x1e2   : > { %vm944_vm3 = vcmp.eq.f32.partialorder %v4202_v24, %v817_v58  ;;  %920 = vmin.xlane.f32.xlu0 %v4421_v18  ;;  %v4438_v46 = vcvt.s32.f32 %v1071_v21  ;;  %v4448_v24 = vsub.f32 %v4189_v16, %v702_v50  ;;  %v4450_v6 = vcvt.s32.f32 %v1113_v54  ;;  %v3492_v13 = vpop.f32.mrf.mxu0 }
 0x1e3   : > { %v4442_v62 = vsel %vm944_vm3, %v4406_v10, 128  ;;  %v821_v29 = vpop.xlane.xlu0 %820 }
 0x1e4   : > { %1074 = vmin.xlane.f32.xlu1 %v4438_v46  ;;  %6012 = vst [vmem:[#allocation26_spill] sm:$0xff] %v4448_v24  ;;  %v1099_v21 = vshra.s32 %v4442_v62, 16  ;;  %vm946_vm5 = vcmp.eq.f32.partialorder %v4210_v28, %v821_v29  ;;  %v4472_v28 = vsub.f32 %v4189_v16, %v712_v19 }
 0x1e5   : > { %v823_v42 = vpop.xlane.xlu1 %822  ;;  %v4466_v54 = vsel %vm946_vm5, %v4406_v10, 128 }
 0x1e6   : > { %vm947_vm4 = vcmp.eq.f32.partialorder %v4207_v27, %v823_v42  ;;  %926 = vmin.xlane.f32.xlu0 %v4436_v22  ;;  %v4460_v27 = vsub.f32 %v4189_v16, %v3489_v34  ;;  %v4462_v42 = vcvt.s32.f32 %v1099_v21  ;;  %6015 = vst [vmem:[#allocation29_spill] sm:$0xff] %v4466_v54  ;;  %6016 = vst [vmem:[#allocation30_spill] sm:$0xff] %v4472_v28  ;;  %v1127_v29 = vshra.s32 %v4466_v54, 16 }
 0x1e7   : > { %v4454_v58 = vsel %vm947_vm4, %v4406_v10, 128  ;;  %v825_v18 = vpop.xlane.xlu0 %824 }
 0x1e8   : > { %1116 = vmin.xlane.f32.xlu1 %v4450_v6  ;;  %6013 = vst [vmem:[#allocation27_spill] sm:$0xff] %v4460_v27  ;;  %6014 = vst [vmem:[#allocation28_spill] sm:$0xff] %v4462_v42  ;;  %v1141_v50 = vshra.s32 %v4454_v58, 16  ;;  %vm948_vm7 = vcmp.eq.f32.partialorder %v4218_v32, %v825_v18  ;;  %v4486_v19 = vcvt.s32.f32 %v1127_v29 }
 0x1e9   : > { %v827_v26 = vpop.xlane.xlu1 %826 }
 0x1ea   : > { %924 = vmin.xlane.f32.xlu0 %v4448_v24  ;;  %vm949_vm6 = vcmp.eq.f32.partialorder %v4215_v31, %v827_v26  ;;  %v4474_v34 = vcvt.s32.f32 %v1141_v50  ;;  %v4484_v26 = vsub.f32 %v4189_v16, %v3492_v13  ;;  %6019 = vst [vmem:[#allocation33_spill] sm:$0xff] %v4486_v19 }
 0x1eb   : > { %v829_v22 = vpop.xlane.xlu0 %828  ;;  %v4478_v21 = vsel %vm949_vm6, %v4406_v10, 128 }
 0x1ec   : > { %1102 = vmin.xlane.f32.xlu1 %v4462_v42  ;;  %6017 = vst [vmem:[#allocation31_spill] sm:$0xff] %v4478_v21  ;;  %6018 = vst [vmem:[#allocation32_spill] sm:$0xff] %v4484_v26  ;;  %v1169_v50 = vshra.s32 %v4478_v21, 16  ;;  %v722_v42 = vpop.f32.mrf.mxu0  ;;  %vm950_vm9 = vcmp.eq.f32.partialorder %v4226_v36, %v829_v22 }
 0x1ed   : > { %v831_v31 = vpop.xlane.xlu1 %830  ;;  %v4496_v32 = vsub.f32 %v4189_v16, %v722_v42 }
 0x1ee   : > { %930 = vmin.xlane.f32.xlu0 %v4460_v27  ;;  %v4490_v27 = vsel %vm948_vm7, %v4406_v10, 128  ;;  %vm951_vm8 = vcmp.eq.f32.partialorder %v4223_v35, %v831_v31  ;;  %v4498_v13 = vcvt.s32.f32 %v1169_v50  ;;  %v3495_v21 = vpop.f32.mrf.mxu0 }
 0x1ef   : > { %v833_v24 = vpop.xlane.xlu0 %832  ;;  %6020 = vst [vmem:[#allocation34_spill] sm:$0xff] %v4490_v27  ;;  %6021 = vst [vmem:[#allocation35_spill] sm:$0xff] %v4496_v32  ;;  %v1155_v18 = vshra.s32 %v4490_v27, 16  ;;  %v4502_v29 = vsel %vm951_vm8, %v4406_v10, 128  ;;  %v4508_v31 = vsub.f32 %v4189_v16, %v3495_v21 }
 0x1f0   : > { %1144 = vmin.xlane.f32.xlu1 %v4474_v34  ;;  %v1197_v50 = vshra.s32 %v4502_v29, 16  ;;  %vm952_vm11 = vcmp.eq.f32.partialorder %v4234_v40, %v833_v24 }
 0x1f1   : > { %v835_v35 = vpop.xlane.xlu1 %834  ;;  %6022 = vst [vmem:[#allocation36_spill] sm:$0xff] %v4508_v31  ;;  %v4510_v42 = vcvt.s32.f32 %v1155_v18 }
 0x1f2   : > { %928 = vmin.xlane.f32.xlu0 %v4472_v28  ;;  %vm953_vm10 = vcmp.eq.f32.partialorder %v4231_v39, %v835_v35  ;;  %v4524_v22 = vcvt.s32.f32 %v1197_v50 }
 0x1f3   : > { %v837_v54 = vpop.xlane.xlu0 %836  ;;  %v4528_v18 = vsel %vm953_vm10, %v4406_v10, 128 }
 0x1f4   : > { %1130 = vmin.xlane.f32.xlu1 %v4486_v19  ;;  %v732_v19 = vpop.f32.mrf.mxu0  ;;  %6024 = vst [vmem:[#allocation38_spill] sm:$0xff] %v4528_v18  ;;  %vm954_vm13 = vcmp.eq.f32.partialorder %v4242_v44, %v837_v54 }
 0x1f5   : > { %v4522_v36 = vsub.f32 %v4189_v16, %v732_v19  ;;  %v839_v39 = vpop.xlane.xlu1 %838  ;;  %v1225_v16 = vshra.s32 %v4528_v18, 16  ;;  %v4539_v19 = vsel %vm952_vm11, %v4406_v10, 128 }
 0x1f6   : > { %934 = vmin.xlane.f32.xlu0 %v4484_v26  ;;  %v4514_v26 = vsel %vm950_vm9, %v4406_v10, 128  ;;  %6025 = vst [vmem:[#allocation39_spill] sm:$0xff] %v4539_v19  ;;  %vm955_vm12 = vcmp.eq.f32.partialorder %v4239_v43, %v839_v39  ;;  %v1211_v40 = vshra.s32 %v4539_v19, 16  ;;  %v4559_v39 = vsel %vm954_vm13, %v4406_v10, 128 }
 0x1f7   : > { %v841_v28 = vpop.xlane.xlu0 %840  ;;  %6023 = vst [vmem:[#allocation37_spill] sm:$0xff] %v4522_v36  ;;  %v1183_v21 = vshra.s32 %v4514_v26, 16  ;;  %v4549_v24 = vsel %vm955_vm12, %v4406_v10, 128  ;;  %6029 = vst [vmem:[#allocation43_spill] sm:$0xff] %v4559_v39  ;;  %v1239_v44 = vshra.s32 %v4559_v39, 16 }
 0x1f8   : > { %1172 = vmin.xlane.f32.xlu1 %v4498_v13  ;;  %6027 = vst [vmem:[#allocation41_spill] sm:$0xff] %v4549_v24  ;;  %v4555_v18 = vcvt.s32.f32 %v1211_v40  ;;  %v1253_v43 = vshra.s32 %v4549_v24, 16  ;;  %vm956_vm15 = vcmp.eq.f32.partialorder %v4250_v48, %v841_v28 }
 0x1f9   : > { %v4535_v35 = vcvt.s32.f32 %v1183_v21  ;;  %v4582_v39 = vsel %vm956_vm15, %v4406_v10, 128 }
 0x1fa   : > { %932 = vmin.xlane.f32.xlu0 %v4496_v32  ;;  %6028 = vst [vmem:[#allocation42_spill] sm:$0xff] %v4555_v18  ;;  %v4565_v19 = vcvt.s32.f32 %v1253_v43 }
 0x1fb   : > { %v4516_v27 = vpop.xlane.xlu0 %844 }
 0x1fc   : > { %1158 = vmin.xlane.f32.xlu1 %v4510_v42  ;;  %vm958_vm3 = vcmp.eq.f32.partialorder %v4258_v52, %v4516_v27 }
 0x1fe   : > { %938 = vmin.xlane.f32.xlu0 %v4508_v31  ;;  %v4545_v31 = vcvt.s32.f32 %v1225_v16 }
 0x1ff   : > { %v4530_v32 = vpop.xlane.xlu0 %848 }
 0x200   : > { %1200 = vmin.xlane.f32.xlu1 %v4524_v22  ;;  %6026 = vst [vmem:[#allocation40_spill] sm:$0xff] %v4545_v31  ;;  %vm960_vm7 = vcmp.eq.f32.partialorder %v4266_v56, %v4530_v32 }
 0x202   : > { %936 = vmin.xlane.f32.xlu0 %v4522_v36  ;;  %v843_v36 = vpop.xlane.xlu1 %842 }
 0x203   : > { %v4541_v50 = vpop.xlane.xlu0 %852  ;;  %vm957_vm14 = vcmp.eq.f32.partialorder %v4247_v47, %v843_v36  ;;  %v4577_v47 = vcvt.s32.f32 %v1239_v44 }
 0x204   : > { %1186 = vmin.xlane.f32.xlu1 %v4535_v35  ;;  %v4569_v54 = vsel %vm957_vm14, %v4406_v10, 128  ;;  %vm962_vm10 = vcmp.eq.f32.partialorder %v4274_v60, %v4541_v50 }
 0x205   : > { %v1281_v43 = vshra.s32 %v4569_v54, 16 }
 0x206   : > { %v847_v24 = vpop.xlane.xlu1 %846 }
 0x207   : > { %v4551_v21 = vpop.xlane.xlu0 %856  ;;  %vm959_vm1 = vcmp.eq.f32.partialorder %v4255_v51, %v847_v24  ;;  %v4593_v28 = vcvt.s32.f32 %v1281_v43 }
 0x208   : > { %1228 = vmin.xlane.f32.xlu1 %v4545_v31  ;;  %vm964_vm12 = vcmp.eq.f32.partialorder %v4282_v0, %v4551_v21 }
 0x20a   : > { %v851_v51 = vpop.xlane.xlu1 %850 }
 0x20b   : > { %v4561_v16 = vpop.xlane.xlu0 %860  ;;  %vm961_vm5 = vcmp.eq.f32.partialorder %v4263_v55, %v851_v51 }
 0x20c   : > { %1214 = vmin.xlane.f32.xlu1 %v4555_v18  ;;  %v4631_v55 = vsel %vm961_vm5, %v4406_v10, 128  ;;  %vm966_vm14 = vcmp.eq.f32.partialorder %v4290_v4, %v4561_v16 }
 0x20e   : > { %v855_v27 = vpop.xlane.xlu1 %854 }
 0x20f   : > { %v865_v40 = vpop.xlane.xlu0 %864  ;;  %vm963_vm9 = vcmp.eq.f32.partialorder %v4271_v59, %v855_v27 }
 0x210   : > { %vm968_vm0 = vcmp.eq.f32.partialorder %v4298_v8, %v865_v40  ;;  %1256 = vmin.xlane.f32.xlu1 %v4565_v19  ;;  %v1267_v40 = vshra.s32 %v4582_v39, 16 }
 0x211   : > { %v4575_v31 = vsel %vm968_vm0, %v4406_v10, 128 }
 0x212   : > { %6030 = vst [vmem:[#allocation44_spill] sm:$0xff] %v4575_v31  ;;  %v1435_v36 = vshra.s32 %v4575_v31, 16  ;;  %v4598_v31 = vsel %vm959_vm1, %v4406_v10, 128  ;;  %v859_v56 = vpop.xlane.xlu1 %858 }
 0x213   : > { %v869_v18 = vpop.xlane.xlu0 %868  ;;  %vm965_vm11 = vcmp.eq.f32.partialorder %v4279_v63, %v859_v56  ;;  %v4693_v56 = vsel %vm964_vm12, %v4406_v10, 128 }
 0x214   : > { %vm970_vm2 = vcmp.eq.f32.partialorder %v4306_v12, %v869_v18  ;;  %1242 = vmin.xlane.f32.xlu1 %v4577_v47  ;;  %v4587_v48 = vcvt.s32.f32 %v1435_v36  ;;  %v4610_v36 = vcvt.s32.f32 %v1267_v40  ;;  %v4682_v50 = vsel %vm965_vm11, %v4406_v10, 128  ;;  %6045 = vst [vmem:[#allocation59_spill] sm:$0xff] %v4693_v56 }
 0x215   : > { %v4590_v8 = vsel %vm970_vm2, %v4406_v10, 128  ;;  %6043 = vst [vmem:[#allocation57_spill] sm:$0xff] %v4682_v50  ;;  %v1393_v63 = vshra.s32 %v4682_v50, 16  ;;  %v1379_v0 = vshra.s32 %v4693_v56, 16 }
 0x216   : > { %6031 = vst [vmem:[#allocation45_spill] sm:$0xff] %v4587_v48  ;;  %6032 = vst [vmem:[#allocation46_spill] sm:$0xff] %v4590_v8  ;;  %1438 = vmin.xlane.f32.xlu0 %v4587_v48  ;;  %v1463_v44 = vshra.s32 %v4590_v8, 16  ;;  %v1309_v8 = vshra.s32 %v4598_v31, 16  ;;  %v4615_v48 = vsel %vm958_vm3, %v4406_v10, 128  ;;  %v863_v59 = vpop.xlane.xlu1 %862 }
 0x217   : > { %v873_v12 = vpop.xlane.xlu0 %872  ;;  %vm967_vm13 = vcmp.eq.f32.partialorder %v4287_v3, %v863_v59  ;;  %v4710_v50 = vcvt.s32.f32 %v1379_v0  ;;  %v4714_v59 = vsel %vm966_vm14, %v4406_v10, 128 }
 0x218   : > { %vm972_vm4 = vcmp.eq.f32.partialorder %v4314_v17, %v873_v12  ;;  %1284 = vmin.xlane.f32.xlu1 %v4593_v28  ;;  %v4604_v18 = vcvt.s32.f32 %v1463_v44  ;;  %v4626_v40 = vcvt.s32.f32 %v1309_v8  ;;  %v4703_v21 = vsel %vm967_vm13, %v4406_v10, 128 }
 0x219   : > { %v4607_v24 = vsel %vm972_vm4, %v4406_v10, 128  ;;  %6046 = vst [vmem:[#allocation60_spill] sm:$0xff] %v4703_v21  ;;  %6047 = vst [vmem:[#allocation61_spill] sm:$0xff] %v4710_v50  ;;  %v1421_v3 = vshra.s32 %v4703_v21, 16  ;;  %v1407_v4 = vshra.s32 %v4714_v59, 16 }
 0x21a   : > { %6033 = vst [vmem:[#allocation47_spill] sm:$0xff] %v4604_v18  ;;  %6034 = vst [vmem:[#allocation48_spill] sm:$0xff] %v4607_v24  ;;  %1466 = vmin.xlane.f32.xlu0 %v4604_v18  ;;  %v1491_v43 = vshra.s32 %v4607_v24, 16  ;;  %v1295_v24 = vshra.s32 %v4615_v48, 16 }
 0x21b   : > { %v877_v52 = vpop.xlane.xlu0 %876  ;;  %v4728_v21 = vcvt.s32.f32 %v1407_v4 }
 0x21c   : > { %vm974_vm6 = vcmp.eq.f32.partialorder %v4322_v25, %v877_v52  ;;  %1270 = vmin.xlane.f32.xlu1 %v4610_v36  ;;  %v4620_v17 = vcvt.s32.f32 %v1491_v43  ;;  %v4644_v52 = vcvt.s32.f32 %v1295_v24 }
 0x21d   : > { %v4623_v44 = vsel %vm974_vm6, %v4406_v10, 128 }
 0x21e   : > { %6035 = vst [vmem:[#allocation49_spill] sm:$0xff] %v4620_v17  ;;  %6036 = vst [vmem:[#allocation50_spill] sm:$0xff] %v4623_v44  ;;  %1494 = vmin.xlane.f32.xlu0 %v4620_v17  ;;  %v1519_v12 = vshra.s32 %v4623_v44, 16  ;;  %v1337_v44 = vshra.s32 %v4631_v55, 16  ;;  %v4648_v17 = vsel %vm960_vm7, %v4406_v10, 128 }
 0x21f   : > { %v881_v25 = vpop.xlane.xlu0 %880  ;;  %v1323_v24 = vshra.s32 %v4648_v17, 16 }
 0x220   : > { %vm976_vm8 = vcmp.eq.f32.partialorder %v4330_v33, %v881_v25  ;;  %1312 = vmin.xlane.f32.xlu1 %v4626_v40  ;;  %v4637_v51 = vcvt.s32.f32 %v1519_v12  ;;  %v4657_v12 = vcvt.s32.f32 %v1337_v44  ;;  %v4661_v25 = vsel %vm963_vm9, %v4406_v10, 128 }
 0x221   : > { %v4640_v8 = vsel %vm976_vm8, %v4406_v10, 128  ;;  %6040 = vst [vmem:[#allocation54_spill] sm:$0xff] %v4661_v25  ;;  %v4668_v27 = vcvt.s32.f32 %v1323_v24  ;;  %v4672_v44 = vsel %vm962_vm10, %v4406_v10, 128  ;;  %v867_v24 = vpop.xlane.xlu1 %866 }
 0x222   : > { %6037 = vst [vmem:[#allocation51_spill] sm:$0xff] %v4637_v51  ;;  %6038 = vst [vmem:[#allocation52_spill] sm:$0xff] %v4640_v8  ;;  %v1547_v43 = vshra.s32 %v4640_v8, 16  ;;  %1522 = vmin.xlane.f32.xlu0 %v4637_v51  ;;  %v1351_v60 = vshra.s32 %v4672_v44, 16  ;;  %vm969_vm15 = vcmp.eq.f32.partialorder %v4295_v7, %v867_v24 }
 0x223   : > { %v4650_v33 = vpop.xlane.xlu0 %884  ;;  %6041 = vst [vmem:[#allocation55_spill] sm:$0xff] %v4668_v27  ;;  %6042 = vst [vmem:[#allocation56_spill] sm:$0xff] %v4672_v44  ;;  %v4724_v16 = vsel %vm969_vm15, %v4406_v10, 128 }
 0x224   : > { %1298 = vmin.xlane.f32.xlu1 %v4644_v52  ;;  %v4654_v32 = vcvt.s32.f32 %v1547_v43  ;;  %v1365_v43 = vshra.s32 %v4661_v25, 16  ;;  %v4689_v25 = vcvt.s32.f32 %v1351_v60  ;;  %6049 = vst [vmem:[#allocation63_spill] sm:$0xff] %v4724_v16  ;;  %v1449_v7 = vshra.s32 %v4724_v16, 16 }
 0x225   : > { %v871_v44 = vpop.xlane.xlu1 %870  ;;  %vm978_vm5 = vcmp.eq.f32.partialorder %v4338_v41, %v4650_v33 }
 0x226   : > { %6039 = vst [vmem:[#allocation53_spill] sm:$0xff] %v4654_v32  ;;  %1550 = vmin.xlane.f32.xlu0 %v4654_v32  ;;  %v4678_v51 = vcvt.s32.f32 %v1365_v43  ;;  %6044 = vst [vmem:[#allocation58_spill] sm:$0xff] %v4689_v25  ;;  %vm971_vm0 = vcmp.eq.f32.partialorder %v4303_v11, %v871_v44 }
 0x227   : > { %v4663_v8 = vpop.xlane.xlu0 %890  ;;  %v4732_v24 = vsel %vm971_vm0, %v4406_v10, 128 }
 0x228   : > { %1340 = vmin.xlane.f32.xlu1 %v4657_v12  ;;  %6050 = vst [vmem:[#allocation64_spill] sm:$0xff] %v4732_v24  ;;  %v1477_v11 = vshra.s32 %v4732_v24, 16  ;;  %vm981_vm6 = vcmp.eq.f32.partialorder %v4343_v45, %v4663_v8 }
 0x229   : > { %v4790_v41 = vsel %vm981_vm6, %v4406_v10, 128 }
 0x22b   : > { %v4674_v32 = vpop.xlane.xlu0 %888 }
 0x22c   : > { %1326 = vmin.xlane.f32.xlu1 %v4668_v27  ;;  %v4699_v27 = vcvt.s32.f32 %v1393_v63  ;;  %v875_v63 = vpop.xlane.xlu1 %874  ;;  %vm980_vm7 = vcmp.eq.f32.partialorder %v4348_v49, %v4674_v32  ;;  %v1084_v32 = vand.u32 65535, %v4414_v37 }
 0x22d   : > { %vm973_vm1 = vcmp.eq.f32.partialorder %v4311_v15, %v875_v63  ;;  %v4801_v45 = vsel %vm980_vm7, %v4406_v10, 128 }
 0x22e   : > { %v4742_v44 = vsel %vm973_vm1, %v4406_v10, 128  ;;  %6056 = vst [vmem:[#allocation70_spill] sm:$0xff] %v4801_v45 }
 0x22f   : > { %v4684_v18 = vpop.xlane.xlu0 %894  ;;  %6052 = vst [vmem:[#allocation66_spill] sm:$0xff] %v4742_v44  ;;  %v1505_v15 = vshra.s32 %v4742_v44, 16 }
 0x230   : > { %1368 = vmin.xlane.f32.xlu1 %v4678_v51  ;;  %v879_v0 = vpop.xlane.xlu1 %878  ;;  %vm983_vm8 = vcmp.eq.f32.partialorder %v4352_v53, %v4684_v18 }
 0x231   : > { %vm975_vm2 = vcmp.eq.f32.partialorder %v4319_v23, %v879_v0  ;;  %v4756_v24 = vcvt.s32.f32 %v1505_v15  ;;  %v4812_v49 = vsel %vm983_vm8, %v4406_v10, 128 }
 0x232   : > { %v4752_v63 = vsel %vm975_vm2, %v4406_v10, 128  ;;  %6058 = vst [vmem:[#allocation72_spill] sm:$0xff] %v4812_v49  ;;  %v1645_v53 = vshra.s32 %v4812_v49, 16 }
 0x233   : > { %v4695_v43 = vpop.xlane.xlu0 %892  ;;  %6053 = vst [vmem:[#allocation67_spill] sm:$0xff] %v4752_v63  ;;  %v1533_v23 = vshra.s32 %v4752_v63, 16 }
 0x234   : > { %1354 = vmin.xlane.f32.xlu1 %v4689_v25  ;;  %v4720_v25 = vcvt.s32.f32 %v1421_v3  ;;  %v4738_v3 = vcvt.s32.f32 %v1449_v7  ;;  %v883_v4 = vpop.xlane.xlu1 %882  ;;  %vm982_vm9 = vcmp.eq.f32.partialorder %v4356_v57, %v4695_v43  ;;  %v1070_v57 = vand.u32 65535, %v4426_v14 }
 0x235   : > { %vm977_vm3 = vcmp.eq.f32.partialorder %v4327_v30, %v883_v4  ;;  %v4767_v44 = vcvt.s32.f32 %v1533_v23  ;;  %v4833_v49 = vcvt.s32.f32 %v1645_v53 }
 0x236   : > { %6048 = vst [vmem:[#allocation62_spill] sm:$0xff] %v4720_v25  ;;  %6051 = vst [vmem:[#allocation65_spill] sm:$0xff] %v4738_v3  ;;  %v4760_v0 = vsel %vm977_vm3, %v4406_v10, 128 }
 0x237   : > { %v4705_v60 = vpop.xlane.xlu0 %898 }
 0x238   : > { %1396 = vmin.xlane.f32.xlu1 %v4699_v27  ;;  %v887_v7 = vpop.xlane.xlu1 %886  ;;  %vm985_vm10 = vcmp.eq.f32.partialorder %v4360_v61, %v4705_v60  ;;  %v1112_v61 = vand.u32 65535, %v4429_v20  ;;  %v1098_v20 = vand.u32 65535, %v4442_v62  ;;  %v1140_v62 = vand.u32 65535, %v4454_v58  ;;  %v6065_v58 = vld [vmem:[#allocation29_spill] sm:$0xff] }
 0x239   : > { %vm979_vm4 = vcmp.eq.f32.partialorder %v4335_v38, %v887_v7  ;;  %v4781_v38 = vsel %vm978_vm5, %v4406_v10, 128 }
 0x23a   : > { %v4770_v30 = vsel %vm979_vm4, %v4406_v10, 128  ;;  %6055 = vst [vmem:[#allocation69_spill] sm:$0xff] %v4781_v38  ;;  %v1575_v7 = vshra.s32 %v4781_v38, 16 }
 0x23b   : > { %v4718_v56 = vpop.xlane.xlu0 %896  ;;  %6054 = vst [vmem:[#allocation68_spill] sm:$0xff] %v4770_v30  ;;  %v1589_v15 = vshra.s32 %v4770_v30, 16 }
 0x23c   : > { %1382 = vmin.xlane.f32.xlu1 %v4710_v50  ;;  %v4798_v30 = vcvt.s32.f32 %v1575_v7  ;;  %v4822_v7 = vsel %vm982_vm9, %v4406_v10, 128  ;;  %vm984_vm12 = vcmp.eq.f32.partialorder %v4364_v1, %v4718_v56 }
 0x23d   : > { %v4787_v23 = vcvt.s32.f32 %v1589_v15  ;;  %v1603_v15 = vshra.s32 %v4801_v45, 16  ;;  %v1631_v37 = vshra.s32 %v4822_v7, 16 }
 0x23f   : > { %v4734_v50 = vpop.xlane.xlu0 %902  ;;  %v4819_v18 = vcvt.s32.f32 %v1603_v15  ;;  %v4838_v15 = vsel %vm985_vm10, %v4406_v10, 128 }
 0x240   : > { %1424 = vmin.xlane.f32.xlu1 %v4720_v25  ;;  %v4748_v25 = vcvt.s32.f32 %v1477_v11  ;;  %v1561_v11 = vshra.s32 %v4760_v0, 16  ;;  %v1673_v53 = vshra.s32 %v4838_v15, 16  ;;  %vm987_vm14 = vcmp.eq.f32.partialorder %v4368_v5, %v4734_v50 }
 0x242   : > { %v4778_v63 = vcvt.s32.f32 %v1561_v11  ;;  %v1617_v11 = vshra.s32 %v4790_v41, 16 }
 0x243   : > { %v4746_v16 = vpop.xlane.xlu0 %900 }
 0x244   : > { %1410 = vmin.xlane.f32.xlu1 %v4728_v21  ;;  %v4809_v38 = vcvt.s32.f32 %v1617_v11  ;;  %v1086_v11 = vcvt.s32.f32 %v1084_v32  ;;  %v1072_v32 = vcvt.s32.f32 %v1070_v57  ;;  %vm986_vm0 = vcmp.eq.f32.partialorder %v4372_v9, %v4746_v16  ;;  %v6064_v9 = vld [vmem:[#allocation15_spill] sm:$0xff] }
 0x245   : > { %v1126_v16 = vand.u32 65535, %v6065_v58 }
 0x246   : > { %6057 = vst [vmem:[#allocation71_spill] sm:$0xff] %v4809_v38 }
 0x248   : > { %1452 = vmin.xlane.f32.xlu1 %v4738_v3  ;;  %v4762_v3 = vpop.xlane.xlu0 %906 }
 0x249   : > { %vm989_vm2 = vcmp.eq.f32.partialorder %v6064_v9, %v4762_v3  ;;  %v6070_v9 = vld [vmem:[#allocation31_spill] sm:$0xff] }
 0x24a   : > { %v1168_v58 = vand.u32 65535, %v6070_v9 }
 0x24c   : > { %1480 = vmin.xlane.f32.xlu1 %v4748_v25  ;;  %v4775_v4 = vpop.xlane.xlu0 %904 }
 0x250   : > { %1508 = vmin.xlane.f32.xlu1 %v4756_v24  ;;  %v4792_v33 = vpop.xlane.xlu0 %910 }
 0x254   : > { %1536 = vmin.xlane.f32.xlu1 %v4767_v44  ;;  %v4806_v8 = vpop.xlane.xlu0 %908 }
 0x258   : > { %1564 = vmin.xlane.f32.xlu1 %v4778_v63  ;;  %v4824_v45 = vpop.xlane.xlu0 %914 }
 0x25c   : > { %1592 = vmin.xlane.f32.xlu1 %v4787_v23  ;;  %v4844_v14 = vpop.xlane.xlu0 %912 }
 0x260   : > { %1578 = vmin.xlane.f32.xlu1 %v4798_v30 }
 0x264   : > { %1620 = vmin.xlane.f32.xlu1 %v4809_v38 }
 0x268   : > { %1606 = vmin.xlane.f32.xlu1 %v4819_v18 }
 0x269   : > { %v4830_v43 = vpop.xlane.xlu1 %1088 }
 0x26a   : > { %vm1090_vm11 = vcmp.eq.f32.partialorder %v4423_v2, %v4830_v43  ;;  %v4849_v2 = vcvt.s32.f32 %v1631_v37  ;;  %v4863_v37 = vcvt.s32.f32 %v1673_v53 }
 0x26b   : > { %v1091_v38 = vsel %vm1090_vm11, %v1086_v11, inf  ;;  %v4854_v11 = vsel %vm984_vm12, %v4406_v10, 128 }
 0x26c   : > { %1648 = vmin.xlane.f32.xlu1 %v4833_v49  ;;  %1092 = vmin.xlane.f32.xlu0 %v1091_v38  ;;  %6059 = vst [vmem:[#allocation73_spill] sm:$0xff] %v4854_v11  ;;  %v1114_v38 = vcvt.s32.f32 %v1112_v61  ;;  %v1659_v57 = vshra.s32 %v4854_v11, 16  ;;  %v1100_v61 = vcvt.s32.f32 %v1098_v20 }
 0x26d   : > { %v4846_v60 = vpop.xlane.xlu1 %1074 }
 0x26e   : > { %vm1076_vm13 = vcmp.eq.f32.partialorder %v4438_v46, %v4846_v60  ;;  %v4868_v46 = vsel %vm987_vm14, %v4406_v10, 128 }
 0x26f   : > { %v1077_v1 = vsel %vm1076_vm13, %v1072_v32, inf  ;;  %6060 = vst [vmem:[#allocation74_spill] sm:$0xff] %v4868_v46  ;;  %v4870_v32 = vpop.xlane.xlu0 %918  ;;  %v1701_v53 = vshra.s32 %v4868_v46, 16 }
 0x270   : > { %1634 = vmin.xlane.f32.xlu1 %v4849_v2  ;;  %1078 = vmin.xlane.f32.xlu0 %v1077_v1  ;;  %v6062_v1 = vld [vmem:[#allocation28_spill] sm:$0xff] }
 0x271   : > { %v4860_v56 = vpop.xlane.xlu1 %1116 }
 0x272   : > { %vm1118_vm15 = vcmp.eq.f32.partialorder %v4450_v6, %v4860_v56  ;;  %v4879_v6 = vcvt.s32.f32 %v1659_v57  ;;  %v1142_v57 = vcvt.s32.f32 %v1140_v62 }
 0x273   : > { %v1119_v5 = vsel %vm1118_vm15, %v1114_v38, inf  ;;  %v4884_v38 = vsel %vm986_vm0, %v4406_v10, 128  ;;  %v4890_v20 = vpop.xlane.xlu0 %916 }
 0x274   : > { %1676 = vmin.xlane.f32.xlu1 %v4863_v37  ;;  %1120 = vmin.xlane.f32.xlu0 %v1119_v5  ;;  %6061 = vst [vmem:[#allocation75_spill] sm:$0xff] %v4879_v6  ;;  %6063 = vst [vmem:[#allocation28_spill] sm:$0xff] %v4884_v38  ;;  %v1687_v46 = vshra.s32 %v4884_v38, 16  ;;  %v1128_v38 = vcvt.s32.f32 %v1126_v16  ;;  %v6073_v16 = vld [vmem:[#allocation34_spill] sm:$0xff] }
 0x275   : > { %v4876_v50 = vpop.xlane.xlu1 %1102 }
 0x276   : > { %vm1104_vm1 = vcmp.eq.f32.partialorder %v6062_v1, %v4876_v50  ;;  %v4895_v1 = vcvt.s32.f32 %v1701_v53 }
 0x277   : > { %v1105_v11 = vsel %vm1104_vm1, %v1100_v61, inf  ;;  %v4900_v61 = vsel %vm989_vm2, %v4406_v10, 128 }
 0x278   : > { %1662 = vmin.xlane.f32.xlu1 %v4879_v6  ;;  %1106 = vmin.xlane.f32.xlu0 %v1105_v11  ;;  %6067 = vst [vmem:[#allocation29_spill] sm:$0xff] %v4895_v1  ;;  %6068 = vst [vmem:[#allocation76_spill] sm:$0xff] %v4900_v61  ;;  %v6069_v11 = vld [vmem:[#allocation16_spill] sm:$0xff]  ;;  %v1729_v53 = vshra.s32 %v4900_v61, 16  ;;  %v4909_v6 = vcvt.s32.f32 %v1687_v46  ;;  %v1170_v46 = vcvt.s32.f32 %v1168_v58 }
 0x279   : > { %v4892_v5 = vpop.xlane.xlu1 %1144  ;;  %vm988_vm4 = vcmp.eq.f32.partialorder %v6069_v11, %v4775_v4  ;;  %v1154_v11 = vand.u32 65535, %v6073_v16 }
 0x27a   : > { %6066 = vst [vmem:[#allocation15_spill] sm:$0xff] %v4892_v5  ;;  %vm1146_vm3 = vcmp.eq.f32.partialorder %v4474_v34, %v4892_v5  ;;  %v6071_v34 = vld [vmem:[#allocation33_spill] sm:$0xff]  ;;  %v4916_v5 = vpop.xlane.xlu0 %922 }
 0x27b   : > { %v1147_v3 = vsel %vm1146_vm3, %v1142_v57, inf  ;;  %v4914_v57 = vsel %vm988_vm4, %v4406_v10, 128 }
 0x27c   : > { %1704 = vmin.xlane.f32.xlu1 %v4895_v1  ;;  %1148 = vmin.xlane.f32.xlu0 %v1147_v3  ;;  %v6072_v3 = vld [vmem:[#allocation17_spill] sm:$0xff]  ;;  %v1715_v61 = vshra.s32 %v4914_v57, 16 }
 0x27d   : > { %v4906_v62 = vpop.xlane.xlu1 %1130  ;;  %vm991_vm6 = vcmp.eq.f32.partialorder %v6072_v3, %v4792_v33  ;;  %v6075_v33 = vld [vmem:[#allocation18_spill] sm:$0xff] }
 0x27e   : > { %vm1132_vm5 = vcmp.eq.f32.partialorder %v6071_v34, %v4906_v62  ;;  %v4925_v34 = vcvt.s32.f32 %v1729_v53  ;;  %vm990_vm8 = vcmp.eq.f32.partialorder %v6075_v33, %v4806_v8  ;;  %v4936_v58 = vpop.xlane.xlu0 %920  ;;  %v1156_v53 = vcvt.s32.f32 %v1154_v11 }
 0x27f   : > { %v1133_v4 = vsel %vm1132_vm5, %v1128_v38, inf  ;;  %v4930_v38 = vsel %vm991_vm6, %v4406_v10, 128 }
 0x280   : > { %1690 = vmin.xlane.f32.xlu1 %v4909_v6  ;;  %1134 = vmin.xlane.f32.xlu0 %v1133_v4  ;;  %6074 = vst [vmem:[#allocation16_spill] sm:$0xff] %v4930_v38  ;;  %v1196_v4 = vand.u32 65535, %v4502_v29  ;;  %v1757_v16 = vshra.s32 %v4930_v38, 16  ;;  %v1182_v29 = vand.u32 65535, %v4514_v26  ;;  %v6082_v26 = vld [vmem:[#allocation38_spill] sm:$0xff] }
 0x281   : > { %v4922_v9 = vpop.xlane.xlu1 %1172 }
 0x282   : > { %vm1174_vm7 = vcmp.eq.f32.partialorder %v4498_v13, %v4922_v9  ;;  %v4941_v13 = vcvt.s32.f32 %v1715_v61  ;;  %v1198_v33 = vcvt.s32.f32 %v1196_v4  ;;  %v4955_v38 = vcvt.s32.f32 %v1757_v16 }
 0x283   : > { %v1175_v1 = vsel %vm1174_vm7, %v1170_v46, inf  ;;  %v4946_v46 = vsel %vm990_vm8, %v4406_v10, 128  ;;  %v1224_v4 = vand.u32 65535, %v6082_v26  ;;  %v1184_v16 = vcvt.s32.f32 %v1182_v29 }
 0x284   : > { %1732 = vmin.xlane.f32.xlu1 %v4925_v34  ;;  %1176 = vmin.xlane.f32.xlu0 %v1175_v1  ;;  %6076 = vst [vmem:[#allocation31_spill] sm:$0xff] %v4946_v46  ;;  %v6077_v1 = vld [vmem:[#allocation19_spill] sm:$0xff]  ;;  %v1743_v61 = vshra.s32 %v4946_v46, 16  ;;  %6079 = vst [vmem:[#allocation17_spill] sm:$0xff] %v4955_v38 }
 0x285   : > { %v4938_v3 = vpop.xlane.xlu1 %1158  ;;  %vm993_vm10 = vcmp.eq.f32.partialorder %v6077_v1, %v4824_v45 }
 0x286   : > { %vm1160_vm9 = vcmp.eq.f32.partialorder %v4510_v42, %v4938_v3  ;;  %v4960_v42 = vsel %vm993_vm10, %v4406_v10, 128 }
 0x287   : > { %v1161_v8 = vsel %vm1160_vm9, %v1156_v53, inf  ;;  %6080 = vst [vmem:[#allocation34_spill] sm:$0xff] %v4960_v42  ;;  %v4962_v53 = vpop.xlane.xlu0 %926  ;;  %v1785_v46 = vshra.s32 %v4960_v42, 16 }
 0x288   : > { %1718 = vmin.xlane.f32.xlu1 %v4941_v13  ;;  %1162 = vmin.xlane.f32.xlu0 %v1161_v8  ;;  %v6081_v8 = vld [vmem:[#allocation20_spill] sm:$0xff] }
 0x289   : > { %v4952_v11 = vpop.xlane.xlu1 %1200  ;;  %vm992_vm12 = vcmp.eq.f32.partialorder %v6081_v8, %v4844_v14  ;;  %v6085_v14 = vld [vmem:[#allocation21_spill] sm:$0xff] }
 0x28a   : > { %6078 = vst [vmem:[#allocation33_spill] sm:$0xff] %v4952_v11  ;;  %vm1202_vm11 = vcmp.eq.f32.partialorder %v4524_v22, %v4952_v11  ;;  %v4971_v22 = vcvt.s32.f32 %v1743_v61  ;;  %vm995_vm14 = vcmp.eq.f32.partialorder %v6085_v14, %v4870_v32  ;;  %v1226_v61 = vcvt.s32.f32 %v1224_v4  ;;  %v6092_v14 = vld [vmem:[#allocation41_spill] sm:$0xff] }
 0x28b   : > { %v1203_v45 = vsel %vm1202_vm11, %v1198_v33, inf  ;;  %v4976_v33 = vsel %vm992_vm12, %v4406_v10, 128  ;;  %v4982_v29 = vpop.xlane.xlu0 %924 }
 0x28c   : > { %1760 = vmin.xlane.f32.xlu1 %v4955_v38  ;;  %1204 = vmin.xlane.f32.xlu0 %v1203_v45  ;;  %6083 = vst [vmem:[#allocation18_spill] sm:$0xff] %v4971_v22  ;;  %6084 = vst [vmem:[#allocation19_spill] sm:$0xff] %v4976_v33  ;;  %v6086_v45 = vld [vmem:[#allocation39_spill] sm:$0xff]  ;;  %v1771_v42 = vshra.s32 %v4976_v33, 16  ;;  %v6089_v38 = vld [vmem:[#allocation40_spill] sm:$0xff] }
 0x28d   : > { %v4968_v1 = vpop.xlane.xlu1 %1186  ;;  %v1210_v8 = vand.u32 65535, %v6086_v45  ;;  %v1252_v45 = vand.u32 65535, %v6092_v14 }
 0x28e   : > { %vm1188_vm13 = vcmp.eq.f32.partialorder %v4535_v35, %v4968_v1  ;;  %v4987_v35 = vcvt.s32.f32 %v1785_v46 }
 0x28f   : > { %v1189_v11 = vsel %vm1188_vm13, %v1184_v16, inf  ;;  %v4992_v16 = vsel %vm995_vm14, %v4406_v10, 128  ;;  %v1212_v33 = vcvt.s32.f32 %v1210_v8 }
 0x290   : > { %1746 = vmin.xlane.f32.xlu1 %v4971_v22  ;;  %1190 = vmin.xlane.f32.xlu0 %v1189_v11  ;;  %6088 = vst [vmem:[#allocation38_spill] sm:$0xff] %v4987_v35  ;;  %6090 = vst [vmem:[#allocation21_spill] sm:$0xff] %v4992_v16  ;;  %v6091_v11 = vld [vmem:[#allocation22_spill] sm:$0xff]  ;;  %v1813_v46 = vshra.s32 %v4992_v16, 16  ;;  %v5001_v22 = vcvt.s32.f32 %v1771_v42  ;;  %v1254_v42 = vcvt.s32.f32 %v1252_v45 }
 0x291   : > { %v4984_v26 = vpop.xlane.xlu1 %1228  ;;  %vm994_vm0 = vcmp.eq.f32.partialorder %v6091_v11, %v4890_v20  ;;  %v6095_v11 = vld [vmem:[#allocation23_spill] sm:$0xff] }
 0x292   : > { %6087 = vst [vmem:[#allocation20_spill] sm:$0xff] %v4984_v26  ;;  %vm1230_vm15 = vcmp.eq.f32.partialorder %v6089_v38, %v4984_v26  ;;  %v6093_v38 = vld [vmem:[#allocation42_spill] sm:$0xff]  ;;  %v931_v26 = vpop.xlane.xlu0 %930  ;;  %vm997_vm2 = vcmp.eq.f32.partialorder %v6095_v11, %v4916_v5  ;;  %v6097_v5 = vld [vmem:[#allocation24_spill] sm:$0xff] }
 0x293   : > { %v1231_v32 = vsel %vm1230_vm15, %v1226_v61, inf  ;;  %v5006_v61 = vsel %vm994_vm0, %v4406_v10, 128  ;;  %vm996_vm4 = vcmp.eq.f32.partialorder %v6097_v5, %v4936_v58 }
 0x294   : > { %1788 = vmin.xlane.f32.xlu1 %v4987_v35  ;;  %1232 = vmin.xlane.f32.xlu0 %v1231_v32  ;;  %6094 = vst [vmem:[#allocation39_spill] sm:$0xff] %v5006_v61  ;;  %v6096_v32 = vld [vmem:[#allocation43_spill] sm:$0xff]  ;;  %v1799_v16 = vshra.s32 %v5006_v61, 16  ;;  %v5015_v35 = vcvt.s32.f32 %v1813_v46 }
 0x295   : > { %v4998_v4 = vpop.xlane.xlu1 %1214  ;;  %v1238_v8 = vand.u32 65535, %v6096_v32 }
 0x296   : > { %vm1216_vm1 = vcmp.eq.f32.partialorder %v6093_v38, %v4998_v4  ;;  %v929_v45 = vpop.xlane.xlu0 %928  ;;  %v5029_v61 = vcvt.s32.f32 %v1799_v16 }
 0x297   : > { %v1217_v20 = vsel %vm1216_vm1, %v1212_v33, inf  ;;  %v5020_v33 = vsel %vm997_vm2, %v4406_v10, 128  ;;  %v1240_v46 = vcvt.s32.f32 %v1238_v8 }
 0x298   : > { %1774 = vmin.xlane.f32.xlu1 %v5001_v22  ;;  %1218 = vmin.xlane.f32.xlu0 %v1217_v20  ;;  %v1280_v20 = vand.u32 65535, %v4569_v54  ;;  %v1841_v32 = vshra.s32 %v5020_v33, 16  ;;  %v1266_v54 = vand.u32 65535, %v4582_v39  ;;  %v1308_v39 = vand.u32 65535, %v4598_v31 }
 0x299   : > { %v5012_v14 = vpop.xlane.xlu1 %1256  ;;  %v1294_v31 = vand.u32 65535, %v4615_v48  ;;  %v1336_v48 = vand.u32 65535, %v4631_v55  ;;  %v1322_v55 = vand.u32 65535, %v4648_v17  ;;  %v6111_v17 = vld [vmem:[#allocation54_spill] sm:$0xff] }
 0x29a   : > { %vm1258_vm3 = vcmp.eq.f32.partialorder %v4565_v19, %v5012_v14  ;;  %v5034_v19 = vsel %vm996_vm4, %v4406_v10, 128  ;;  %v5043_v5 = vcvt.s32.f32 %v1841_v32  ;;  %v1268_v32 = vcvt.s32.f32 %v1266_v54 }
 0x29b   : > { %v1259_v38 = vsel %vm1258_vm3, %v1254_v42, inf  ;;  %6098 = vst [vmem:[#allocation40_spill] sm:$0xff] %v5034_v19  ;;  %v6099_v42 = vld [vmem:[#allocation25_spill] sm:$0xff]  ;;  %v1827_v16 = vshra.s32 %v5034_v19, 16 }
 0x29c   : > { %1816 = vmin.xlane.f32.xlu1 %v5015_v35  ;;  %1260 = vmin.xlane.f32.xlu0 %v1259_v38  ;;  %vm999_vm6 = vcmp.eq.f32.partialorder %v6099_v42, %v4962_v53  ;;  %v1282_v38 = vcvt.s32.f32 %v1280_v20  ;;  %v6101_v42 = vld [vmem:[#allocation26_spill] sm:$0xff] }
 0x29d   : > { %v5026_v11 = vpop.xlane.xlu1 %1242  ;;  %vm998_vm8 = vcmp.eq.f32.partialorder %v6101_v42, %v4982_v29  ;;  %v5057_v19 = vcvt.s32.f32 %v1827_v16  ;;  %v6102_v29 = vld [vmem:[#allocation27_spill] sm:$0xff]  ;;  %v1310_v42 = vcvt.s32.f32 %v1308_v39  ;;  %v1296_v39 = vcvt.s32.f32 %v1294_v31 }
 0x29e   : > { %vm1244_vm5 = vcmp.eq.f32.partialorder %v4577_v47, %v5026_v11  ;;  %v5048_v47 = vsel %vm999_vm6, %v4406_v10, 128  ;;  %vm1001_vm10 = vcmp.eq.f32.partialorder %v6102_v29, %v931_v26 }
 0x29f   : > { %v1245_v58 = vsel %vm1244_vm5, %v1240_v46, inf  ;;  %6100 = vst [vmem:[#allocation22_spill] sm:$0xff] %v5048_v47  ;;  %v935_v46 = vpop.xlane.xlu0 %934 }
 0x2a0   : > { %1802 = vmin.xlane.f32.xlu1 %v5029_v61  ;;  %1246 = vmin.xlane.f32.xlu0 %v1245_v58  ;;  %v1869_v58 = vshra.s32 %v5048_v47, 16 }
 0x2a1   : > { %v5040_v8 = vpop.xlane.xlu1 %1284 }
 0x2a2   : > { %vm1286_vm7 = vcmp.eq.f32.partialorder %v4593_v28, %v5040_v8  ;;  %v5062_v28 = vsel %vm998_vm8, %v4406_v10, 128  ;;  %v5070_v47 = vcvt.s32.f32 %v1869_v58 }
 0x2a3   : > { %v1287_v53 = vsel %vm1286_vm7, %v1282_v38, inf  ;;  %v1855_v16 = vshra.s32 %v5062_v28, 16 }
 0x2a4   : > { %1844 = vmin.xlane.f32.xlu1 %v5043_v5  ;;  %1288 = vmin.xlane.f32.xlu0 %v1287_v53  ;;  %v933_v53 = vpop.xlane.xlu0 %932 }
 0x2a5   : > { %v5054_v20 = vpop.xlane.xlu1 %1270  ;;  %v5083_v29 = vcvt.s32.f32 %v1855_v16 }
 0x2a6   : > { %vm1272_vm9 = vcmp.eq.f32.partialorder %v4610_v36, %v5054_v20  ;;  %v5075_v36 = vsel %vm1001_vm10, %v4406_v10, 128 }
 0x2a7   : > { %v1273_v38 = vsel %vm1272_vm9, %v1268_v32, inf  ;;  %6103 = vst [vmem:[#allocation41_spill] sm:$0xff] %v5075_v36  ;;  %v6104_v32 = vld [vmem:[#allocation30_spill] sm:$0xff]  ;;  %v1897_v58 = vshra.s32 %v5075_v36, 16  ;;  %6105 = vst [vmem:[#allocation42_spill] sm:$0xff] %v5083_v29 }
 0x2a8   : > { %1830 = vmin.xlane.f32.xlu1 %v5057_v19  ;;  %1274 = vmin.xlane.f32.xlu0 %v1273_v38  ;;  %vm1000_vm12 = vcmp.eq.f32.partialorder %v6104_v32, %v929_v45  ;;  %v6107_v32 = vld [vmem:[#allocation32_spill] sm:$0xff] }
 0x2a9   : > { %v5067_v54 = vpop.xlane.xlu1 %1312  ;;  %vm1003_vm14 = vcmp.eq.f32.partialorder %v6107_v32, %v935_v46  ;;  %v5096_v36 = vcvt.s32.f32 %v1897_v58  ;;  %v6110_v46 = vld [vmem:[#allocation35_spill] sm:$0xff] }
 0x2aa   : > { %vm1314_vm11 = vcmp.eq.f32.partialorder %v4626_v40, %v5067_v54  ;;  %v5088_v40 = vsel %vm1000_vm12, %v4406_v10, 128  ;;  %vm1002_vm0 = vcmp.eq.f32.partialorder %v6110_v46, %v933_v53  ;;  %v6114_v46 = vld [vmem:[#allocation37_spill] sm:$0xff] }
 0x2ab   : > { %v1315_v26 = vsel %vm1314_vm11, %v1310_v42, inf  ;;  %6106 = vst [vmem:[#allocation23_spill] sm:$0xff] %v5088_v40  ;;  %v939_v42 = vpop.xlane.xlu0 %938  ;;  %v1883_v16 = vshra.s32 %v5088_v40, 16  ;;  %6108 = vst [vmem:[#allocation43_spill] sm:$0xff] %v5096_v36  ;;  %v1324_v40 = vcvt.s32.f32 %v1322_v55 }
 0x2ac   : > { %1872 = vmin.xlane.f32.xlu1 %v5070_v47  ;;  %1316 = vmin.xlane.f32.xlu0 %v1315_v26  ;;  %v1338_v26 = vcvt.s32.f32 %v1336_v48 }
 0x2ad   : > { %v5080_v38 = vpop.xlane.xlu1 %1298 }
 0x2ae   : > { %vm1300_vm13 = vcmp.eq.f32.partialorder %v4644_v52, %v5080_v38  ;;  %v5101_v52 = vsel %vm1003_vm14, %v4406_v10, 128 }
 0x2af   : > { %v1301_v45 = vsel %vm1300_vm13, %v1296_v39, inf  ;;  %6109 = vst [vmem:[#allocation24_spill] sm:$0xff] %v5101_v52  ;;  %v937_v32 = vpop.xlane.xlu0 %936  ;;  %v1925_v58 = vshra.s32 %v5101_v52, 16 }
 0x2b0   : > { %1858 = vmin.xlane.f32.xlu1 %v5083_v29  ;;  %1302 = vmin.xlane.f32.xlu0 %v1301_v45  ;;  %v1364_v45 = vand.u32 65535, %v6111_v17  ;;  %v5109_v29 = vcvt.s32.f32 %v1883_v16  ;;  %vm1004_vm2 = vcmp.eq.f32.partialorder %v6114_v46, %v937_v32  ;;  %v6119_v32 = vld [vmem:[#allocation36_spill] sm:$0xff] }
 0x2b1   : > { %v5093_v31 = vpop.xlane.xlu1 %1340  ;;  %v5122_v52 = vcvt.s32.f32 %v1925_v58  ;;  %vm1005_vm4 = vcmp.eq.f32.partialorder %v6119_v32, %v939_v42  ;;  %v6125_v42 = vld [vmem:[#allocation59_spill] sm:$0xff] }
 0x2b2   : > { %vm1342_vm15 = vcmp.eq.f32.partialorder %v4657_v12, %v5093_v31  ;;  %v6112_v12 = vld [vmem:[#allocation55_spill] sm:$0xff]  ;;  %v1366_v55 = vcvt.s32.f32 %v1364_v45 }
 0x2b3   : > { %v1343_v39 = vsel %vm1342_vm15, %v1338_v26, inf  ;;  %v5114_v26 = vsel %vm1002_vm0, %v4406_v10, 128  ;;  %6117 = vst [vmem:[#allocation27_spill] sm:$0xff] %v5122_v52 }
 0x2b4   : > { %1900 = vmin.xlane.f32.xlu1 %v5096_v36  ;;  %1344 = vmin.xlane.f32.xlu0 %v1343_v39  ;;  %6113 = vst [vmem:[#allocation25_spill] sm:$0xff] %v5114_v26  ;;  %v6115_v39 = vld [vmem:[#allocation56_spill] sm:$0xff]  ;;  %v1911_v16 = vshra.s32 %v5114_v26, 16 }
 0x2b5   : > { %v5106_v48 = vpop.xlane.xlu1 %1326  ;;  %v1350_v17 = vand.u32 65535, %v6115_v39 }
 0x2b6   : > { %vm1328_vm1 = vcmp.eq.f32.partialorder %v6112_v12, %v5106_v48  ;;  %v5127_v12 = vsel %vm1004_vm2, %v4406_v10, 128  ;;  %v5135_v26 = vcvt.s32.f32 %v1911_v16 }
 0x2b7   : > { %v1329_v53 = vsel %vm1328_vm1, %v1324_v40, inf  ;;  %6118 = vst [vmem:[#allocation30_spill] sm:$0xff] %v5127_v12  ;;  %v1352_v45 = vcvt.s32.f32 %v1350_v17  ;;  %v1939_v58 = vshra.s32 %v5127_v12, 16 }
 0x2b8   : > { %1886 = vmin.xlane.f32.xlu1 %v5109_v29  ;;  %1330 = vmin.xlane.f32.xlu0 %v1329_v53  ;;  %v6120_v53 = vld [vmem:[#allocation57_spill] sm:$0xff]  ;;  %6122 = vst [vmem:[#allocation35_spill] sm:$0xff] %v5135_v26 }
 0x2b9   : > { %v5119_v36 = vpop.xlane.xlu1 %1368  ;;  %v1392_v46 = vand.u32 65535, %v6120_v53  ;;  %v5149_v16 = vcvt.s32.f32 %v1939_v58  ;;  %v5161_v58 = vpop.xlane.xlu0 %1438 }
 0x2ba   : > { %6116 = vst [vmem:[#allocation26_spill] sm:$0xff] %v5119_v36  ;;  %vm1370_vm3 = vcmp.eq.f32.partialorder %v4678_v51, %v5119_v36  ;;  %v6123_v51 = vld [vmem:[#allocation58_spill] sm:$0xff]  ;;  %v5140_v36 = vsel %vm1005_vm4, %v4406_v10, 128  ;;  %6132 = vst [vmem:[#allocation57_spill] sm:$0xff] %v5161_v58 }
 0x2bb   : > { %v1371_v40 = vsel %vm1370_vm3, %v1366_v55, inf  ;;  %6124 = vst [vmem:[#allocation54_spill] sm:$0xff] %v5140_v36  ;;  %v1394_v53 = vcvt.s32.f32 %v1392_v46  ;;  %v1953_v17 = vshra.s32 %v5140_v36, 16  ;;  %6127 = vst [vmem:[#allocation37_spill] sm:$0xff] %v5149_v16 }
 0x2bc   : > { %1928 = vmin.xlane.f32.xlu1 %v5122_v52  ;;  %1372 = vmin.xlane.f32.xlu0 %v1371_v40  ;;  %v1378_v40 = vand.u32 65535, %v6125_v42  ;;  %v6130_v42 = vld [vmem:[#allocation61_spill] sm:$0xff] }
 0x2bd   : > { %v5132_v39 = vpop.xlane.xlu1 %1354  ;;  %v5157_v46 = vcvt.s32.f32 %v1953_v17 }
 0x2be   : > { %6121 = vst [vmem:[#allocation32_spill] sm:$0xff] %v5132_v39  ;;  %vm1356_vm5 = vcmp.eq.f32.partialorder %v6123_v51, %v5132_v39 }
 0x2bf   : > { %v1357_v55 = vsel %vm1356_vm5, %v1352_v45, inf  ;;  %v6128_v45 = vld [vmem:[#allocation60_spill] sm:$0xff]  ;;  %6131 = vst [vmem:[#allocation36_spill] sm:$0xff] %v5157_v46 }
 0x2c0   : > { %1914 = vmin.xlane.f32.xlu1 %v5135_v26  ;;  %1358 = vmin.xlane.f32.xlu0 %v1357_v55  ;;  %v1420_v12 = vand.u32 65535, %v6128_v45  ;;  %v1380_v55 = vcvt.s32.f32 %v1378_v40  ;;  %v6134_v45 = vld [vmem:[#allocation62_spill] sm:$0xff] }
 0x2c1   : > { %v5144_v32 = vpop.xlane.xlu1 %1396 }
 0x2c2   : > { %6126 = vst [vmem:[#allocation55_spill] sm:$0xff] %v5144_v32  ;;  %vm1398_vm6 = vcmp.eq.f32.partialorder %v4699_v27, %v5144_v32  ;;  %v1406_v27 = vand.u32 65535, %v4714_v59 }
 0x2c3   : > { %v1399_v51 = vsel %vm1398_vm6, %v1394_v53, inf }
 0x2c4   : > { %1400 = vmin.xlane.f32.xlu0 %v1399_v51  ;;  %1942 = vmin.xlane.f32.xlu1 %v5149_v16  ;;  %v1422_v51 = vcvt.s32.f32 %v1420_v12  ;;  %v6135_v16 = vld [vmem:[#allocation63_spill] sm:$0xff]  ;;  %v6138_v12 = vld [vmem:[#allocation64_spill] sm:$0xff] }
 0x2c5   : > { %v5153_v26 = vpop.xlane.xlu1 %1382  ;;  %v1476_v32 = vand.u32 65535, %v6138_v12 }
 0x2c6   : > { %6129 = vst [vmem:[#allocation56_spill] sm:$0xff] %v5153_v26  ;;  %vm1384_vm7 = vcmp.eq.f32.partialorder %v6130_v42, %v5153_v26  ;;  %v1448_v42 = vand.u32 65535, %v6135_v16 }
 0x2c7   : > { %v1385_v36 = vsel %vm1384_vm7, %v1380_v55, inf  ;;  %v1408_v55 = vcvt.s32.f32 %v1406_v27  ;;  %v6141_v27 = vld [vmem:[#allocation45_spill] sm:$0xff]  ;;  %v1478_v12 = vcvt.s32.f32 %v1476_v32 }
 0x2c8   : > { %1386 = vmin.xlane.f32.xlu0 %v1385_v36  ;;  %1956 = vmin.xlane.f32.xlu1 %v5157_v46  ;;  %v5172_v36 = vpop.xlane.xlu0 %1466  ;;  %v6137_v46 = vld [vmem:[#allocation44_spill] sm:$0xff]  ;;  %vm1440_vm11 = vcmp.eq.f32.partialorder %v6141_v27, %v5161_v58 }
 0x2c9   : > { %v5163_v53 = vpop.xlane.xlu1 %1424  ;;  %v1434_v26 = vand.u32 65535, %v6137_v46 }
 0x2ca   : > { %6133 = vst [vmem:[#allocation58_spill] sm:$0xff] %v5163_v53  ;;  %vm1426_vm8 = vcmp.eq.f32.partialorder %v6134_v45, %v5163_v53  ;;  %v6140_v45 = vld [vmem:[#allocation65_spill] sm:$0xff] }
 0x2cb   : > { %v1427_v40 = vsel %vm1426_vm8, %v1422_v51, inf  ;;  %v1450_v51 = vcvt.s32.f32 %v1448_v42  ;;  %v1436_v53 = vcvt.s32.f32 %v1434_v26 }
 0x2cc   : > { %1428 = vmin.xlane.f32.xlu0 %v1427_v40 }
 0x2cd   : > { %v5168_v17 = vpop.xlane.xlu1 %1410 }
 0x2ce   : > { %6136 = vst [vmem:[#allocation59_spill] sm:$0xff] %v5168_v17  ;;  %vm1412_vm9 = vcmp.eq.f32.partialorder %v4728_v21, %v5168_v17  ;;  %v6142_v21 = vld [vmem:[#allocation46_spill] sm:$0xff] }
 0x2cf   : > { %v1413_v59 = vsel %vm1412_vm9, %v1408_v55, inf  ;;  %v1462_v40 = vand.u32 65535, %v6142_v21  ;;  %v6143_v17 = vld [vmem:[#allocation66_spill] sm:$0xff]  ;;  %v6146_v21 = vld [vmem:[#allocation67_spill] sm:$0xff] }
 0x2d0   : > { %1414 = vmin.xlane.f32.xlu0 %v1413_v59  ;;  %v1504_v55 = vand.u32 65535, %v6143_v17  ;;  %v5184_v59 = vpop.xlane.xlu0 %1494  ;;  %v1532_v17 = vand.u32 65535, %v6146_v21 }
 0x2d1   : > { %v5176_v52 = vpop.xlane.xlu1 %1452  ;;  %v1464_v39 = vcvt.s32.f32 %v1462_v40 }
 0x2d2   : > { %6139 = vst [vmem:[#allocation60_spill] sm:$0xff] %v5176_v52  ;;  %vm1454_vm10 = vcmp.eq.f32.partialorder %v6140_v45, %v5176_v52  ;;  %v1441_v45 = vsel %vm1440_vm11, %v1436_v53, inf  ;;  %v1506_v52 = vcvt.s32.f32 %v1504_v55  ;;  %v6147_v53 = vld [vmem:[#allocation49_spill] sm:$0xff]  ;;  %v1534_v55 = vcvt.s32.f32 %v1532_v17 }
 0x2d3   : > { %v1455_v16 = vsel %vm1454_vm10, %v1450_v51, inf  ;;  %v6144_v51 = vld [vmem:[#allocation47_spill] sm:$0xff]  ;;  %vm1496_vm15 = vcmp.eq.f32.partialorder %v6147_v53, %v5184_v59 }
 0x2d4   : > { %1456 = vmin.xlane.f32.xlu0 %v1455_v16  ;;  %vm1468_vm13 = vcmp.eq.f32.partialorder %v6144_v51, %v5172_v36  ;;  %v6145_v16 = vld [vmem:[#allocation48_spill] sm:$0xff]  ;;  %v5198_v26 = vpop.xlane.xlu0 %1522 }
 0x2d5   : > { %v5186_v46 = vpop.xlane.xlu1 %1480  ;;  %v1490_v27 = vand.u32 65535, %v6145_v16  ;;  %v1469_v32 = vsel %vm1468_vm13, %v1464_v39, inf  ;;  %v6150_v39 = vld [vmem:[#allocation52_spill] sm:$0xff] }
 0x2d6   : > { %vm1482_vm12 = vcmp.eq.f32.partialorder %v4748_v25, %v5186_v46  ;;  %v1546_v21 = vand.u32 65535, %v6150_v39 }
 0x2d7   : > { %v1483_v42 = vsel %vm1482_vm12, %v1478_v12, inf  ;;  %v6148_v12 = vld [vmem:[#allocation50_spill] sm:$0xff]  ;;  %v1492_v40 = vcvt.s32.f32 %v1490_v27 }
 0x2d8   : > { %1484 = vmin.xlane.f32.xlu1 %v1483_v42  ;;  %1442 = vmin.xlane.f32.xlu0 %v1441_v45  ;;  %v1518_v42 = vand.u32 65535, %v6148_v12  ;;  %v1560_v45 = vand.u32 65535, %v4760_v0  ;;  %v5212_v53 = vpop.xlane.xlu0 %1550  ;;  %v1548_v39 = vcvt.s32.f32 %v1546_v21 }
 0x2d9   : > { %v5194_v58 = vpop.xlane.xlu1 %1508  ;;  %v1497_v16 = vsel %vm1496_vm15, %v1492_v40, inf  ;;  %v6153_v40 = vld [vmem:[#allocation69_spill] sm:$0xff] }
 0x2da   : > { %vm1510_vm14 = vcmp.eq.f32.partialorder %v4756_v24, %v5194_v58  ;;  %v1562_v17 = vcvt.s32.f32 %v1560_v45  ;;  %v1520_v27 = vcvt.s32.f32 %v1518_v42 }
 0x2db   : > { %v1511_v25 = vsel %vm1510_vm14, %v1506_v52, inf  ;;  %v6149_v52 = vld [vmem:[#allocation51_spill] sm:$0xff] }
 0x2dc   : > { %1512 = vmin.xlane.f32.xlu1 %v1511_v25  ;;  %1470 = vmin.xlane.f32.xlu0 %v1469_v32  ;;  %vm1524_vm1 = vcmp.eq.f32.partialorder %v6149_v52, %v5198_v26  ;;  %v6151_v25 = vld [vmem:[#allocation68_spill] sm:$0xff] }
 0x2dd   : > { %v5204_v51 = vpop.xlane.xlu1 %1536  ;;  %v1588_v32 = vand.u32 65535, %v6151_v25  ;;  %v1525_v12 = vsel %vm1524_vm1, %v1520_v27, inf }
 0x2de   : > { %vm1538_vm0 = vcmp.eq.f32.partialorder %v4767_v44, %v5204_v51 }
 0x2df   : > { %v1539_v24 = vsel %vm1538_vm0, %v1534_v55, inf  ;;  %v6152_v55 = vld [vmem:[#allocation53_spill] sm:$0xff]  ;;  %v1590_v52 = vcvt.s32.f32 %v1588_v32 }
 0x2e0   : > { %1540 = vmin.xlane.f32.xlu1 %v1539_v24  ;;  %1498 = vmin.xlane.f32.xlu0 %v1497_v16  ;;  %vm1552_vm3 = vcmp.eq.f32.partialorder %v6152_v55, %v5212_v53  ;;  %v1574_v24 = vand.u32 65535, %v6153_v40  ;;  %v6156_v40 = vld [vmem:[#allocation72_spill] sm:$0xff] }
 0x2e1   : > { %v5214_v0 = vpop.xlane.xlu1 %1564  ;;  %v1553_v45 = vsel %vm1552_vm3, %v1548_v39, inf  ;;  %v1095_v39 = vcvt.f32.s32 %v4830_v43 }
 0x2e2   : > { %vm1566_vm2 = vcmp.eq.f32.partialorder %v4778_v63, %v5214_v0  ;;  %v1616_v63 = vand.u32 65535, %v4790_v41  ;;  %v1644_v41 = vand.u32 65535, %v6156_v40 }
 0x2e3   : > { %v1567_v44 = vsel %vm1566_vm2, %v1562_v17, inf  ;;  %v1576_v17 = vcvt.s32.f32 %v1574_v24 }
 0x2e4   : > { %1568 = vmin.xlane.f32.xlu1 %v1567_v44  ;;  %1526 = vmin.xlane.f32.xlu0 %v1525_v12  ;;  %v6154_v44 = vld [vmem:[#allocation70_spill] sm:$0xff]  ;;  %v1618_v12 = vcvt.s32.f32 %v1616_v63 }
 0x2e5   : > { %v5221_v16 = vpop.xlane.xlu1 %1592  ;;  %v1602_v32 = vand.u32 65535, %v6154_v44  ;;  %v1081_v44 = vcvt.f32.s32 %v4846_v60  ;;  %v1123_v60 = vcvt.f32.s32 %v4860_v56  ;;  %v5985_v56 = vmov 0.0  }
 0x2e6   : > { %vm1594_vm4 = vcmp.eq.f32.partialorder %v4787_v23, %v5221_v16  ;;  %v6155_v23 = vld [vmem:[#allocation71_spill] sm:$0xff] }
 0x2e7   : > { %v1595_v42 = vsel %vm1594_vm4, %v1590_v52, inf  ;;  %v1604_v24 = vcvt.s32.f32 %v1602_v32  ;;  %v1082_v40 = vshll.u32 %v1081_v44, 16 }
 0x2e8   : > { %1596 = vmin.xlane.f32.xlu1 %v1595_v42  ;;  %1554 = vmin.xlane.f32.xlu0 %v1553_v45  ;;  %v1630_v42 = vand.u32 65535, %v4822_v7 }
 0x2e9   : > { %v5226_v25 = vpop.xlane.xlu1 %1578 }
 0x2ea   : > { %vm1580_vm5 = vcmp.eq.f32.partialorder %v4798_v30, %v5226_v25  ;;  %v1632_v7 = vcvt.s32.f32 %v1630_v42  ;;  %v1109_v42 = vcvt.f32.s32 %v4876_v50 }
 0x2eb   : > { %v1581_v27 = vsel %vm1580_vm5, %v1576_v17, inf  ;;  %v1646_v17 = vcvt.s32.f32 %v1644_v41 }
 0x2ec   : > { %1582 = vmin.xlane.f32.xlu0 %v1581_v27  ;;  %v1096_v27 = vshll.u32 %v1095_v39, 16  ;;  %v6157_v39 = vld [vmem:[#allocation73_spill] sm:$0xff] }
 0x2ed   : > { %v5231_v21 = vpop.xlane.xlu1 %1620 }
 0x2ee   : > { %vm1622_vm6 = vcmp.eq.f32.partialorder %v6155_v23, %v5231_v21 }
 0x2ef   : > { %v1623_v55 = vsel %vm1622_vm6, %v1618_v12, inf }
 0x2f0   : > { %1624 = vmin.xlane.f32.xlu1 %v1623_v55 }
 0x2f1   : > { %v5236_v52 = vpop.xlane.xlu1 %1606 }
 0x2f2   : > { %vm1608_vm7 = vcmp.eq.f32.partialorder %v4819_v18, %v5236_v52  ;;  %v1672_v18 = vand.u32 65535, %v4838_v15 }
 0x2f3   : > { %v1609_v30 = vsel %vm1608_vm7, %v1604_v24, inf }
 0x2f4   : > { %1610 = vmin.xlane.f32.xlu0 %v1609_v30  ;;  %v1658_v30 = vand.u32 65535, %v6157_v39  ;;  %v6160_v39 = vld [vmem:[#allocation75_spill] sm:$0xff] }
 0x2f5   : > { %v5242_v45 = vpop.xlane.xlu1 %1648  ;;  %v1093_v63 = vpop.xlane.xlu0 %1092 }
 0x2f6   : > { %vm1650_vm8 = vcmp.eq.f32.partialorder %v4833_v49, %v5242_v45  ;;  %v1094_v32 = vcvt.f32.s32 %v1093_v63 }
 0x2f7   : > { %v1651_v12 = vsel %vm1650_vm8, %v1646_v17, inf  ;;  %v1674_v17 = vcvt.s32.f32 %v1672_v18  ;;  %v1124_v18 = vshll.u32 %v1123_v60, 16  ;;  %v6161_v60 = vld [vmem:[#allocation15_spill] sm:$0xff] }
 0x2f8   : > { %v1097_v43 = vadd.s32 %v1096_v27, %v1094_v32  ;;  %1652 = vmin.xlane.f32.xlu1 %v1651_v12  ;;  %v5983_v32 = vmov 1.0  }
 0x2f9   : > { %v5248_v23 = vpop.xlane.xlu1 %1634  ;;  %v1079_v55 = vpop.xlane.xlu0 %1078 }
 0x2fa   : > { %vm1636_vm9 = vcmp.eq.f32.partialorder %v4849_v2, %v5248_v23  ;;  %v1080_v41 = vcvt.f32.s32 %v1079_v55  ;;  %vm1967_vm10 = vcmp.eq.s32.totalorder %v4406_v10, %v1097_v43 }
 0x2fb   : > { %v1637_v24 = vsel %vm1636_vm9, %v1632_v7, inf  ;;  %v3072_v44 = vsel %vm1967_vm10, 1.0, %v5985_v56 }
 0x2fc   : > { %1638 = vmin.xlane.f32.xlu0 %v1637_v24  ;;  %v1083_v49 = vadd.s32 %v1082_v40, %v1080_v41  ;;  %v1660_v41 = vcvt.s32.f32 %v1658_v30  ;;  %v1110_v24 = vshll.u32 %v1109_v42, 16  ;;  %v6164_v30 = vld [vmem:[#allocation29_spill] sm:$0xff] }
 0x2fd   : > { %v5255_v63 = vpop.xlane.xlu1 %1676  ;;  %v1121_v15 = vpop.xlane.xlu0 %1120 }
 0x2fe   : > { %6158 = vst [vmem:[#allocation61_spill] sm:$0xff] %v5255_v63  ;;  %vm1678_vm11 = vcmp.eq.f32.partialorder %v4863_v37, %v5255_v63  ;;  %v1122_v2 = vcvt.f32.s32 %v1121_v15  ;;  %vm1966_vm12 = vcmp.eq.s32.totalorder %v4406_v10, %v1083_v49  ;;  %v6159_v37 = vld [vmem:[#allocation74_spill] sm:$0xff] }
 0x2ff   : > { %v3071_v27 = vsel %vm1966_vm12, 1.0, %v5985_v56  ;;  %3528 = vmatprep.mubr.msk.f32.mxu1 %vm1966_vm12, %v5983_v32  ;;  %v1679_v12 = vsel %vm1678_vm11, %v1674_v17, inf  ;;  %v1700_v50 = vand.u32 65535, %v6159_v37 }
 0x300   : > { %v2805_v55 = vadd.f32 %v3072_v44, %v3071_v27  ;;  %1680 = vmin.xlane.f32.xlu1 %v1679_v12  ;;  %3529 = vmatmul.mubr.msk.f32.vlgmr.msra.gmra.mxu1 %vm1967_vm10, %v5983_v32  ;;  %v1125_v49 = vadd.s32 %v1124_v18, %v1122_v2  ;;  %v1151_v27 = vcvt.f32.s32 %v6161_v60  ;;  %v6162_v12 = vld [vmem:[#allocation28_spill] sm:$0xff]  ;;  %v1137_v32 = vcvt.f32.s32 %v4906_v62 }
 0x301   : > { %v5270_v7 = vpop.xlane.xlu1 %1662  ;;  %v1107_v40 = vpop.xlane.xlu0 %1106  ;;  %v1686_v43 = vand.u32 65535, %v6162_v12  ;;  %v1702_v63 = vcvt.s32.f32 %v1700_v50  ;;  %v6165_v2 = vmov 0.0   ;;  %v6167_v62 = vld [vmem:[#allocation76_spill] sm:$0xff] }
 0x302   : > { %vm1664_vm13 = vcmp.eq.f32.partialorder %v6160_v39, %v5270_v7  ;;  %v1108_v15 = vcvt.f32.s32 %v1107_v40  ;;  %vm1969_vm0 = vcmp.eq.s32.totalorder %v4406_v10, %v1125_v49  ;;  %v6166_v40 = vmov 1.0  }
 0x303   : > { %v1665_v17 = vsel %vm1664_vm13, %v1660_v41, inf  ;;  %v1728_v50 = vand.u32 65535, %v6167_v62 }
 0x304   : > { %v1111_v44 = vadd.s32 %v1110_v24, %v1108_v15  ;;  %1666 = vmin.xlane.f32.xlu0 %v1665_v17  ;;  %v1152_v24 = vshll.u32 %v1151_v27, 16  ;;  %v1138_v15 = vshll.u32 %v1137_v32, 16  ;;  %v3074_v17 = vsel %vm1969_vm0, 1.0, %v6165_v2 }
 0x305   : > { %v5277_v37 = vpop.xlane.xlu1 %1704  ;;  %v1149_v56 = vpop.xlane.xlu0 %1148  ;;  %v1165_v32 = vcvt.f32.s32 %v4938_v3  ;;  %v6168_v3 = vld [vmem:[#allocation16_spill] sm:$0xff] }
 0x306   : > { %6163 = vst [vmem:[#allocation62_spill] sm:$0xff] %v5277_v37  ;;  %vm1706_vm14 = vcmp.eq.f32.partialorder %v6164_v30, %v5277_v37  ;;  %v1150_v42 = vcvt.f32.s32 %v1149_v56  ;;  %vm1968_vm15 = vcmp.eq.s32.totalorder %v4406_v10, %v1111_v44  ;;  %v1688_v44 = vcvt.s32.f32 %v1686_v43 }
 0x307   : > { %v3073_v18 = vsel %vm1968_vm15, 1.0, %v6165_v2  ;;  %3531 = vmatprep.mubr.msk.f32.mxu1 %vm1968_vm15, %v6166_v40  ;;  %v1707_v41 = vsel %vm1706_vm14, %v1702_v63, inf  ;;  %v1730_v37 = vcvt.s32.f32 %v1728_v50 }
 0x308   : > { %v2806_v39 = vadd.f32 %v3073_v18, %v2805_v55  ;;  %1708 = vmin.xlane.f32.xlu1 %v1707_v41  ;;  %3532 = vmatmul.mubr.msk.f32.gmra.mxu1 %vm1969_vm0, %v6166_v40  ;;  %v1153_v49 = vadd.s32 %v1152_v24, %v1150_v42  ;;  %v1179_v55 = vcvt.f32.s32 %v4922_v9  ;;  %v1714_v18 = vand.u32 65535, %v4914_v57 }
 0x309   : > { %v5288_v56 = vpop.xlane.xlu1 %1690  ;;  %v1135_v60 = vpop.xlane.xlu0 %1134  ;;  %v1756_v24 = vand.u32 65535, %v6168_v3 }
 0x30a   : > { %v2807_v12 = vadd.f32 %v3074_v17, %v2806_v39  ;;  %vm1692_vm1 = vcmp.eq.f32.partialorder %v4909_v6, %v5288_v56  ;;  %v1136_v63 = vcvt.f32.s32 %v1135_v60  ;;  %vm1971_vm4 = vcmp.eq.s32.totalorder %v4406_v10, %v1153_v49 }
 0x30b   : > { %v1693_v27 = vsel %vm1692_vm1, %v1688_v44, inf  ;;  %v1180_v57 = vshll.u32 %v1179_v55, 16  ;;  %v1166_v39 = vshll.u32 %v1165_v32, 16  ;;  %v1716_v17 = vcvt.s32.f32 %v1714_v18  ;;  %v6170_v55 = vld [vmem:[#allocation31_spill] sm:$0xff]  ;;  %v6171_v18 = vld [vmem:[#allocation17_spill] sm:$0xff] }
 0x30c   : > { %v1139_v30 = vadd.s32 %v1138_v15, %v1136_v63  ;;  %1694 = vmin.xlane.f32.xlu0 %v1693_v27  ;;  %v1193_v32 = vcvt.f32.s32 %v4968_v1  ;;  %v6172_v1 = vld [vmem:[#allocation34_spill] sm:$0xff] }
 0x30d   : > { %v5295_v41 = vpop.xlane.xlu1 %1732  ;;  %v1177_v62 = vpop.xlane.xlu0 %1176 }
 0x30e   : > { %vm1734_vm2 = vcmp.eq.f32.partialorder %v4925_v34, %v5295_v41  ;;  %v1178_v43 = vcvt.f32.s32 %v1177_v62  ;;  %vm1970_vm3 = vcmp.eq.s32.totalorder %v4406_v10, %v1139_v30  ;;  %v3076_v34 = vsel %vm1971_vm4, 1.0, %v6165_v2 }
 0x30f   : > { %v3075_v6 = vsel %vm1970_vm3, 1.0, %v6165_v2  ;;  %3534 = vmatprep.mubr.msk.f32.mxu1 %vm1970_vm3, %v6166_v40  ;;  %v1735_v9 = vsel %vm1734_vm2, %v1730_v37, inf  ;;  %v1742_v30 = vand.u32 65535, %v6170_v55 }
 0x310   : > { %v2808_v42 = vadd.f32 %v3075_v6, %v2807_v12  ;;  %1736 = vmin.xlane.f32.xlu1 %v1735_v9  ;;  %3535 = vmatmul.mubr.msk.f32.gmra.mxu1 %vm1971_vm4, %v6166_v40  ;;  %v1181_v60 = vadd.s32 %v1180_v57, %v1178_v43  ;;  %v6169_v12 = vld [vmem:[#allocation33_spill] sm:$0xff]  ;;  %v1758_v9 = vcvt.s32.f32 %v1756_v24  ;;  %v1784_v24 = vand.u32 65535, %v6172_v1 }
 0x311   : > { %v5306_v50 = vpop.xlane.xlu1 %1718  ;;  %v1163_v15 = vpop.xlane.xlu0 %1162  ;;  %v1207_v63 = vcvt.f32.s32 %v6169_v12  ;;  %v6173_v12 = vld [vmem:[#allocation18_spill] sm:$0xff] }
 0x312   : > { %v2809_v44 = vadd.f32 %v3076_v34, %v2808_v42  ;;  %vm1720_vm5 = vcmp.eq.f32.partialorder %v4941_v13, %v5306_v50  ;;  %v1164_v37 = vcvt.f32.s32 %v1163_v15  ;;  %vm1973_vm8 = vcmp.eq.s32.totalorder %v4406_v10, %v1181_v60 }
 0x313   : > { %v1721_v49 = vsel %vm1720_vm5, %v1716_v17, inf  ;;  %v1208_v42 = vshll.u32 %v1207_v63, 16  ;;  %v3078_v34 = vsel %vm1973_vm8, 1.0, %v6165_v2  ;;  %v1786_v1 = vcvt.s32.f32 %v1784_v24 }
 0x314   : > { %v1167_v27 = vadd.s32 %v1166_v39, %v1164_v37  ;;  %1722 = vmin.xlane.f32.xlu0 %v1721_v49  ;;  %v1194_v39 = vshll.u32 %v1193_v32, 16  ;;  %v1744_v37 = vcvt.s32.f32 %v1742_v30  ;;  %v1221_v32 = vcvt.f32.s32 %v4998_v4  ;;  %v6176_v30 = vld [vmem:[#allocation38_spill] sm:$0xff]  ;;  %v6177_v4 = vld [vmem:[#allocation21_spill] sm:$0xff] }
 0x315   : > { %v5313_v62 = vpop.xlane.xlu1 %1760  ;;  %v1205_v6 = vpop.xlane.xlu0 %1204  ;;  %v1812_v24 = vand.u32 65535, %v6177_v4 }
 0x316   : > { %vm1762_vm6 = vcmp.eq.f32.partialorder %v6171_v18, %v5313_v62  ;;  %v1206_v43 = vcvt.f32.s32 %v1205_v6  ;;  %vm1972_vm7 = vcmp.eq.s32.totalorder %v4406_v10, %v1167_v27 }
 0x317   : > { %v3077_v13 = vsel %vm1972_vm7, 1.0, %v6165_v2  ;;  %3537 = vmatprep.mubr.msk.f32.mxu1 %vm1972_vm7, %v6166_v40  ;;  %v1763_v57 = vsel %vm1762_vm6, %v1758_v9, inf  ;;  %v6175_v9 = vld [vmem:[#allocation19_spill] sm:$0xff] }
 0x318   : > { %v2810_v3 = vadd.f32 %v3077_v13, %v2809_v44  ;;  %1764 = vmin.xlane.f32.xlu1 %v1763_v57  ;;  %3538 = vmatmul.mubr.msk.f32.gmra.mxu1 %vm1973_vm8, %v6166_v40  ;;  %v1209_v60 = vadd.s32 %v1208_v42, %v1206_v43  ;;  %v6174_v44 = vld [vmem:[#allocation20_spill] sm:$0xff]  ;;  %v1770_v18 = vand.u32 65535, %v6175_v9 }
 0x319   : > { %v5324_v15 = vpop.xlane.xlu1 %1746  ;;  %v1191_v17 = vpop.xlane.xlu0 %1190  ;;  %v1235_v55 = vcvt.f32.s32 %v6174_v44 }
 0x31a   : > { %v2811_v49 = vadd.f32 %v3078_v34, %v2810_v3  ;;  %vm1748_vm9 = vcmp.eq.f32.partialorder %v6173_v12, %v5324_v15  ;;  %v1192_v27 = vcvt.f32.s32 %v1191_v17  ;;  %vm1975_vm12 = vcmp.eq.s32.totalorder %v4406_v10, %v1209_v60 }
 0x31b   : > { %v1749_v63 = vsel %vm1748_vm9, %v1744_v37, inf  ;;  %v1222_v17 = vshll.u32 %v1221_v32, 16  ;;  %v3080_v37 = vsel %vm1975_vm12, 1.0, %v6165_v2  ;;  %v1249_v32 = vcvt.f32.s32 %v5026_v11 }
 0x31c   : > { %v1195_v6 = vadd.s32 %v1194_v39, %v1192_v27  ;;  %1750 = vmin.xlane.f32.xlu0 %v1749_v63  ;;  %v1236_v39 = vshll.u32 %v1235_v55, 16  ;;  %v1772_v63 = vcvt.s32.f32 %v1770_v18  ;;  %v1840_v11 = vand.u32 65535, %v5020_v33 }
 0x31d   : > { %v5331_v13 = vpop.xlane.xlu1 %1788  ;;  %v1233_v57 = vpop.xlane.xlu0 %1232 }
 0x31e   : > { %vm1790_vm10 = vcmp.eq.f32.partialorder %v6176_v30, %v5331_v13  ;;  %v1234_v43 = vcvt.f32.s32 %v1233_v57  ;;  %vm1974_vm11 = vcmp.eq.s32.totalorder %v4406_v10, %v1195_v6  ;;  %v6178_v57 = vld [vmem:[#allocation39_spill] sm:$0xff] }
 0x31f   : > { %v3079_v42 = vsel %vm1974_vm11, 1.0, %v6165_v2  ;;  %3540 = vmatprep.mubr.msk.f32.mxu1 %vm1974_vm11, %v6166_v40  ;;  %v1791_v3 = vsel %vm1790_vm10, %v1786_v1, inf  ;;  %v1798_v1 = vand.u32 65535, %v6178_v57 }
 0x320   : > { %v2812_v34 = vadd.f32 %v3079_v42, %v2811_v49  ;;  %1792 = vmin.xlane.f32.xlu1 %v1791_v3  ;;  %3541 = vmatmul.mubr.msk.f32.gmra.mxu1 %vm1975_vm12, %v6166_v40  ;;  %v1237_v60 = vadd.s32 %v1236_v39, %v1234_v43  ;;  %v1263_v49 = vcvt.f32.s32 %v5012_v14  ;;  %v1814_v3 = vcvt.s32.f32 %v1812_v24 }
 0x321   : > { %v5342_v12 = vpop.xlane.xlu1 %1774  ;;  %v1219_v27 = vpop.xlane.xlu0 %1218 }
 0x322   : > { %v2813_v44 = vadd.f32 %v3080_v37, %v2812_v34  ;;  %vm1776_vm13 = vcmp.eq.f32.partialorder %v5001_v22, %v5342_v12  ;;  %v1220_v6 = vcvt.f32.s32 %v1219_v27  ;;  %vm1977_vm0 = vcmp.eq.s32.totalorder %v4406_v10, %v1237_v60 }
 0x323   : > { %v1777_v55 = vsel %vm1776_vm13, %v1772_v63, inf  ;;  %v1264_v43 = vshll.u32 %v1263_v49, 16  ;;  %v1250_v34 = vshll.u32 %v1249_v32, 16  ;;  %v1277_v49 = vcvt.f32.s32 %v5054_v20  ;;  %v6180_v20 = vld [vmem:[#allocation22_spill] sm:$0xff] }
 0x324   : > { %v1223_v9 = vadd.s32 %v1222_v17, %v1220_v6  ;;  %1778 = vmin.xlane.f32.xlu0 %v1777_v55  ;;  %v1800_v17 = vcvt.s32.f32 %v1798_v1  ;;  %v6179_v55 = vld [vmem:[#allocation40_spill] sm:$0xff]  ;;  %v1842_v32 = vcvt.s32.f32 %v1840_v11 }
 0x325   : > { %v5349_v30 = vpop.xlane.xlu1 %1816  ;;  %v1261_v42 = vpop.xlane.xlu0 %1260  ;;  %v1826_v33 = vand.u32 65535, %v6179_v55 }
 0x326   : > { %vm1818_vm14 = vcmp.eq.f32.partialorder %v5015_v35, %v5349_v30  ;;  %v1262_v18 = vcvt.f32.s32 %v1261_v42  ;;  %vm1976_vm15 = vcmp.eq.s32.totalorder %v4406_v10, %v1223_v9  ;;  %v3082_v35 = vsel %vm1977_vm0, 1.0, %v6165_v2 }
 0x327   : > { %v3081_v22 = vsel %vm1976_vm15, 1.0, %v6165_v2  ;;  %3543 = vmatprep.mubr.msk.f32.mxu1 %vm1976_vm15, %v6166_v40  ;;  %v1819_v14 = vsel %vm1818_vm14, %v1814_v3, inf }
 0x328   : > { %v2814_v39 = vadd.f32 %v3081_v22, %v2813_v44  ;;  %1820 = vmin.xlane.f32.xlu1 %v1819_v14  ;;  %3544 = vmatmul.mubr.msk.f32.gmra.mxu1 %vm1977_vm0, %v6166_v40  ;;  %v1265_v37 = vadd.s32 %v1264_v43, %v1262_v18  ;;  %v1291_v44 = vcvt.f32.s32 %v5040_v8  ;;  %v1868_v18 = vand.u32 65535, %v6180_v20 }
 0x329   : > { %v5360_v4 = vpop.xlane.xlu1 %1802  ;;  %v1247_v24 = vpop.xlane.xlu0 %1246  ;;  %v1278_v22 = vshll.u32 %v1277_v49, 16 }
 0x32a   : > { %v2815_v27 = vadd.f32 %v3082_v35, %v2814_v39  ;;  %vm1804_vm1 = vcmp.eq.f32.partialorder %v5029_v61, %v5360_v4  ;;  %v1248_v63 = vcvt.f32.s32 %v1247_v24  ;;  %vm1979_vm4 = vcmp.eq.s32.totalorder %v4406_v10, %v1265_v37 }
 0x32b   : > { %v1805_v60 = vsel %vm1804_vm1, %v1800_v17, inf  ;;  %v1292_v42 = vshll.u32 %v1291_v44, 16  ;;  %v1828_v39 = vcvt.s32.f32 %v1826_v33  ;;  %v1319_v17 = vcvt.f32.s32 %v5067_v54 }
 0x32c   : > { %v1251_v6 = vadd.s32 %v1250_v34, %v1248_v63  ;;  %1806 = vmin.xlane.f32.xlu0 %v1805_v60  ;;  %v1305_v63 = vcvt.f32.s32 %v5080_v38  ;;  %v6181_v38 = vld [vmem:[#allocation41_spill] sm:$0xff] }
 0x32d   : > { %v5367_v9 = vpop.xlane.xlu1 %1844  ;;  %v1289_v57 = vpop.xlane.xlu0 %1288  ;;  %v1896_v49 = vand.u32 65535, %v6181_v38 }
 0x32e   : > { %vm1846_vm2 = vcmp.eq.f32.partialorder %v5043_v5, %v5367_v9  ;;  %v1290_v1 = vcvt.f32.s32 %v1289_v57  ;;  %vm1978_vm3 = vcmp.eq.s32.totalorder %v4406_v10, %v1251_v6  ;;  %v3084_v5 = vsel %vm1979_vm4, 1.0, %v6165_v2 }
 0x32f   : > { %v3083_v61 = vsel %vm1978_vm3, 1.0, %v6165_v2  ;;  %3546 = vmatprep.mubr.msk.f32.mxu1 %vm1978_vm3, %v6166_v40  ;;  %v1847_v8 = vsel %vm1846_vm2, %v1842_v32, inf  ;;  %v1870_v6 = vcvt.s32.f32 %v1868_v18  ;;  %v1306_v57 = vshll.u32 %v1305_v63, 16 }
 0x330   : > { %v2816_v3 = vadd.f32 %v3083_v61, %v2815_v27  ;;  %1848 = vmin.xlane.f32.xlu1 %v1847_v8  ;;  %3547 = vmatmul.mubr.msk.f32.gmra.mxu1 %vm1979_vm4, %v6166_v40  ;;  %v1293_v11 = vadd.s32 %v1292_v42, %v1290_v1  ;;  %v1854_v27 = vand.u32 65535, %v5062_v28  ;;  %v1320_v28 = vshll.u32 %v1319_v17, 16  ;;  %v6184_v17 = vld [vmem:[#allocation43_spill] sm:$0xff] }
 0x331   : > { %v5378_v14 = vpop.xlane.xlu1 %1830  ;;  %v1275_v43 = vpop.xlane.xlu0 %1274 }
 0x332   : > { %v2817_v34 = vadd.f32 %v3084_v5, %v2816_v3  ;;  %vm1832_vm5 = vcmp.eq.f32.partialorder %v5057_v19, %v5378_v14  ;;  %v1276_v35 = vcvt.f32.s32 %v1275_v43  ;;  %vm1981_vm8 = vcmp.eq.s32.totalorder %v4406_v10, %v1293_v11  ;;  %v6182_v3 = vld [vmem:[#allocation42_spill] sm:$0xff]  ;;  %v6183_v43 = vld [vmem:[#allocation23_spill] sm:$0xff] }
 0x333   : > { %v1833_v24 = vsel %vm1832_vm5, %v1828_v39, inf  ;;  %v1856_v61 = vcvt.s32.f32 %v1854_v27  ;;  %v1882_v39 = vand.u32 65535, %v6183_v43  ;;  %v1333_v11 = vcvt.f32.s32 %v5106_v48  ;;  %v6185_v48 = vld [vmem:[#allocation24_spill] sm:$0xff] }
 0x334   : > { %v1279_v37 = vadd.s32 %v1278_v22, %v1276_v35  ;;  %1834 = vmin.xlane.f32.xlu0 %v1833_v24  ;;  %v1347_v22 = vcvt.f32.s32 %v5093_v31  ;;  %v1898_v24 = vcvt.s32.f32 %v1896_v49 }
 0x335   : > { %v5385_v60 = vpop.xlane.xlu1 %1872  ;;  %v1317_v44 = vpop.xlane.xlu0 %1316 }
 0x336   : > { %vm1874_vm6 = vcmp.eq.f32.partialorder %v5070_v47, %v5385_v60  ;;  %v1318_v55 = vcvt.f32.s32 %v1317_v44  ;;  %vm1980_vm7 = vcmp.eq.s32.totalorder %v4406_v10, %v1279_v37  ;;  %v3086_v47 = vsel %vm1981_vm8, 1.0, %v6165_v2 }
 0x337   : > { %v3085_v19 = vsel %vm1980_vm7, 1.0, %v6165_v2  ;;  %3549 = vmatprep.mubr.msk.f32.mxu1 %vm1980_vm7, %v6166_v40  ;;  %v1875_v54 = vsel %vm1874_vm6, %v1870_v6, inf  ;;  %v1348_v63 = vshll.u32 %v1347_v22, 16  ;;  %v1924_v6 = vand.u32 65535, %v6185_v48 }
 0x338   : > { %v2818_v33 = vadd.f32 %v3085_v19, %v2817_v34  ;;  %1876 = vmin.xlane.f32.xlu1 %v1875_v54  ;;  %3550 = vmatmul.mubr.msk.f32.gmra.mxu1 %vm1981_vm8, %v6166_v40  ;;  %v1321_v8 = vadd.s32 %v1320_v28, %v1318_v55  ;;  %v1334_v55 = vshll.u32 %v1333_v11, 16 }
 0x339   : > { %v5396_v32 = vpop.xlane.xlu1 %1858  ;;  %v1303_v1 = vpop.xlane.xlu0 %1302  ;;  %v1926_v22 = vcvt.s32.f32 %v1924_v6 }
 0x33a   : > { %v2819_v42 = vadd.f32 %v3086_v47, %v2818_v33  ;;  %vm1860_vm9 = vcmp.eq.f32.partialorder %v6182_v3, %v5396_v32  ;;  %v1304_v20 = vcvt.f32.s32 %v1303_v1  ;;  %vm1983_vm12 = vcmp.eq.s32.totalorder %v4406_v10, %v1321_v8 }
 0x33b   : > { %v1861_v18 = vsel %vm1860_vm9, %v1856_v61, inf  ;;  %v3088_v19 = vsel %vm1983_vm12, 1.0, %v6165_v2  ;;  %v1884_v33 = vcvt.s32.f32 %v1882_v39  ;;  %v6186_v61 = vld [vmem:[#allocation25_spill] sm:$0xff]  ;;  %v6189_v39 = vld [vmem:[#allocation27_spill] sm:$0xff] }
 0x33c   : > { %v1307_v5 = vadd.s32 %v1306_v57, %v1304_v20  ;;  %1862 = vmin.xlane.f32.xlu0 %v1861_v18  ;;  %v1910_v8 = vand.u32 65535, %v6186_v61 }
 0x33d   : > { %v5403_v34 = vpop.xlane.xlu1 %1900  ;;  %v1345_v35 = vpop.xlane.xlu0 %1344 }
 0x33e   : > { %vm1902_vm10 = vcmp.eq.f32.partialorder %v6184_v17, %v5403_v34  ;;  %v1346_v37 = vcvt.f32.s32 %v1345_v35  ;;  %vm1982_vm11 = vcmp.eq.s32.totalorder %v4406_v10, %v1307_v5  ;;  %v6188_v5 = vld [vmem:[#allocation32_spill] sm:$0xff]  ;;  %v6190_v17 = vld [vmem:[#allocation30_spill] sm:$0xff]  ;;  %v1912_v48 = vcvt.s32.f32 %v1910_v8 }
 0x33f   : > { %v3087_v31 = vsel %vm1982_vm11, 1.0, %v6165_v2  ;;  %3552 = vmatprep.mubr.msk.f32.mxu1 %vm1982_vm11, %v6166_v40  ;;  %v1903_v27 = vsel %vm1902_vm10, %v1898_v24, inf  ;;  %v1361_v43 = vcvt.f32.s32 %v6188_v5  ;;  %v6195_v5 = vld [vmem:[#allocation37_spill] sm:$0xff] }
 0x340   : > { %v2820_v44 = vadd.f32 %v3087_v31, %v2819_v42  ;;  %1904 = vmin.xlane.f32.xlu1 %v1903_v27  ;;  %3553 = vmatmul.mubr.msk.f32.gmra.mxu1 %vm1983_vm12, %v6166_v40  ;;  %v1349_v38 = vadd.s32 %v1348_v63, %v1346_v37  ;;  %v6187_v42 = vld [vmem:[#allocation26_spill] sm:$0xff]  ;;  %v1938_v37 = vand.u32 65535, %v6190_v17 }
 0x341   : > { %v5414_v54 = vpop.xlane.xlu1 %1886  ;;  %v1331_v28 = vpop.xlane.xlu0 %1330  ;;  %v1375_v3 = vcvt.f32.s32 %v6187_v42  ;;  %v1362_v6 = vshll.u32 %v1361_v43, 16 }
 0x342   : > { %v2821_v49 = vadd.f32 %v3088_v19, %v2820_v44  ;;  %vm1888_vm13 = vcmp.eq.f32.partialorder %v5109_v29, %v5414_v54  ;;  %v1332_v57 = vcvt.f32.s32 %v1331_v28  ;;  %vm1985_vm0 = vcmp.eq.s32.totalorder %v4406_v10, %v1349_v38  ;;  %v6191_v19 = vld [vmem:[#allocation35_spill] sm:$0xff] }
 0x343   : > { %v1889_v47 = vsel %vm1888_vm13, %v1884_v33, inf  ;;  %v1376_v31 = vshll.u32 %v1375_v3, 16  ;;  %v3090_v27 = vsel %vm1985_vm0, 1.0, %v6165_v2 }
 0x344   : > { %v1335_v1 = vadd.s32 %v1334_v55, %v1332_v57  ;;  %1890 = vmin.xlane.f32.xlu0 %v1889_v47  ;;  %v6192_v57 = vld [vmem:[#allocation54_spill] sm:$0xff] }
 0x345   : > { %v5420_v20 = vpop.xlane.xlu1 %1928  ;;  %v1373_v18 = vpop.xlane.xlu0 %1372  ;;  %v1952_v47 = vand.u32 65535, %v6192_v57  ;;  %v6198_v57 = vld [vmem:[#allocation59_spill] sm:$0xff] }
 0x346   : > { %vm1930_vm14 = vcmp.eq.f32.partialorder %v6189_v39, %v5420_v20  ;;  %vm1984_vm15 = vcmp.eq.s32.totalorder %v4406_v10, %v1335_v1  ;;  %v1374_v29 = vcvt.f32.s32 %v1373_v18  ;;  %v6193_v1 = vld [vmem:[#allocation55_spill] sm:$0xff]  ;;  %v1940_v18 = vcvt.s32.f32 %v1938_v37 }
 0x347   : > { %v3089_v11 = vsel %vm1984_vm15, 1.0, %v6165_v2  ;;  %3555 = vmatprep.mubr.msk.f32.mxu1 %vm1984_vm15, %v6166_v40  ;;  %v1931_v35 = vsel %vm1930_vm14, %v1926_v22, inf  ;;  %v1403_v61 = vcvt.f32.s32 %v6193_v1  ;;  %v6194_v22 = vld [vmem:[#allocation56_spill] sm:$0xff]  ;;  %v1417_v1 = vcvt.f32.s32 %v6198_v57 }
 0x348   : > { %v2822_v24 = vadd.f32 %v3089_v11, %v2821_v49  ;;  %1932 = vmin.xlane.f32.xlu1 %v1931_v35  ;;  %3556 = vmatmul.mubr.msk.f32.gmra.mxu1 %vm1985_vm0, %v6166_v40  ;;  %v1377_v33 = vadd.s32 %v1376_v31, %v1374_v29  ;;  %v1389_v8 = vcvt.f32.s32 %v6194_v22  ;;  %v6196_v31 = vld [vmem:[#allocation36_spill] sm:$0xff] }
 0x349   : > { %v5432_v63 = vpop.xlane.xlu1 %1914  ;;  %v1359_v44 = vpop.xlane.xlu0 %1358  ;;  %v1404_v29 = vshll.u32 %v1403_v61, 16 }
 0x34a   : > { %v2823_v55 = vadd.f32 %v3090_v27, %v2822_v24  ;;  %vm1916_vm1 = vcmp.eq.f32.partialorder %v6191_v19, %v5432_v63  ;;  %v1360_v28 = vcvt.f32.s32 %v1359_v44  ;;  %vm1987_vm4 = vcmp.eq.s32.totalorder %v4406_v10, %v1377_v33  ;;  %v6197_v19 = vld [vmem:[#allocation58_spill] sm:$0xff] }
 0x34b   : > { %v1917_v38 = vsel %vm1916_vm1, %v1912_v48, inf  ;;  %v1954_v24 = vcvt.s32.f32 %v1952_v47  ;;  %v1390_v17 = vshll.u32 %v1389_v8, 16  ;;  %v3092_v61 = vsel %vm1987_vm4, 1.0, %v6165_v2 }
 0x34c   : > { %v1363_v49 = vadd.s32 %v1362_v6, %v1360_v28  ;;  %1918 = vmin.xlane.f32.xlu0 %v1917_v38  ;;  %v1431_v28 = vcvt.f32.s32 %v6197_v19  ;;  %v1418_v8 = vshll.u32 %v1417_v1, 16 }
 0x34d   : > { %v5438_v42 = vpop.xlane.xlu1 %1942  ;;  %v1401_v3 = vpop.xlane.xlu0 %1400 }
 0x34e   : > { %vm1944_vm2 = vcmp.eq.f32.partialorder %v6195_v5, %v5438_v42  ;;  %vm1986_vm3 = vcmp.eq.s32.totalorder %v4406_v10, %v1363_v49  ;;  %v1402_v43 = vcvt.f32.s32 %v1401_v3 }
 0x34f   : > { %3558 = vmatprep.mubr.msk.f32.mxu1 %vm1986_vm3, %v6166_v40  ;;  %v1945_v39 = vsel %vm1944_vm2, %v1940_v18, inf  ;;  %v3091_v37 = vsel %vm1986_vm3, 1.0, %v6165_v2  ;;  %v1432_v18 = vshll.u32 %v1431_v28, 16  ;;  %v1473_v28 = vcvt.f32.s32 %v5172_v36 }
 0x350   : > { %1946 = vmin.xlane.f32.xlu0 %v1945_v39  ;;  %3559 = vmatmul.mubr.msk.f32.gmra.mxu1 %vm1987_vm4, %v6166_v40  ;;  %v1405_v44 = vadd.s32 %v1404_v29, %v1402_v43  ;;  %v2824_v38 = vadd.f32 %v3091_v37, %v2823_v55  ;;  %v6199_v29 = vld [vmem:[#allocation60_spill] sm:$0xff]  ;;  %v6200_v37 = vld [vmem:[#allocation57_spill] sm:$0xff] }
 0x351   : > { %v5449_v11 = vpop.xlane.xlu1 %1956  ;;  %v1387_v35 = vpop.xlane.xlu0 %1386 }
 0x352   : > { %vm1958_vm5 = vcmp.eq.f32.partialorder %v6196_v31, %v5449_v11  ;;  %v1388_v27 = vcvt.f32.s32 %v1387_v35  ;;  %vm1989_vm7 = vcmp.eq.s32.totalorder %v4406_v10, %v1405_v44  ;;  %v2825_v55 = vadd.f32 %v3092_v61, %v2824_v38 }
 0x353   : > { %v1959_v48 = vsel %vm1958_vm5, %v1954_v24, inf  ;;  %v1459_v35 = vcvt.f32.s32 %v6199_v29  ;;  %v1445_v31 = vcvt.f32.s32 %v6200_v37  ;;  %v3094_v33 = vsel %vm1989_vm7, 1.0, %v6165_v2 }
 0x354   : > { %v1391_v6 = vadd.s32 %v1390_v17, %v1388_v27  ;;  %1960 = vmin.xlane.f32.xlu1 %v1959_v48  ;;  %v1487_v44 = vcvt.f32.s32 %v5186_v46  ;;  %v1543_v37 = vcvt.f32.s32 %v5204_v51 }
 0x355   : > { %v1429_v49 = vpop.xlane.xlu0 %1428  ;;  %v1460_v19 = vshll.u32 %v1459_v35, 16  ;;  %v1446_v1 = vshll.u32 %v1445_v31, 16 }
 0x356   : > { %vm1988_vm6 = vcmp.eq.s32.totalorder %v4406_v10, %v1391_v6  ;;  %v1430_v47 = vcvt.f32.s32 %v1429_v49  ;;  %v1488_v46 = vshll.u32 %v1487_v44, 16 }
 0x357   : > { %3561 = vmatprep.mubr.msk.f32.mxu1 %vm1988_vm6, %v6166_v40  ;;  %v3093_v3 = vsel %vm1988_vm6, 1.0, %v6165_v2 }
 0x358   : > { %3562 = vmatmul.mubr.msk.f32.gmra.mxu1 %vm1989_vm7, %v6166_v40  ;;  %v1433_v43 = vadd.s32 %v1432_v18, %v1430_v47  ;;  %v2826_v39 = vadd.f32 %v3093_v3, %v2825_v55  ;;  %v1515_v18 = vcvt.f32.s32 %v5194_v58  ;;  %v1501_v55 = vcvt.f32.s32 %v5184_v59 }
 0x359   : > { %v1415_v22 = vpop.xlane.xlu0 %1414 }
 0x35a   : > { %v1416_v5 = vcvt.f32.s32 %v1415_v22  ;;  %v2827_v48 = vadd.f32 %v3094_v33, %v2826_v39  ;;  %vm1991_vm9 = vcmp.eq.s32.totalorder %v4406_v10, %v1433_v43  ;;  %v1502_v59 = vshll.u32 %v1501_v55, 16 }
 0x35b   : > { %v3096_v22 = vsel %vm1991_vm9, 1.0, %v6165_v2 }
 0x35c   : > { %v1419_v24 = vadd.s32 %v1418_v8, %v1416_v5  ;;  %v1474_v5 = vshll.u32 %v1473_v28, 16 }
 0x35d   : > { %v1457_v17 = vpop.xlane.xlu0 %1456 }
 0x35e   : > { %v1458_v27 = vcvt.f32.s32 %v1457_v17  ;;  %vm1990_vm8 = vcmp.eq.s32.totalorder %v4406_v10, %v1419_v24  ;;  %v1516_v17 = vshll.u32 %v1515_v18, 16 }
 0x35f   : > { %v3095_v6 = vsel %vm1990_vm8, 1.0, %v6165_v2  ;;  %3564 = vmatprep.mubr.msk.f32.mxu1 %vm1990_vm8, %v6166_v40 }
 0x360   : > { %3565 = vmatmul.mubr.msk.f32.gmra.mxu1 %vm1991_vm9, %v6166_v40  ;;  %v2828_v38 = vadd.f32 %v3095_v6, %v2827_v48  ;;  %v1461_v47 = vadd.s32 %v1460_v19, %v1458_v27  ;;  %v1529_v27 = vcvt.f32.s32 %v5198_v26  ;;  %v1557_v26 = vcvt.f32.s32 %v5212_v53 }
 0x361   : > { %v1485_v49 = vpop.xlane.xlu1 %1484  ;;  %v1443_v57 = vpop.xlane.xlu0 %1442 }
 0x362   : > { %v1486_v61 = vcvt.f32.s32 %v1485_v49  ;;  %v1444_v3 = vcvt.f32.s32 %v1443_v57  ;;  %v2829_v43 = vadd.f32 %v3096_v22, %v2828_v38  ;;  %vm1993_vm11 = vcmp.eq.s32.totalorder %v4406_v10, %v1461_v47 }
 0x363   : > { %v3098_v48 = vsel %vm1993_vm11, 1.0, %v6165_v2  ;;  %v1544_v49 = vshll.u32 %v1543_v37, 16  ;;  %v1571_v57 = vcvt.f32.s32 %v5214_v0 }
 0x364   : > { %v1447_v8 = vadd.s32 %v1446_v1, %v1444_v3  ;;  %v1489_v39 = vadd.s32 %v1488_v46, %v1486_v61  ;;  %v1530_v3 = vshll.u32 %v1529_v27, 16 }
 0x365   : > { %v1513_v29 = vpop.xlane.xlu1 %1512  ;;  %v1471_v36 = vpop.xlane.xlu0 %1470 }
 0x366   : > { %v1514_v35 = vcvt.f32.s32 %v1513_v29  ;;  %v1472_v24 = vcvt.f32.s32 %v1471_v36  ;;  %vm1992_vm10 = vcmp.eq.s32.totalorder %v4406_v10, %v1447_v8  ;;  %vm1995_vm12 = vcmp.eq.s32.totalorder %v4406_v10, %v1489_v39 }
 0x367   : > { %v3097_v58 = vsel %vm1992_vm10, 1.0, %v6165_v2  ;;  %3567 = vmatprep.mubr.msk.f32.mxu1 %vm1992_vm10, %v6166_v40  ;;  %v3100_v18 = vsel %vm1995_vm12, 1.0, %v6165_v2  ;;  %v1558_v39 = vshll.u32 %v1557_v26, 16  ;;  %v1599_v29 = vcvt.f32.s32 %v5221_v16 }
 0x368   : > { %v1475_v31 = vadd.s32 %v1474_v5, %v1472_v24  ;;  %v2830_v33 = vadd.f32 %v3097_v58, %v2829_v43  ;;  %3568 = vmatmul.mubr.msk.f32.gmra.mxu1 %vm1993_vm11, %v6166_v40  ;;  %v1517_v44 = vadd.s32 %v1516_v17, %v1514_v35  ;;  %v1572_v43 = vshll.u32 %v1571_v57, 16 }
 0x369   : > { %v1541_v6 = vpop.xlane.xlu1 %1540  ;;  %v1499_v19 = vpop.xlane.xlu0 %1498  ;;  %v1585_v24 = vcvt.f32.s32 %v5226_v25 }
 0x36a   : > { %v2831_v28 = vadd.f32 %v3098_v48, %v2830_v33  ;;  %v1542_v51 = vcvt.f32.s32 %v1541_v6  ;;  %v1500_v38 = vcvt.f32.s32 %v1499_v19  ;;  %vm1994_vm13 = vcmp.eq.s32.totalorder %v4406_v10, %v1475_v31 }
 0x36b   : > { %v3099_v1 = vsel %vm1994_vm13, 1.0, %v6165_v2  ;;  %3570 = vmatprep.mubr.msk.f32.mxu1 %vm1994_vm13, %v6166_v40  ;;  %vm1997_vm14 = vcmp.eq.s32.totalorder %v4406_v10, %v1517_v44  ;;  %v1600_v44 = vshll.u32 %v1599_v29, 16  ;;  %v1586_v25 = vshll.u32 %v1585_v24, 16 }
 0x36c   : > { %v1503_v47 = vadd.s32 %v1502_v59, %v1500_v38  ;;  %v2832_v61 = vadd.f32 %v3099_v1, %v2831_v28  ;;  %3571 = vmatmul.mubr.msk.f32.gmra.mxu1 %vm1995_vm12, %v6166_v40  ;;  %v1545_v46 = vadd.s32 %v1544_v49, %v1542_v51  ;;  %v3102_v37 = vsel %vm1997_vm14, 1.0, %v6165_v2 }
 0x36d   : > { %v1569_v55 = vpop.xlane.xlu1 %1568  ;;  %v1527_v22 = vpop.xlane.xlu0 %1526  ;;  %v1627_v1 = vcvt.f32.s32 %v5231_v21  ;;  %v1655_v29 = vcvt.f32.s32 %v5242_v45  ;;  %v1641_v24 = vcvt.f32.s32 %v5248_v23 }
 0x36e   : > { %v2833_v8 = vadd.f32 %v3100_v18, %v2832_v61  ;;  %v1570_v0 = vcvt.f32.s32 %v1569_v55  ;;  %v1528_v5 = vcvt.f32.s32 %v1527_v22  ;;  %vm1996_vm15 = vcmp.eq.s32.totalorder %v4406_v10, %v1503_v47 }
 0x36f   : > { %v3101_v53 = vsel %vm1996_vm15, 1.0, %v6165_v2  ;;  %3573 = vmatprep.mubr.msk.f32.mxu1 %vm1996_vm15, %v6166_v40  ;;  %vm1999_vm0 = vcmp.eq.s32.totalorder %v4406_v10, %v1545_v46  ;;  %v1613_v61 = vcvt.f32.s32 %v5236_v52  ;;  %v1628_v21 = vshll.u32 %v1627_v1, 16 }
 0x370   : > { %v1531_v36 = vadd.s32 %v1530_v3, %v1528_v5  ;;  %v2834_v35 = vadd.f32 %v3101_v53, %v2833_v8  ;;  %3574 = vmatmul.mubr.msk.f32.gmra.mxu1 %vm1997_vm14, %v6166_v40  ;;  %v1573_v17 = vadd.s32 %v1572_v43, %v1570_v0  ;;  %v3104_v19 = vsel %vm1999_vm0, 1.0, %v6165_v2 }
 0x371   : > { %v1597_v58 = vpop.xlane.xlu1 %1596  ;;  %v1555_v59 = vpop.xlane.xlu0 %1554  ;;  %v1614_v5 = vshll.u32 %v1613_v61, 16 }
 0x372   : > { %v2835_v31 = vadd.f32 %v3102_v37, %v2834_v35  ;;  %v1598_v33 = vcvt.f32.s32 %v1597_v58  ;;  %v1556_v27 = vcvt.f32.s32 %v1555_v59  ;;  %vm1998_vm1 = vcmp.eq.s32.totalorder %v4406_v10, %v1531_v36 }
 0x373   : > { %v3103_v16 = vsel %vm1998_vm1, 1.0, %v6165_v2  ;;  %3576 = vmatprep.mubr.msk.f32.mxu1 %vm1998_vm1, %v6166_v40  ;;  %vm2001_vm2 = vcmp.eq.s32.totalorder %v4406_v10, %v1573_v17  ;;  %v1656_v58 = vshll.u32 %v1655_v29, 16 }
 0x374   : > { %v1559_v48 = vadd.s32 %v1558_v39, %v1556_v27  ;;  %v2836_v6 = vadd.f32 %v3103_v16, %v2835_v31  ;;  %3577 = vmatmul.mubr.msk.f32.gmra.mxu1 %vm1999_vm0, %v6166_v40  ;;  %v1601_v51 = vadd.s32 %v1600_v44, %v1598_v33  ;;  %v3106_v3 = vsel %vm2001_vm2, 1.0, %v6165_v2  ;;  %v6201_v44 = vld [vmem:[#allocation61_spill] sm:$0xff] }
 0x375   : > { %v1583_v28 = vpop.xlane.xlu0 %1582  ;;  %v1642_v33 = vshll.u32 %v1641_v24, 16 }
 0x376   : > { %v2837_v38 = vadd.f32 %v3104_v19, %v2836_v6  ;;  %v1584_v49 = vcvt.f32.s32 %v1583_v28  ;;  %vm2000_vm3 = vcmp.eq.s32.totalorder %v4406_v10, %v1559_v48  ;;  %vm2003_vm5 = vcmp.eq.s32.totalorder %v4406_v10, %v1601_v51 }
 0x377   : > { %v3105_v57 = vsel %vm2000_vm3, 1.0, %v6165_v2  ;;  %3579 = vmatprep.mubr.msk.f32.mxu1 %vm2000_vm3, %v6166_v40  ;;  %v3108_v0 = vsel %vm2003_vm5, 1.0, %v6165_v2  ;;  %v1683_v48 = vcvt.f32.s32 %v6201_v44  ;;  %v1669_v19 = vcvt.f32.s32 %v5270_v7 }
 0x378   : > { %v1587_v26 = vadd.s32 %v1586_v25, %v1584_v49  ;;  %v2838_v47 = vadd.f32 %v3105_v57, %v2837_v38  ;;  %3580 = vmatmul.mubr.msk.f32.gmra.mxu1 %vm2001_vm2, %v6166_v40 }
 0x379   : > { %v1625_v46 = vpop.xlane.xlu1 %1624  ;;  %v1684_v38 = vshll.u32 %v1683_v48, 16 }
 0x37a   : > { %v2839_v18 = vadd.f32 %v3106_v3, %v2838_v47  ;;  %v1626_v55 = vcvt.f32.s32 %v1625_v46  ;;  %vm2002_vm4 = vcmp.eq.s32.totalorder %v4406_v10, %v1587_v26  ;;  %v1670_v26 = vshll.u32 %v1669_v19, 16  ;;  %v6202_v3 = vld [vmem:[#allocation62_spill] sm:$0xff] }
 0x37b   : > { %v3107_v22 = vsel %vm2002_vm4, 1.0, %v6165_v2  ;;  %3582 = vmatprep.mubr.msk.f32.mxu1 %vm2002_vm4, %v6166_v40  ;;  %v1711_v46 = vcvt.f32.s32 %v6202_v3 }
 0x37c   : > { %v2840_v8 = vadd.f32 %v3107_v22, %v2839_v18  ;;  %3583 = vmatmul.mubr.msk.f32.gmra.mxu1 %vm2003_vm5, %v6166_v40  ;;  %v1629_v43 = vadd.s32 %v1628_v21, %v1626_v55  ;;  %v1697_v22 = vcvt.f32.s32 %v5288_v56 }
 0x37d   : > { %v1611_v52 = vpop.xlane.xlu0 %1610 }
 0x37e   : > { %v2841_v53 = vadd.f32 %v3108_v0, %v2840_v8  ;;  %v1612_v39 = vcvt.f32.s32 %v1611_v52  ;;  %vm2005_vm7 = vcmp.eq.s32.totalorder %v4406_v10, %v1629_v43  ;;  %v1712_v0 = vshll.u32 %v1711_v46, 16 }
 0x37f   : > { %v3110_v31 = vsel %vm2005_vm7, 1.0, %v6165_v2 }
 0x380   : > { %v1615_v36 = vadd.s32 %v1614_v5, %v1612_v39 }
 0x381   : > { %v1653_v35 = vpop.xlane.xlu1 %1652 }
 0x382   : > { %v1654_v17 = vcvt.f32.s32 %v1653_v35  ;;  %vm2004_vm6 = vcmp.eq.s32.totalorder %v4406_v10, %v1615_v36  ;;  %v1739_v36 = vcvt.f32.s32 %v5295_v41 }
 0x383   : > { %v3109_v37 = vsel %vm2004_vm6, 1.0, %v6165_v2  ;;  %3585 = vmatprep.mubr.msk.f32.mxu1 %vm2004_vm6, %v6166_v40 }
 0x384   : > { %v2842_v59 = vadd.f32 %v3109_v37, %v2841_v53  ;;  %3586 = vmatmul.mubr.msk.f32.gmra.mxu1 %vm2005_vm7, %v6166_v40  ;;  %v1657_v27 = vadd.s32 %v1656_v58, %v1654_v17  ;;  %v1698_v53 = vshll.u32 %v1697_v22, 16  ;;  %v1725_v17 = vcvt.f32.s32 %v5306_v50 }
 0x385   : > { %v1639_v45 = vpop.xlane.xlu0 %1638 }
 0x386   : > { %v2843_v16 = vadd.f32 %v3110_v31, %v2842_v59  ;;  %v1640_v23 = vcvt.f32.s32 %v1639_v45  ;;  %vm2007_vm9 = vcmp.eq.s32.totalorder %v4406_v10, %v1657_v27  ;;  %v1740_v59 = vshll.u32 %v1739_v36, 16 }
 0x387   : > { %v3112_v57 = vsel %vm2007_vm9, 1.0, %v6165_v2 }
 0x388   : > { %v1643_v6 = vadd.s32 %v1642_v33, %v1640_v23  ;;  %v1726_v33 = vshll.u32 %v1725_v17, 16  ;;  %v1767_v23 = vcvt.f32.s32 %v5313_v62 }
 0x389   : > { %v1681_v25 = vpop.xlane.xlu1 %1680 }
 0x38a   : > { %v1682_v28 = vcvt.f32.s32 %v1681_v25  ;;  %vm2006_vm8 = vcmp.eq.s32.totalorder %v4406_v10, %v1643_v6  ;;  %v1753_v6 = vcvt.f32.s32 %v5324_v15 }
 0x38b   : > { %v3111_v51 = vsel %vm2006_vm8, 1.0, %v6165_v2  ;;  %3588 = vmatprep.mubr.msk.f32.mxu1 %vm2006_vm8, %v6166_v40 }
 0x38c   : > { %v2844_v49 = vadd.f32 %v3111_v51, %v2843_v16  ;;  %3589 = vmatmul.mubr.msk.f32.gmra.mxu1 %vm2007_vm9, %v6166_v40  ;;  %v1685_v47 = vadd.s32 %v1684_v38, %v1682_v28  ;;  %v1768_v28 = vshll.u32 %v1767_v23, 16 }
 0x38d   : > { %v1667_v1 = vpop.xlane.xlu0 %1666 }
 0x38e   : > { %v2845_v61 = vadd.f32 %v3112_v57, %v2844_v49  ;;  %v1668_v7 = vcvt.f32.s32 %v1667_v1  ;;  %vm2009_vm11 = vcmp.eq.s32.totalorder %v4406_v10, %v1685_v47  ;;  %v1754_v49 = vshll.u32 %v1753_v6, 16 }
 0x38f   : > { %v3114_v5 = vsel %vm2009_vm11, 1.0, %v6165_v2  ;;  %v1879_v6 = vcvt.f32.s32 %v5385_v60  ;;  %v3698_v60 = vld [vmem:[%s4112_s7] sm:$0xff] }
 0x390   : > { %v1671_v18 = vadd.s32 %v1670_v26, %v1668_v7  ;;  %v1795_v26 = vcvt.f32.s32 %v5331_v13  ;;  %v1781_v7 = vcvt.f32.s32 %v5342_v12 }
 0x391   : > { %v1709_v55 = vpop.xlane.xlu1 %1708 }
 0x392   : > { %v1710_v21 = vcvt.f32.s32 %v1709_v55  ;;  %vm2008_vm10 = vcmp.eq.s32.totalorder %v4406_v10, %v1671_v18  ;;  %v1796_v18 = vshll.u32 %v1795_v26, 16  ;;  %v1880_v26 = vshll.u32 %v1879_v6, 16 }
 0x393   : > { %v3113_v8 = vsel %vm2008_vm10, 1.0, %v6165_v2  ;;  %3591 = vmatprep.mubr.msk.f32.mxu1 %vm2008_vm10, %v6166_v40 }
 0x394   : > { %v2846_v52 = vadd.f32 %v3113_v8, %v2845_v61  ;;  %3592 = vmatmul.mubr.msk.f32.gmra.mxu1 %vm2009_vm11, %v6166_v40  ;;  %v1713_v39 = vadd.s32 %v1712_v0, %v1710_v21  ;;  %v1782_v21 = vshll.u32 %v1781_v7, 16 }
 0x395   : > { %v1695_v43 = vpop.xlane.xlu0 %1694 }
 0x396   : > { %v2847_v29 = vadd.f32 %v3114_v5, %v2846_v52  ;;  %v1696_v56 = vcvt.f32.s32 %v1695_v43  ;;  %vm2011_vm13 = vcmp.eq.s32.totalorder %v4406_v10, %v1713_v39  ;;  %v1823_v52 = vcvt.f32.s32 %v5349_v30 }
 0x397   : > { %v3116_v45 = vsel %vm2011_vm13, 1.0, %v6165_v2 }
 0x398   : > { %v1699_v35 = vadd.s32 %v1698_v53, %v1696_v56  ;;  %v1809_v53 = vcvt.f32.s32 %v5360_v4  ;;  %v1824_v56 = vshll.u32 %v1823_v52, 16  ;;  %v1893_v52 = vcvt.f32.s32 %v5414_v54 }
 0x399   : > { %v1737_v24 = vpop.xlane.xlu1 %1736 }
 0x39a   : > { %v1738_v37 = vcvt.f32.s32 %v1737_v24  ;;  %vm2010_vm12 = vcmp.eq.s32.totalorder %v4406_v10, %v1699_v35  ;;  %v1810_v24 = vshll.u32 %v1809_v53, 16  ;;  %v3699_v53 = vld [vmem:[%s4112_s7 + $0x18] sm:$0xff] }
 0x39b   : > { %v3115_v58 = vsel %vm2010_vm12, 1.0, %v6165_v2  ;;  %3594 = vmatprep.mubr.msk.f32.mxu1 %vm2010_vm12, %v6166_v40 }
 0x39c   : > { %v2848_v31 = vadd.f32 %v3115_v58, %v2847_v29  ;;  %3595 = vmatmul.mubr.msk.f32.gmra.mxu1 %vm2011_vm13, %v6166_v40  ;;  %v1741_v27 = vadd.s32 %v1740_v59, %v1738_v37  ;;  %v1851_v58 = vcvt.f32.s32 %v5367_v9 }
 0x39d   : > { %v1723_v41 = vpop.xlane.xlu0 %1722 }
 0x39e   : > { %v2849_v16 = vadd.f32 %v3116_v45, %v2848_v31  ;;  %v1724_v50 = vcvt.f32.s32 %v1723_v41  ;;  %vm2013_vm15 = vcmp.eq.s32.totalorder %v4406_v10, %v1741_v27  ;;  %v1837_v45 = vcvt.f32.s32 %v5378_v14 }
 0x39f   : > { %v3118_v38 = vsel %vm2013_vm15, 1.0, %v6165_v2  ;;  %v1852_v27 = vshll.u32 %v1851_v58, 16 }
 0x3a0   : > { %v1727_v44 = vadd.s32 %v1726_v33, %v1724_v50  ;;  %v1838_v23 = vshll.u32 %v1837_v45, 16  ;;  %v1935_v45 = vcvt.f32.s32 %v5420_v20 }
 0x3a1   : > { %v1765_v48 = vpop.xlane.xlu1 %1764 }
 0x3a2   : > { %v1766_v25 = vcvt.f32.s32 %v1765_v48  ;;  %vm2012_vm14 = vcmp.eq.s32.totalorder %v4406_v10, %v1727_v44 }
 0x3a3   : > { %v3117_v19 = vsel %vm2012_vm14, 1.0, %v6165_v2  ;;  %3597 = vmatprep.mubr.msk.f32.mxu1 %vm2012_vm14, %v6166_v40 }
 0x3a4   : > { %v2850_v51 = vadd.f32 %v3117_v19, %v2849_v16  ;;  %3598 = vmatmul.mubr.msk.f32.gmra.mxu1 %vm2013_vm15, %v6166_v40  ;;  %v1769_v57 = vadd.s32 %v1768_v28, %v1766_v25  ;;  %v3697_v28 = vld [vmem:[%s4112_s7 + $0x8] sm:$0xff] }
 0x3a5   : > { %v1751_v62 = vpop.xlane.xlu0 %1750 }
 0x3a6   : > { %v2851_v1 = vadd.f32 %v3118_v38, %v2850_v51  ;;  %v1752_v15 = vcvt.f32.s32 %v1751_v62  ;;  %vm2015_vm1 = vcmp.eq.s32.totalorder %v4406_v10, %v1769_v57  ;;  %v1865_v62 = vcvt.f32.s32 %v5396_v32 }
 0x3a7   : > { %v3120_v22 = vsel %vm2015_vm1, 1.0, %v6165_v2 }
 0x3a8   : > { %v1755_v47 = vadd.s32 %v1754_v49, %v1752_v15 }
 0x3a9   : > { %v1793_v61 = vpop.xlane.xlu1 %1792 }
 0x3aa   : > { %v1794_v3 = vcvt.f32.s32 %v1793_v61  ;;  %vm2014_vm0 = vcmp.eq.s32.totalorder %v4406_v10, %v1755_v47 }
 0x3ab   : > { %v3119_v46 = vsel %vm2014_vm0, 1.0, %v6165_v2  ;;  %3600 = vmatprep.mubr.msk.f32.mxu1 %vm2014_vm0, %v6166_v40 }
 0x3ac   : > { %v2852_v55 = vadd.f32 %v3119_v46, %v2851_v1  ;;  %3601 = vmatmul.mubr.msk.f32.gmra.mxu1 %vm2015_vm1, %v6166_v40  ;;  %v1797_v8 = vadd.s32 %v1796_v18, %v1794_v3  ;;  %v1866_v46 = vshll.u32 %v1865_v62, 16 }
 0x3ad   : > { %v1779_v13 = vpop.xlane.xlu0 %1778 }
 0x3ae   : > { %v2853_v0 = vadd.f32 %v3120_v22, %v2852_v55  ;;  %v1780_v12 = vcvt.f32.s32 %v1779_v13  ;;  %vm2017_vm3 = vcmp.eq.s32.totalorder %v4406_v10, %v1797_v8 }
 0x3af   : > { %v3122_v35 = vsel %vm2017_vm3, 1.0, %v6165_v2 }
 0x3b0   : > { %v1783_v5 = vadd.s32 %v1782_v21, %v1780_v12  ;;  %v1907_v21 = vcvt.f32.s32 %v5403_v34 }
 0x3b1   : > { %v1821_v43 = vpop.xlane.xlu1 %1820 }
 0x3b2   : > { %v1822_v39 = vcvt.f32.s32 %v1821_v43  ;;  %vm2016_vm2 = vcmp.eq.s32.totalorder %v4406_v10, %v1783_v5  ;;  %v1908_v34 = vshll.u32 %v1907_v21, 16 }
 0x3b3   : > { %v3121_v29 = vsel %vm2016_vm2, 1.0, %v6165_v2  ;;  %3603 = vmatprep.mubr.msk.f32.mxu1 %vm2016_vm2, %v6166_v40 }
 0x3b4   : > { %v2854_v36 = vadd.f32 %v3121_v29, %v2853_v0  ;;  %3604 = vmatmul.mubr.msk.f32.gmra.mxu1 %vm2017_vm3, %v6166_v40  ;;  %v1825_v17 = vadd.s32 %v1824_v56, %v1822_v39  ;;  %v3700_v29 = vld [vmem:[%s4112_s7 + $0x10] sm:$0xff] }
 0x3b5   : > { %v1807_v30 = vpop.xlane.xlu0 %1806 }
 0x3b6   : > { %v2855_v37 = vadd.f32 %v3122_v35, %v2854_v36  ;;  %v1808_v4 = vcvt.f32.s32 %v1807_v30  ;;  %vm2019_vm5 = vcmp.eq.s32.totalorder %v4406_v10, %v1825_v17  ;;  %v1894_v17 = vshll.u32 %v1893_v52, 16 }
 0x3b7   : > { %v3124_v9 = vsel %vm2019_vm5, 1.0, %v6165_v2 }
 0x3b8   : > { %v1811_v59 = vadd.s32 %v1810_v24, %v1808_v4 }
 0x3b9   : > { %v1849_v31 = vpop.xlane.xlu1 %1848 }
 0x3ba   : > { %v1850_v41 = vcvt.f32.s32 %v1849_v31  ;;  %vm2018_vm4 = vcmp.eq.s32.totalorder %v4406_v10, %v1811_v59 }
 0x3bb   : > { %v3123_v33 = vsel %vm2018_vm4, 1.0, %v6165_v2  ;;  %3606 = vmatprep.mubr.msk.f32.mxu1 %vm2018_vm4, %v6166_v40 }
 0x3bc   : > { %v2856_v16 = vadd.f32 %v3123_v33, %v2855_v37  ;;  %3607 = vmatmul.mubr.msk.f32.gmra.mxu1 %vm2019_vm5, %v6166_v40  ;;  %v1853_v14 = vadd.s32 %v1852_v27, %v1850_v41 }
 0x3bd   : > { %v1835_v50 = vpop.xlane.xlu0 %1834 }
 0x3be   : > { %v2857_v44 = vadd.f32 %v3124_v9, %v2856_v16  ;;  %v1836_v48 = vcvt.f32.s32 %v1835_v50  ;;  %vm2021_vm7 = vcmp.eq.s32.totalorder %v4406_v10, %v1853_v14  ;;  %v1921_v9 = vcvt.f32.s32 %v5432_v63  ;;  %v3701_v14 = vld [vmem:[%s4112_s7 + $0x28] sm:$0xff] }
 0x3bf   : > { %v3126_v7 = vsel %vm2021_vm7, 1.0, %v6165_v2  ;;  %v1949_v63 = vcvt.f32.s32 %v5438_v42  ;;  %v1963_v42 = vcvt.f32.s32 %v5449_v11 }
 0x3c0   : > { %v1839_v25 = vadd.s32 %v1838_v23, %v1836_v48  ;;  %v3530_v19 = vpop.f32.mrf.mxu1  ;;  %v3702_v48 = vld [vmem:[%s4112_s7 + $0x20] sm:$0xff]  ;;  %v1922_v62 = vshll.u32 %v1921_v9, 16 }
 0x3c1   : > { %v2544_v51 = vsub.f32 %v3530_v19, %v3697_v28  ;;  %2608 = vst [vmem:[%s5589_s10 + $0x8] sm:$0xff] %v3530_v19  ;;  %v1877_v38 = vpop.xlane.xlu1 %1876 }
 0x3c2   : > { %v1878_v49 = vcvt.f32.s32 %v1877_v38  ;;  %v2224_v57 = vpop.f32.mrf.mxu1  ;;  %vm2020_vm6 = vcmp.eq.s32.totalorder %v4406_v10, %v1839_v25  ;;  %v1936_v25 = vshll.u32 %v1935_v45, 16 }
 0x3c3   : > { %v2543_v1 = vsub.f32 %v2224_v57, %v3698_v60  ;;  %2607 = vst [vmem:[%s5589_s10] sm:$0xff] %v2224_v57  ;;  %v3125_v15 = vsel %vm2020_vm6, 1.0, %v6165_v2  ;;  %3609 = vmatprep.mubr.msk.f32.mxu1 %vm2020_vm6, %v6166_v40  ;;  %v2672_v61 = vmul.f32 %v2544_v51, %v2544_v51 }
 0x3c4   : > { %v2858_v47 = vadd.f32 %v3125_v15, %v2857_v44  ;;  %3610 = vmatmul.mubr.msk.f32.gmra.mxu1 %vm2021_vm7, %v6166_v40  ;;  %v1881_v18 = vadd.s32 %v1880_v26, %v1878_v49 }
 0x3c5   : > { %v2671_v32 = vmul.f32 %v2543_v1, %v2543_v1  ;;  %v1863_v3 = vpop.xlane.xlu0 %1862 }
 0x3c6   : > { %v2859_v55 = vadd.f32 %v3126_v7, %v2858_v47  ;;  %v1864_v22 = vcvt.f32.s32 %v1863_v3  ;;  %vm2023_vm9 = vcmp.eq.s32.totalorder %v4406_v10, %v1881_v18  ;;  %v3703_v18 = vld [vmem:[%s4112_s7 + $0x38] sm:$0xff] }
 0x3c7   : > { %v2735_v13 = vadd.f32 %v2672_v61, %v2671_v32  ;;  %v3128_v30 = vsel %vm2023_vm9, 1.0, %v6165_v2  ;;  %v1950_v61 = vshll.u32 %v1949_v63, 16 }
 0x3c8   : > { %v1867_v8 = vadd.s32 %v1866_v46, %v1864_v22  ;;  %v3533_v0 = vpop.f32.mrf.mxu1  ;;  %v3704_v22 = vld [vmem:[%s4112_s7 + $0x30] sm:$0xff] }
 0x3c9   : > { %2610 = vst [vmem:[%s5589_s10 + $0x18] sm:$0xff] %v3533_v0  ;;  %v1905_v12 = vpop.xlane.xlu1 %1904  ;;  %v2546_v39 = vsub.f32 %v3533_v0, %v3699_v53 }
 0x3ca   : > { %v1906_v5 = vcvt.f32.s32 %v1905_v12  ;;  %v2234_v43 = vpop.f32.mrf.mxu1  ;;  %vm2022_vm8 = vcmp.eq.s32.totalorder %v4406_v10, %v1867_v8 }
 0x3cb   : > { %v2545_v56 = vsub.f32 %v2234_v43, %v3700_v29  ;;  %2609 = vst [vmem:[%s5589_s10 + $0x10] sm:$0xff] %v2234_v43  ;;  %v3127_v36 = vsel %vm2022_vm8, 1.0, %v6165_v2  ;;  %3612 = vmatprep.mubr.msk.f32.mxu1 %vm2022_vm8, %v6166_v40  ;;  %v2674_v59 = vmul.f32 %v2546_v39, %v2546_v39 }
 0x3cc   : > { %v2860_v35 = vadd.f32 %v3127_v36, %v2859_v55  ;;  %3613 = vmatmul.mubr.msk.f32.gmra.mxu1 %vm2023_vm9, %v6166_v40  ;;  %v1909_v37 = vadd.s32 %v1908_v34, %v1906_v5  ;;  %v1964_v5 = vshll.u32 %v1963_v42, 16  ;;  %v3712_v42 = vld [vmem:[%s4112_s7 + $0x70] sm:$0xff] }
 0x3cd   : > { %v2673_v54 = vmul.f32 %v2545_v56, %v2545_v56  ;;  %v1891_v24 = vpop.xlane.xlu0 %1890 }
 0x3ce   : > { %v2861_v4 = vadd.f32 %v3128_v30, %v2860_v35  ;;  %v1892_v58 = vcvt.f32.s32 %v1891_v24  ;;  %vm2025_vm11 = vcmp.eq.s32.totalorder %v4406_v10, %v1909_v37  ;;  %v3705_v24 = vld [vmem:[%s4112_s7 + $0x48] sm:$0xff]  ;;  %v3706_v37 = vld [vmem:[%s4112_s7 + $0x40] sm:$0xff] }
 0x3cf   : > { %v2736_v31 = vadd.f32 %v2735_v13, %v2673_v54  ;;  %v3130_v51 = vsel %vm2025_vm11, 1.0, %v6165_v2 }
 0x3d0   : > { %v1895_v41 = vadd.s32 %v1894_v17, %v1892_v58  ;;  %v3536_v33 = vpop.f32.mrf.mxu1 }
 0x3d1   : > { %v2737_v27 = vadd.f32 %v2736_v31, %v2674_v59  ;;  %2612 = vst [vmem:[%s5589_s10 + $0x28] sm:$0xff] %v3536_v33  ;;  %v1933_v16 = vpop.xlane.xlu1 %1932  ;;  %v2548_v44 = vsub.f32 %v3536_v33, %v3701_v14 }
 0x3d2   : > { %v1934_v50 = vcvt.f32.s32 %v1933_v16  ;;  %v2244_v23 = vpop.f32.mrf.mxu1  ;;  %vm2024_vm10 = vcmp.eq.s32.totalorder %v4406_v10, %v1895_v41 }
 0x3d3   : > { %v2547_v6 = vsub.f32 %v2244_v23, %v3702_v48  ;;  %2611 = vst [vmem:[%s5589_s10 + $0x20] sm:$0xff] %v2244_v23  ;;  %v3129_v20 = vsel %vm2024_vm10, 1.0, %v6165_v2  ;;  %3615 = vmatprep.mubr.msk.f32.mxu1 %vm2024_vm10, %v6166_v40  ;;  %v2676_v1 = vmul.f32 %v2548_v44, %v2548_v44  ;;  %v3707_v23 = vld [vmem:[%s4112_s7 + $0x58] sm:$0xff] }
 0x3d4   : > { %v2862_v19 = vadd.f32 %v3129_v20, %v2861_v4  ;;  %3616 = vmatmul.mubr.msk.f32.gmra.mxu1 %vm2025_vm11, %v6166_v40  ;;  %v1937_v49 = vadd.s32 %v1936_v25, %v1934_v50 }
 0x3d5   : > { %v2675_v28 = vmul.f32 %v2547_v6, %v2547_v6  ;;  %v1919_v38 = vpop.xlane.xlu0 %1918 }
 0x3d6   : > { %v2863_v57 = vadd.f32 %v3130_v51, %v2862_v19  ;;  %v1920_v60 = vcvt.f32.s32 %v1919_v38  ;;  %vm2027_vm13 = vcmp.eq.s32.totalorder %v4406_v10, %v1937_v49  ;;  %v3709_v38 = vld [vmem:[%s4112_s7 + $0x68] sm:$0xff]  ;;  %v3710_v49 = vld [vmem:[%s4112_s7 + $0x60] sm:$0xff] }
 0x3d7   : > { %v2738_v15 = vadd.f32 %v2737_v27, %v2675_v28  ;;  %v3132_v12 = vsel %vm2027_vm13, 1.0, %v6165_v2 }
 0x3d8   : > { %v1923_v26 = vadd.s32 %v1922_v62, %v1920_v60  ;;  %v3539_v47 = vpop.f32.mrf.mxu1 }
 0x3d9   : > { %2614 = vst [vmem:[%s5589_s10 + $0x38] sm:$0xff] %v3539_v47  ;;  %v1947_v32 = vpop.xlane.xlu0 %1946  ;;  %v2739_v7 = vadd.f32 %v2738_v15, %v2676_v1  ;;  %v2550_v55 = vsub.f32 %v3539_v47, %v3703_v18 }
 0x3da   : > { %v1948_v3 = vcvt.f32.s32 %v1947_v32  ;;  %v2254_v46 = vpop.f32.mrf.mxu1  ;;  %vm2026_vm12 = vcmp.eq.s32.totalorder %v4406_v10, %v1923_v26  ;;  %v3711_v32 = vld [vmem:[%s4112_s7 + $0x78] sm:$0xff] }
 0x3db   : > { %v2549_v13 = vsub.f32 %v2254_v46, %v3704_v22  ;;  %2613 = vst [vmem:[%s5589_s10 + $0x30] sm:$0xff] %v2254_v46  ;;  %v3131_v21 = vsel %vm2026_vm12, 1.0, %v6165_v2  ;;  %3618 = vmatprep.mubr.msk.f32.mxu1 %vm2026_vm12, %v6166_v40  ;;  %v2678_v39 = vmul.f32 %v2550_v55, %v2550_v55 }
 0x3dc   : > { %v1951_v8 = vadd.s32 %v1950_v61, %v1948_v3  ;;  %v2864_v0 = vadd.f32 %v3131_v21, %v2863_v57  ;;  %3619 = vmatmul.mubr.msk.f32.gmra.mxu1 %vm2027_vm13, %v6166_v40 }
 0x3dd   : > { %v2677_v11 = vmul.f32 %v2549_v13, %v2549_v13  ;;  %v1961_v52 = vpop.xlane.xlu1 %1960 }
 0x3de   : > { %v2865_v43 = vadd.f32 %v3132_v12, %v2864_v0  ;;  %v1962_v53 = vcvt.f32.s32 %v1961_v52  ;;  %vm2028_vm14 = vcmp.eq.s32.totalorder %v4406_v10, %v1951_v8  ;;  %v3713_v8 = vld [vmem:[%s4112_s7 + $0x88] sm:$0xff] }
 0x3df   : > { %v2740_v29 = vadd.f32 %v2739_v7, %v2677_v11  ;;  %v3133_v56 = vsel %vm2028_vm14, 1.0, %v6165_v2  ;;  %3621 = vmatprep.mubr.msk.f32.mxu1 %vm2028_vm14, %v6166_v40  ;;  %v3714_v11 = vld [vmem:[%s4112_s7 + $0x80] sm:$0xff] }
 0x3e0   : > { %v1965_v36 = vadd.s32 %v1964_v5, %v1962_v53  ;;  %v2866_v34 = vadd.f32 %v3133_v56, %v2865_v43  ;;  %v3542_v35 = vpop.f32.mrf.mxu1  ;;  %v3715_v56 = vld [vmem:[%s4112_s7 + $0x98] sm:$0xff] }
 0x3e1   : > { %2616 = vst [vmem:[%s5589_s10 + $0x48] sm:$0xff] %v3542_v35  ;;  %v2741_v54 = vadd.f32 %v2740_v29, %v2678_v39  ;;  %v2552_v17 = vsub.f32 %v3542_v35, %v3705_v24 }
 0x3e2   : > { %v2264_v30 = vpop.f32.mrf.mxu1  ;;  %vm2029_vm15 = vcmp.eq.s32.totalorder %v4406_v10, %v1965_v36 }
 0x3e3   : > { %v2551_v4 = vsub.f32 %v2264_v30, %v3706_v37  ;;  %2615 = vst [vmem:[%s5589_s10 + $0x40] sm:$0xff] %v2264_v30  ;;  %v3134_v58 = vsel %vm2029_vm15, 1.0, %v6165_v2  ;;  %3622 = vmatmul.mubr.msk.f32.gmra.mxu1 %vm2029_vm15, %v6166_v40  ;;  %v2680_v41 = vmul.f32 %v2552_v17, %v2552_v17  ;;  %v3708_v2 = vld [vmem:[%s4112_s7 + $0x50] sm:$0xff] }
 0x3e4   : > { %v2867_v59 = vadd.f32 %v3134_v58, %v2866_v34  ;;  %v3716_v34 = vld [vmem:[%s4112_s7 + $0x90] sm:$0xff]  ;;  %v3717_v58 = vld [vmem:[%s4112_s7 + $0xa8] sm:$0xff] }
 0x3e5   : > { %v2679_v31 = vmul.f32 %v2551_v4, %v2551_v4 }
 0x3e6   : > { %v2868_v45 = vrot.slane %v2867_v59, 4 }
 0x3e7   : > { %v2742_v33 = vadd.f32 %v2741_v54, %v2679_v31  ;;  %v3718_v31 = vld [vmem:[%s4112_s7 + $0xa0] sm:$0xff] }
 0x3e8   : > { %v2869_v27 = vadd.f32 %v2868_v45, %v2867_v59  ;;  %v3545_v16 = vpop.f32.mrf.mxu1 }
 0x3e9   : > { %2618 = vst [vmem:[%s5589_s10 + $0x58] sm:$0xff] %v3545_v16  ;;  %v2743_v10 = vadd.f32 %v2742_v33, %v2680_v41  ;;  %v2554_v14 = vsub.f32 %v3545_v16, %v3707_v23 }
 0x3ea   : > { %v2870_v9 = vrot.slane %v2869_v27, 2  ;;  %v2274_v50 = vpop.f32.mrf.mxu1 }
 0x3eb   : > { %v2553_v40 = vsub.f32 %v2274_v50, %v3708_v2  ;;  %2617 = vst [vmem:[%s5589_s10 + $0x50] sm:$0xff] %v2274_v50  ;;  %v2682_v20 = vmul.f32 %v2554_v14, %v2554_v14  ;;  %v3719_v50 = vld [vmem:[%s4112_s7 + $0xb0] sm:$0xff] }
 0x3ec   : > { %v2871_v44 = vadd.f32 %v2870_v9, %v2869_v27 }
 0x3ed   : > { %v2681_v48 = vmul.f32 %v2553_v40, %v2553_v40 }
 0x3ee   : > { %v2872_v6 = vrot.slane %v2871_v44, 1 }
 0x3ef   : > { %v2744_v25 = vadd.f32 %v2743_v10, %v2681_v48 }
 0x3f0   : > { %v2873_v19 = vadd.f32 %v2872_v6, %v2871_v44  ;;  %v3548_v63 = vpop.f32.mrf.mxu1  ;;  %v3720_v44 = vld [vmem:[%s4112_s7 + $0xb8] sm:$0xff]  ;;  %v3721_v6 = vld [vmem:[%s4112_s7 + $0xc0] sm:$0xff] }
 0x3f1   : > { %2620 = vst [vmem:[%s5589_s10 + $0x68] sm:$0xff] %v3548_v63  ;;  %v2745_v28 = vadd.f32 %v2744_v25, %v2682_v20  ;;  %v2556_v62 = vsub.f32 %v3548_v63, %v3709_v38  ;;  %v3722_v38 = vld [vmem:[%s4112_s7 + $0xc8] sm:$0xff] }
 0x3f2   : > { %v2284_v51 = vpop.f32.mrf.mxu1  ;;  %2874 = vst [vmem:[%s273_s8] sm:$0x1] %v2873_v19 }
 0x3f3   : > { %v2555_v57 = vsub.f32 %v2284_v51, %v3710_v49  ;;  %2619 = vst [vmem:[%s5589_s10 + $0x60] sm:$0xff] %v2284_v51  ;;  %v2684_v1 = vmul.f32 %v2556_v62, %v2556_v62 }
 0x3f5   : > { %v2683_v60 = vmul.f32 %v2555_v57, %v2555_v57  ;;  %v3723_v57 = vld [vmem:[%s4112_s7 + $0xd0] sm:$0xff] }
 0x3f7   : > { %v2746_v15 = vadd.f32 %v2745_v28, %v2683_v60 }
 0x3f8   : > { %v3551_v26 = vpop.f32.mrf.mxu1 }
 0x3f9   : > { %2622 = vst [vmem:[%s5589_s10 + $0x78] sm:$0xff] %v3551_v26  ;;  %v2747_v47 = vadd.f32 %v2746_v15, %v2684_v1  ;;  %v2558_v7 = vsub.f32 %v3551_v26, %v3711_v32 }
 0x3fa   : > { %v2294_v61 = vpop.f32.mrf.mxu1 }
 0x3fb   : > { %v2557_v3 = vsub.f32 %v2294_v61, %v3712_v42  ;;  %2621 = vst [vmem:[%s5589_s10 + $0x70] sm:$0xff] %v2294_v61  ;;  %v2686_v18 = vmul.f32 %v2558_v7, %v2558_v7  ;;  %v3724_v7 = vld [vmem:[%s4112_s7 + $0xd8] sm:$0xff] }
 0x3fd   : > { %v2685_v46 = vmul.f32 %v2557_v3, %v2557_v3 }
 0x3ff   : > { %v2748_v55 = vadd.f32 %v2747_v47, %v2685_v46 }
 0x400   : > { %v3554_v22 = vpop.f32.mrf.mxu1 }
 0x401   : > { %2624 = vst [vmem:[%s5589_s10 + $0x88] sm:$0xff] %v3554_v22  ;;  %v2749_v13 = vadd.f32 %v2748_v55, %v2686_v18  ;;  %v2560_v0 = vsub.f32 %v3554_v22, %v3713_v8  ;;  %v3725_v55 = vld [vmem:[%s4112_s7 + $0xe0] sm:$0xff] }
 0x402   : > { %v2304_v21 = vpop.f32.mrf.mxu1 }
 0x403   : > { %v2559_v12 = vsub.f32 %v2304_v21, %v3714_v11  ;;  %2623 = vst [vmem:[%s5589_s10 + $0x80] sm:$0xff] %v2304_v21  ;;  %v2688_v5 = vmul.f32 %v2560_v0, %v2560_v0 }
 0x405   : > { %v2687_v52 = vmul.f32 %v2559_v12, %v2559_v12 }
 0x407   : > { %v2750_v43 = vadd.f32 %v2749_v13, %v2687_v52  ;;  %v3726_v52 = vld [vmem:[%s4112_s7 + $0xe8] sm:$0xff] }
 0x408   : > { %v3557_v53 = vpop.f32.mrf.mxu1 }
 0x409   : > { %2626 = vst [vmem:[%s5589_s10 + $0x98] sm:$0xff] %v3557_v53  ;;  %v2751_v39 = vadd.f32 %v2750_v43, %v2688_v5  ;;  %v2562_v36 = vsub.f32 %v3557_v53, %v3715_v56 }
 0x40a   : > { %v2314_v29 = vpop.f32.mrf.mxu1 }
 0x40b   : > { %v2561_v35 = vsub.f32 %v2314_v29, %v3716_v34  ;;  %2625 = vst [vmem:[%s5589_s10 + $0x90] sm:$0xff] %v2314_v29  ;;  %v2690_v30 = vmul.f32 %v2562_v36, %v2562_v36 }
 0x40d   : > { %v2689_v54 = vmul.f32 %v2561_v35, %v2561_v35 }
 0x40f   : > { %v2752_v24 = vadd.f32 %v2751_v39, %v2689_v54  ;;  %v3727_v39 = vld [vmem:[%s4112_s7 + $0xf0] sm:$0xff] }
 0x410   : > { %v3560_v17 = vpop.f32.mrf.mxu1 }
 0x411   : > { %2628 = vst [vmem:[%s5589_s10 + $0xa8] sm:$0xff] %v3560_v17  ;;  %v2753_v37 = vadd.f32 %v2752_v24, %v2690_v30  ;;  %v2564_v59 = vsub.f32 %v3560_v17, %v3717_v58  ;;  %v3728_v30 = vld [vmem:[%s4112_s7 + $0xf8] sm:$0xff] }
 0x412   : > { %v2324_v4 = vpop.f32.mrf.mxu1 }
 0x413   : > { %v2563_v45 = vsub.f32 %v2324_v4, %v3718_v31  ;;  %2627 = vst [vmem:[%s5589_s10 + $0xa0] sm:$0xff] %v2324_v4  ;;  %v2692_v33 = vmul.f32 %v2564_v59, %v2564_v59 }
 0x415   : > { %v2691_v41 = vmul.f32 %v2563_v45, %v2563_v45 }
 0x417   : > { %v2754_v27 = vadd.f32 %v2753_v37, %v2691_v41  ;;  %v3729_v37 = vld [vmem:[%s4112_s7 + $0x100] sm:$0xff] }
 0x418   : > { %v3563_v16 = vpop.f32.mrf.mxu1 }
 0x419   : > { %2630 = vst [vmem:[%s5589_s10 + $0xb8] sm:$0xff] %v3563_v16  ;;  %v2755_v10 = vadd.f32 %v2754_v27, %v2692_v33  ;;  %v2566_v48 = vsub.f32 %v3563_v16, %v3720_v44  ;;  %v3730_v33 = vld [vmem:[%s4112_s7 + $0x108] sm:$0xff]  ;;  %v3732_v44 = vld [vmem:[%s4112_s7 + $0x118] sm:$0xff] }
 0x41a   : > { %v2334_v9 = vpop.f32.mrf.mxu1 }
 0x41b   : > { %2629 = vst [vmem:[%s5589_s10 + $0xb0] sm:$0xff] %v2334_v9  ;;  %v2565_v23 = vsub.f32 %v2334_v9, %v3719_v50  ;;  %v2694_v63 = vmul.f32 %v2566_v48, %v2566_v48 }
 0x41d   : > { %v2693_v40 = vmul.f32 %v2565_v23, %v2565_v23 }
 0x41f   : > { %v2756_v25 = vadd.f32 %v2755_v10, %v2693_v40  ;;  %v3731_v10 = vld [vmem:[%s4112_s7 + $0x110] sm:$0xff] }
 0x420   : > { %v3566_v14 = vpop.f32.mrf.mxu1 }
 0x421   : > { %2632 = vst [vmem:[%s5589_s10 + $0xc8] sm:$0xff] %v3566_v14  ;;  %v2568_v62 = vsub.f32 %v3566_v14, %v3722_v38  ;;  %v2757_v49 = vadd.f32 %v2756_v25, %v2694_v63 }
 0x422   : > { %v2344_v2 = vpop.f32.mrf.mxu1 }
 0x423   : > { %2631 = vst [vmem:[%s5589_s10 + $0xc0] sm:$0xff] %v2344_v2  ;;  %v2567_v20 = vsub.f32 %v2344_v2, %v3721_v6  ;;  %v2696_v47 = vmul.f32 %v2568_v62, %v2568_v62  ;;  %v3734_v62 = vld [vmem:[%s4112_s7 + $0x128] sm:$0xff] }
 0x425   : > { %v2695_v28 = vmul.f32 %v2567_v20, %v2567_v20  ;;  %v3733_v20 = vld [vmem:[%s4112_s7 + $0x120] sm:$0xff] }
 0x427   : > { %v2758_v15 = vadd.f32 %v2757_v49, %v2695_v28 }
 0x428   : > { %v3569_v19 = vpop.f32.mrf.mxu1 }
 0x429   : > { %2634 = vst [vmem:[%s5589_s10 + $0xd8] sm:$0xff] %v3569_v19  ;;  %v2570_v42 = vsub.f32 %v3569_v19, %v3724_v7  ;;  %v2759_v3 = vadd.f32 %v2758_v15, %v2696_v47 }
 0x42a   : > { %v2354_v51 = vpop.f32.mrf.mxu1 }
 0x42b   : > { %2633 = vst [vmem:[%s5589_s10 + $0xd0] sm:$0xff] %v2354_v51  ;;  %v2569_v60 = vsub.f32 %v2354_v51, %v3723_v57  ;;  %v2698_v21 = vmul.f32 %v2570_v42, %v2570_v42  ;;  %v3735_v57 = vld [vmem:[%s4112_s7 + $0x130] sm:$0xff] }
 0x42c   : > { %v3572_v1 = vpop.f32.mrf.mxu1 }
 0x42d   : > { %2636 = vst [vmem:[%s5589_s10 + $0xe8] sm:$0xff] %v3572_v1  ;;  %v2697_v61 = vmul.f32 %v2569_v60, %v2569_v60  ;;  %v2572_v5 = vsub.f32 %v3572_v1, %v3726_v52 }
 0x42e   : > { %v2364_v26 = vpop.f32.mrf.mxu1 }
 0x42f   : > { %2635 = vst [vmem:[%s5589_s10 + $0xe0] sm:$0xff] %v2364_v26  ;;  %v2760_v18 = vadd.f32 %v2759_v3, %v2697_v61  ;;  %v2571_v22 = vsub.f32 %v2364_v26, %v3725_v55  ;;  %v2700_v36 = vmul.f32 %v2572_v5, %v2572_v5  ;;  %v3737_v3 = vld [vmem:[%s4112_s7 + $0x140] sm:$0xff] }
 0x430   : > { %v3575_v32 = vpop.f32.mrf.mxu1 }
 0x431   : > { %2638 = vst [vmem:[%s5589_s10 + $0xf8] sm:$0xff] %v3575_v32  ;;  %v2699_v0 = vmul.f32 %v2571_v22, %v2571_v22  ;;  %v2761_v11 = vadd.f32 %v2760_v18, %v2698_v21  ;;  %v2574_v24 = vsub.f32 %v3575_v32, %v3728_v30  ;;  %v3736_v32 = vld [vmem:[%s4112_s7 + $0x138] sm:$0xff]  ;;  %v3738_v21 = vld [vmem:[%s4112_s7 + $0x148] sm:$0xff] }
 0x432   : > { %v2374_v46 = vpop.f32.mrf.mxu1 }
 0x433   : > { %2637 = vst [vmem:[%s5589_s10 + $0xf0] sm:$0xff] %v2374_v46  ;;  %v2762_v53 = vadd.f32 %v2761_v11, %v2699_v0  ;;  %v2573_v29 = vsub.f32 %v2374_v46, %v3727_v39  ;;  %v2702_v59 = vmul.f32 %v2574_v24, %v2574_v24  ;;  %v3739_v11 = vld [vmem:[%s4112_s7 + $0x150] sm:$0xff]  ;;  %v3740_v39 = vld [vmem:[%s4112_s7 + $0x158] sm:$0xff] }
 0x434   : > { %v3578_v13 = vpop.f32.mrf.mxu1 }
 0x435   : > { %2640 = vst [vmem:[%s5589_s10 + $0x108] sm:$0xff] %v3578_v13  ;;  %v2701_v35 = vmul.f32 %v2573_v29, %v2573_v29  ;;  %v2763_v54 = vadd.f32 %v2762_v53, %v2700_v36  ;;  %v2576_v27 = vsub.f32 %v3578_v13, %v3730_v33  ;;  %v3741_v36 = vld [vmem:[%s4112_s7 + $0x160] sm:$0xff] }
 0x436   : > { %v2384_v8 = vpop.f32.mrf.mxu1 }
 0x437   : > { %2639 = vst [vmem:[%s5589_s10 + $0x100] sm:$0xff] %v2384_v8  ;;  %v2764_v17 = vadd.f32 %v2763_v54, %v2701_v35  ;;  %v2575_v4 = vsub.f32 %v2384_v8, %v3729_v37  ;;  %v2704_v23 = vmul.f32 %v2576_v27, %v2576_v27  ;;  %v3742_v37 = vld [vmem:[%s4112_s7 + $0x168] sm:$0xff] }
 0x438   : > { %v3581_v12 = vpop.f32.mrf.mxu1 }
 0x439   : > { %2642 = vst [vmem:[%s5589_s10 + $0x118] sm:$0xff] %v3581_v12  ;;  %v2703_v45 = vmul.f32 %v2575_v4, %v2575_v4  ;;  %v2765_v41 = vadd.f32 %v2764_v17, %v2702_v59  ;;  %v2578_v48 = vsub.f32 %v3581_v12, %v3732_v44  ;;  %v3743_v59 = vld [vmem:[%s4112_s7 + $0x170] sm:$0xff] }
 0x43a   : > { %v2394_v43 = vpop.f32.mrf.mxu1 }
 0x43b   : > { %2641 = vst [vmem:[%s5589_s10 + $0x110] sm:$0xff] %v2394_v43  ;;  %v2766_v16 = vadd.f32 %v2765_v41, %v2703_v45  ;;  %v2577_v9 = vsub.f32 %v2394_v43, %v3731_v10  ;;  %v2706_v63 = vmul.f32 %v2578_v48, %v2578_v48  ;;  %v3744_v10 = vld [vmem:[%s4112_s7 + $0x178] sm:$0xff] }
 0x43c   : > { %v3584_v56 = vpop.f32.mrf.mxu1 }
 0x43d   : > { %2644 = vst [vmem:[%s5589_s10 + $0x128] sm:$0xff] %v3584_v56  ;;  %v2705_v2 = vmul.f32 %v2577_v9, %v2577_v9  ;;  %v2767_v40 = vadd.f32 %v2766_v16, %v2704_v23  ;;  %v2580_v49 = vsub.f32 %v3584_v56, %v3734_v62  ;;  %v3745_v23 = vld [vmem:[%s4112_s7 + $0x180] sm:$0xff] }
 0x43e   : > { %v2404_v34 = vpop.f32.mrf.mxu1 }
 0x43f   : > { %2643 = vst [vmem:[%s5589_s10 + $0x120] sm:$0xff] %v2404_v34  ;;  %v2768_v6 = vadd.f32 %v2767_v40, %v2705_v2  ;;  %v2579_v25 = vsub.f32 %v2404_v34, %v3733_v20  ;;  %v2708_v26 = vmul.f32 %v2580_v49, %v2580_v49  ;;  %v3748_v49 = vld [vmem:[%s4112_s7 + $0x198] sm:$0xff] }
 0x441   : > { %v2707_v51 = vmul.f32 %v2579_v25, %v2579_v25  ;;  %v2769_v38 = vadd.f32 %v2768_v6, %v2706_v63  ;;  %v3746_v6 = vld [vmem:[%s4112_s7 + $0x188] sm:$0xff] }
 0x443   : > { %v2770_v1 = vadd.f32 %v2769_v38, %v2707_v51 }
 0x444   : > { %v3587_v58 = vpop.f32.mrf.mxu1 }
 0x445   : > { %2646 = vst [vmem:[%s5589_s10 + $0x138] sm:$0xff] %v3587_v58  ;;  %v2582_v7 = vsub.f32 %v3587_v58, %v3736_v32  ;;  %v2771_v42 = vadd.f32 %v2770_v1, %v2708_v26  ;;  %v3749_v1 = vld [vmem:[%s4112_s7 + $0x1a0] sm:$0xff] }
 0x446   : > { %v2414_v31 = vpop.f32.mrf.mxu1 }
 0x447   : > { %2645 = vst [vmem:[%s5589_s10 + $0x130] sm:$0xff] %v2414_v31  ;;  %v2581_v60 = vsub.f32 %v2414_v31, %v3735_v57  ;;  %v2710_v55 = vmul.f32 %v2582_v7, %v2582_v7 }
 0x449   : > { %v2709_v47 = vmul.f32 %v2581_v60, %v2581_v60 }
 0x44b   : > { %v2772_v18 = vadd.f32 %v2771_v42, %v2709_v47  ;;  %v3750_v42 = vld [vmem:[%s4112_s7 + $0x1a8] sm:$0xff] }
 0x44c   : > { %v3590_v50 = vpop.f32.mrf.mxu1 }
 0x44d   : > { %2648 = vst [vmem:[%s5589_s10 + $0x148] sm:$0xff] %v3590_v50  ;;  %v2584_v8 = vsub.f32 %v3590_v50, %v3738_v21  ;;  %v2773_v0 = vadd.f32 %v2772_v18, %v2710_v55  ;;  %v3751_v18 = vld [vmem:[%s4112_s7 + $0x1b0] sm:$0xff] }
 0x44e   : > { %v2424_v14 = vpop.f32.mrf.mxu1 }
 0x44f   : > { %2647 = vst [vmem:[%s5589_s10 + $0x140] sm:$0xff] %v2424_v14  ;;  %v2583_v46 = vsub.f32 %v2424_v14, %v3737_v3  ;;  %v2712_v43 = vmul.f32 %v2584_v8, %v2584_v8 }
 0x451   : > { %v2711_v22 = vmul.f32 %v2583_v46, %v2583_v46 }
 0x453   : > { %v2774_v5 = vadd.f32 %v2773_v0, %v2711_v22 }
 0x454   : > { %v3593_v19 = vpop.f32.mrf.mxu1 }
 0x455   : > { %2650 = vst [vmem:[%s5589_s10 + $0x158] sm:$0xff] %v3593_v19  ;;  %v2586_v29 = vsub.f32 %v3593_v19, %v3740_v39  ;;  %v2775_v56 = vadd.f32 %v2774_v5, %v2712_v43  ;;  %v3747_v19 = vld [vmem:[%s4112_s7 + $0x190] sm:$0xff]  ;;  %v3753_v5 = vld [vmem:[%s4112_s7 + $0x1c0] sm:$0xff] }
 0x456   : > { %v2434_v28 = vpop.f32.mrf.mxu1 }
 0x457   : > { %2649 = vst [vmem:[%s5589_s10 + $0x150] sm:$0xff] %v2434_v28  ;;  %v2585_v12 = vsub.f32 %v2434_v28, %v3739_v11  ;;  %v2714_v24 = vmul.f32 %v2586_v29, %v2586_v29  ;;  %v3752_v11 = vld [vmem:[%s4112_s7 + $0x1b8] sm:$0xff] }
 0x459   : > { %v2713_v53 = vmul.f32 %v2585_v12, %v2585_v12 }
 0x45b   : > { %v2776_v54 = vadd.f32 %v2775_v56, %v2713_v53 }
 0x45c   : > { %v3596_v15 = vpop.f32.mrf.mxu1 }
 0x45d   : > { %2652 = vst [vmem:[%s5589_s10 + $0x168] sm:$0xff] %v3596_v15  ;;  %v2588_v4 = vsub.f32 %v3596_v15, %v3742_v37  ;;  %v2777_v58 = vadd.f32 %v2776_v54, %v2714_v24 }
 0x45e   : > { %v2444_v61 = vpop.f32.mrf.mxu1 }
 0x45f   : > { %2651 = vst [vmem:[%s5589_s10 + $0x160] sm:$0xff] %v2444_v61  ;;  %v2587_v34 = vsub.f32 %v2444_v61, %v3741_v36  ;;  %v2716_v33 = vmul.f32 %v2588_v4, %v2588_v4  ;;  %v3754_v36 = vld [vmem:[%s4112_s7 + $0x1c8] sm:$0xff] }
 0x461   : > { %v2715_v17 = vmul.f32 %v2587_v34, %v2587_v34 }
 0x463   : > { %v2778_v45 = vadd.f32 %v2777_v58, %v2715_v17  ;;  %v3756_v58 = vld [vmem:[%s4112_s7 + $0x1d8] sm:$0xff] }
 0x464   : > { %v3599_v13 = vpop.f32.mrf.mxu1 }
 0x465   : > { %2654 = vst [vmem:[%s5589_s10 + $0x178] sm:$0xff] %v3599_v13  ;;  %v2590_v9 = vsub.f32 %v3599_v13, %v3744_v10  ;;  %v2779_v50 = vadd.f32 %v2778_v45, %v2716_v33 }
 0x466   : > { %v2454_v52 = vpop.f32.mrf.mxu1 }
 0x467   : > { %2653 = vst [vmem:[%s5589_s10 + $0x170] sm:$0xff] %v2454_v52  ;;  %v2589_v31 = vsub.f32 %v2454_v52, %v3743_v59  ;;  %v2718_v40 = vmul.f32 %v2590_v9, %v2590_v9 }
 0x469   : > { %v2717_v27 = vmul.f32 %v2589_v31, %v2589_v31 }
 0x46b   : > { %v2780_v2 = vadd.f32 %v2779_v50, %v2717_v27  ;;  %v3757_v27 = vld [vmem:[%s4112_s7 + $0x1e0] sm:$0xff]  ;;  %v3758_v50 = vld [vmem:[%s4112_s7 + $0x1e8] sm:$0xff] }
 0x46c   : > { %v3602_v35 = vpop.f32.mrf.mxu1 }
 0x46d   : > { %2656 = vst [vmem:[%s5589_s10 + $0x188] sm:$0xff] %v3602_v35  ;;  %v2592_v20 = vsub.f32 %v3602_v35, %v3746_v6  ;;  %v2781_v25 = vadd.f32 %v2780_v2, %v2718_v40  ;;  %v3759_v6 = vld [vmem:[%s4112_s7 + $0x1f8] sm:$0xff] }
 0x46e   : > { %v2464_v30 = vpop.f32.mrf.mxu1 }
 0x46f   : > { %2655 = vst [vmem:[%s5589_s10 + $0x180] sm:$0xff] %v2464_v30  ;;  %v2591_v14 = vsub.f32 %v2464_v30, %v3745_v23  ;;  %v2720_v38 = vmul.f32 %v2592_v20, %v2592_v20  ;;  %v3755_v30 = vld [vmem:[%s4112_s7 + $0x1d0] sm:$0xff] }
 0x471   : > { %v2719_v44 = vmul.f32 %v2591_v14, %v2591_v14 }
 0x473   : > { %v2782_v51 = vadd.f32 %v2781_v25, %v2719_v44  ;;  %v3760_v25 = vld [vmem:[%s4112_s7 + $0x1f0] sm:$0xff] }
 0x474   : > { %v3605_v41 = vpop.f32.mrf.mxu1 }
 0x475   : > { %2658 = vst [vmem:[%s5589_s10 + $0x198] sm:$0xff] %v3605_v41  ;;  %v2594_v57 = vsub.f32 %v3605_v41, %v3748_v49  ;;  %v2783_v60 = vadd.f32 %v2782_v51, %v2720_v38 }
 0x476   : > { %v2474_v16 = vpop.f32.mrf.mxu1 }
 0x477   : > { %2657 = vst [vmem:[%s5589_s10 + $0x190] sm:$0xff] %v2474_v16  ;;  %v2593_v63 = vsub.f32 %v2474_v16, %v3747_v19  ;;  %v2722_v32 = vmul.f32 %v2594_v57, %v2594_v57 }
 0x479   : > { %v2721_v62 = vmul.f32 %v2593_v63, %v2593_v63 }
 0x47b   : > { %v2784_v47 = vadd.f32 %v2783_v60, %v2721_v62 }
 0x47c   : > { %v3608_v48 = vpop.f32.mrf.mxu1 }
 0x47d   : > { %2660 = vst [vmem:[%s5589_s10 + $0x1a8] sm:$0xff] %v3608_v48  ;;  %v2596_v3 = vsub.f32 %v3608_v48, %v3750_v42  ;;  %v2785_v46 = vadd.f32 %v2784_v47, %v2722_v32 }
 0x47e   : > { %v2484_v28 = vpop.f32.mrf.mxu1 }
 0x47f   : > { %2659 = vst [vmem:[%s5589_s10 + $0x1a0] sm:$0xff] %v2484_v28  ;;  %v2595_v15 = vsub.f32 %v2484_v28, %v3749_v1  ;;  %v2724_v21 = vmul.f32 %v2596_v3, %v2596_v3 }
 0x481   : > { %v2723_v7 = vmul.f32 %v2595_v15, %v2595_v15 }
 0x483   : > { %v2786_v22 = vadd.f32 %v2785_v46, %v2723_v7 }
 0x484   : > { %v3611_v26 = vpop.f32.mrf.mxu1 }
 0x485   : > { %2662 = vst [vmem:[%s5589_s10 + $0x1b8] sm:$0xff] %v3611_v26  ;;  %v2598_v12 = vsub.f32 %v3611_v26, %v3752_v11  ;;  %v2787_v52 = vadd.f32 %v2786_v22, %v2724_v21 }
 0x486   : > { %v2494_v61 = vpop.f32.mrf.mxu1 }
 0x487   : > { %2661 = vst [vmem:[%s5589_s10 + $0x1b0] sm:$0xff] %v2494_v61  ;;  %v2597_v55 = vsub.f32 %v2494_v61, %v3751_v18  ;;  %v2726_v39 = vmul.f32 %v2598_v12, %v2598_v12 }
 0x489   : > { %v2725_v8 = vmul.f32 %v2597_v55, %v2597_v55 }
 0x48b   : > { %v2788_v53 = vadd.f32 %v2787_v52, %v2725_v8 }
 0x48c   : > { %v3614_v13 = vpop.f32.mrf.mxu1 }
 0x48d   : > { %2664 = vst [vmem:[%s5589_s10 + $0x1c8] sm:$0xff] %v3614_v13  ;;  %v2600_v34 = vsub.f32 %v3614_v13, %v3754_v36  ;;  %v2789_v35 = vadd.f32 %v2788_v53, %v2726_v39 }
 0x48e   : > { %v2504_v0 = vpop.f32.mrf.mxu1 }
 0x48f   : > { %2663 = vst [vmem:[%s5589_s10 + $0x1c0] sm:$0xff] %v2504_v0  ;;  %v2599_v43 = vsub.f32 %v2504_v0, %v3753_v5  ;;  %v2728_v37 = vmul.f32 %v2600_v34, %v2600_v34 }
 0x491   : > { %v2727_v29 = vmul.f32 %v2599_v43, %v2599_v43 }
 0x493   : > { %v2790_v17 = vadd.f32 %v2789_v35, %v2727_v29 }
 0x494   : > { %v3617_v56 = vpop.f32.mrf.mxu1 }
 0x495   : > { %2666 = vst [vmem:[%s5589_s10 + $0x1d8] sm:$0xff] %v3617_v56  ;;  %v2602_v59 = vsub.f32 %v3617_v56, %v3756_v58  ;;  %v2791_v31 = vadd.f32 %v2790_v17, %v2728_v37 }
 0x496   : > { %v2514_v54 = vpop.f32.mrf.mxu1 }
 0x497   : > { %v2601_v24 = vsub.f32 %v2514_v54, %v3755_v30  ;;  %2665 = vst [vmem:[%s5589_s10 + $0x1d0] sm:$0xff] %v2514_v54  ;;  %v2730_v10 = vmul.f32 %v2602_v59, %v2602_v59 }
 0x499   : > { %v2729_v4 = vmul.f32 %v2601_v24, %v2601_v24 }
 0x49b   : > { %v2792_v41 = vadd.f32 %v2791_v31, %v2729_v4 }
 0x49c   : > { %v3620_v45 = vpop.f32.mrf.mxu1 }
 0x49d   : > { %2668 = vst [vmem:[%s5589_s10 + $0x1e8] sm:$0xff] %v3620_v45  ;;  %v2604_v23 = vsub.f32 %v3620_v45, %v3758_v50  ;;  %v2793_v14 = vadd.f32 %v2792_v41, %v2730_v10 }
 0x49e   : > { %v2524_v33 = vpop.f32.mrf.mxu1 }
 0x49f   : > { %v2603_v16 = vsub.f32 %v2524_v33, %v3757_v27  ;;  %2667 = vst [vmem:[%s5589_s10 + $0x1e0] sm:$0xff] %v2524_v33  ;;  %v2732_v48 = vmul.f32 %v2604_v23, %v2604_v23 }
 0x4a1   : > { %v2731_v9 = vmul.f32 %v2603_v16, %v2603_v16 }
 0x4a3   : > { %v3623_v2 = vpop.f32.mrf.mxu1  ;;  %v2794_v40 = vadd.f32 %v2793_v14, %v2731_v9 }
 0x4a4   : > { %2670 = vst [vmem:[%s5589_s10 + $0x1f8] sm:$0xff] %v3623_v2  ;;  %v2606_v20 = vsub.f32 %v3623_v2, %v3759_v6 }
 0x4a5   : > { %v2534_v44 = vpop.f32.mrf.mxu1 }
 0x4a6   : > { %v2605_v19 = vsub.f32 %v2534_v44, %v3760_v25  ;;  %2669 = vst [vmem:[%s5589_s10 + $0x1f0] sm:$0xff] %v2534_v44 }
 0x4a7   : > { %3828 = shalt.err (!%p3825_p0)
}
 0x4a8   : > { %s3829_s7 = scalar_lea.hbm %s5759_s28, 8192  ;;  %s3833_s10 = scalar_lea.hbm %s5876_s3, 16384 }
 0x4a9   : > { %p3830_p5 = scmp.ne.s32.totalorder %s5759_s28, %s3829_s7  ;;  %p3834_p4 = scmp.lt.s32.totalorder %s5759_s28, %s5876_s3 }
 0x4aa   : > { %p3835_p6 = scmp.lt.s32.totalorder %s3833_s10, %s3829_s7 }
 0x4ab   : > { %p3831_p2 = pnand %p3830_p5, %p6203_p11 }
 0x4ac   : > { %p3836_p8 = por %p3835_p6, %p3834_p4 }
 0x4ad   : > { %p3832_p1 = pneg %p3831_p2 }
 0x4af   : > { %p3837_p3 = pnand %p3836_p8, %p3832_p1 }
 0x4b1   : > { %3840 = shalt.err (!%p3837_p3)
}
 0x4b2   : > { %s3948_s29 = smov 128   ;;  %s3949_s16 = smov 8   ;;  %v2733_v63 = vmul.f32 %v2605_v19, %v2605_v19  ;;  %v2795_v28 = vadd.f32 %v2794_v40, %v2732_v48  ;;  %v2734_v51 = vmul.f32 %v2606_v20, %v2606_v20 }
 0x4b3   : > { %3630 = dma.vmem_to_hbm [thread:$0]  (%p6203_p11), %s5761_s11, 8192, %s5759_s28, %s2876_s15, %s3948_s29, %s3948_s29, %s3949_s16  }
 0x4b4   : > { %v2796_v38 = vadd.f32 %v2795_v28, %v2733_v63  ;;  %s2880_s12 = sand.u32 1, %s4003_s22   ;;  %s3202_s9 = sshll.u32 %s4003_s22, 4 }
 0x4b5   : > { %s267_s27 = scalar_lea.vmem [#allocation8], %s4106_s23  ;;  %s2926_s24 = sshll.u32 %s273_s8, 4  ;;  %s5807_s24 = int_to_ptr.vmem [resolvable:$true] %s2926_s24 }
 0x4b6   : > { %v2797_v62 = vadd.f32 %v2796_v38, %v2734_v51  ;;  %s2913_s7 = sshll.u32 %s267_s27, 4  ;;  %s5798_s28 = scalar_lea.hbm %s5877_s4, %s3202_s9  ;;  %s5800_s7 = int_to_ptr.vmem [resolvable:$true] %s2913_s7 }
 0x4b7   : > { %s5805_s22 = scalar_lea.hbm %s5878_s5, %s3202_s9  ;;  %s5809_s23 = scalar_lea.sflag [#allocation9], %s2880_s12 }
 0x4b8   : > { %v2798_v49 = vrot.slane %v2797_v62, 4  ;;  %s3841_s8 = scalar_lea.vmem %s5800_s7, 16  ;;  %s3950_s6 = smov [#allocation8]  }
 0x4b9   : > { %p3842_p7 = scmp.ne.s32.totalorder %s5800_s7, %s3841_s8  ;;  %s3845_s17 = sshll.u32 %s3950_s6, 4  ;;  %s3846_s17 = int_to_ptr.vmem [resolvable:$false] %s3845_s17 }
 0x4ba   : > { %v2799_v57 = vadd.f32 %v2798_v49, %v2797_v62  ;;  %s3847_s29 = scalar_lea.vmem %s3846_s17, 32  ;;  %p3848_p12 = scmp.lt.s32.totalorder %s5800_s7, %s3846_s17 }
 0x4bb   : > { %p3843_p9 = pnand %p3842_p7, %p6203_p11  ;;  %p3849_p13 = scmp.lt.s32.totalorder %s3847_s29, %s3841_s8 }
 0x4bc   : > { %v2800_v60 = vrot.slane %v2799_v57, 2 }
 0x4bd   : > { %p3844_p10 = pneg %p3843_p9  ;;  %p3850_p0 = por %p3849_p13, %p3848_p12 }
 0x4be   : > { %v2801_v1 = vadd.f32 %v2800_v60, %v2799_v57 }
 0x4bf   : > { %p3851_p5 = pnand %p3850_p0, %p3844_p10 }
 0x4c0   : > { %v2802_v15 = vrot.slane %v2801_v1, 1 }
 0x4c2   : > { %v2803_v26 = vadd.f32 %v2802_v15, %v2801_v1 }
 0x4c4   : > { %2804 = vst [vmem:[%s267_s27] sm:$0x1] %v2803_v26 }
 0x4c5   : > { %3854 = shalt.err (!%p3851_p5)
}
 0x4c6   : > { %s3855_s16 = scalar_lea.hbm %s5798_s28, 16  ;;  %s3859_s27 = scalar_lea.hbm %s5877_s4, 32 }
 0x4c7   : > { %p3856_p2 = scmp.ne.s32.totalorder %s5798_s28, %s3855_s16  ;;  %p3860_p6 = scmp.lt.s32.totalorder %s5798_s28, %s5877_s4 }
 0x4c8   : > { %p3861_p8 = scmp.lt.s32.totalorder %s3859_s27, %s3855_s16 }
 0x4c9   : > { %p3857_p1 = pnand %p3856_p2, %p6203_p11 }
 0x4ca   : > { %p3862_p3 = por %p3861_p8, %p3860_p6 }
 0x4cb   : > { %p3858_p4 = pneg %p3857_p1 }
 0x4cd   : > { %p3863_p7 = pnand %p3862_p3, %p3858_p4 }
 0x4cf   : > { %3866 = shalt.err (!%p3863_p7)
}
 0x4d0   : > { %3631 = dma.vmem_to_hbm [thread:$0]  (%p6203_p11), %s5800_s7, 16, %s5798_s28, %s5809_s23  }
 0x4d1   : > { %s3867_s15 = scalar_lea.vmem %s5807_s24, 16  ;;  %s3951_s10 = smov [#allocation10]  }
 0x4d2   : > { %p3868_p9 = scmp.ne.s32.totalorder %s5807_s24, %s3867_s15  ;;  %s3871_s8 = sshll.u32 %s3951_s10, 4  ;;  %s3872_s8 = int_to_ptr.vmem [resolvable:$false] %s3871_s8 }
 0x4d3   : > { %s3873_s6 = scalar_lea.vmem %s3872_s8, 32  ;;  %p3874_p13 = scmp.lt.s32.totalorder %s5807_s24, %s3872_s8 }
 0x4d4   : > { %p3869_p10 = pnand %p3868_p9, %p6203_p11  ;;  %p3875_p0 = scmp.lt.s32.totalorder %s3873_s6, %s3867_s15 }
 0x4d6   : > { %p3870_p12 = pneg %p3869_p10  ;;  %p3876_p5 = por %p3875_p0, %p3874_p13 }
 0x4d8   : > { %p3877_p2 = pnand %p3876_p5, %p3870_p12 }
 0x4da   : > { %3880 = shalt.err (!%p3877_p2)
}
 0x4db   : > { %s3881_s17 = scalar_lea.hbm %s5805_s22, 16  ;;  %s3885_s29 = scalar_lea.hbm %s5878_s5, 32 }
 0x4dc   : > { %p3882_p1 = scmp.ne.s32.totalorder %s5805_s22, %s3881_s17  ;;  %p3886_p8 = scmp.lt.s32.totalorder %s5805_s22, %s5878_s5 }
 0x4dd   : > { %p3887_p3 = scmp.lt.s32.totalorder %s3885_s29, %s3881_s17 }
 0x4de   : > { %p3883_p4 = pnand %p3882_p1, %p6203_p11 }
 0x4df   : > { %p3888_p7 = por %p3887_p3, %p3886_p8 }
 0x4e0   : > { %p3884_p6 = pneg %p3883_p4 }
 0x4e2   : > { %p3889_p9 = pnand %p3888_p7, %p3884_p6 }
 0x4e4   : > { %3892 = shalt.err (!%p3889_p9)
}
 0x4e5   : > { %3632 = dma.vmem_to_hbm [thread:$0]  (%p6203_p11), %s5807_s24, 16, %s5805_s22, %s5809_s23  }
 0x4e6 PF: > { %s2938_s9 = sand.u32 1, %s3927_s18   ;;  %p6204_p10 = scmp.ne.s32.totalorder %s5990_s25, 0 }
 0x4e7   : > { %p6205_p12 = scmp.ge.s32.totalorder %s3939_s21, 2  ;;  %s2939_s27 = scalar_lea.sflag [#allocation4], %s2938_s9 }
 0x4e9   : > { %p3645_p13 = pnand %p6205_p12, %p6204_p10 }
 0x4eb   : > { %p3646_p0 = pneg %p3645_p13 }
 0x4ed   : > { %3918 = dma.done.wait (%p3646_p0), %s2939_s27, 8192  }
 0x4ee   : > { %3920 = vsyncadd (%p3646_p0), %s2939_s27, 4294959104  ;;  %s6206_s26 = sadd.s32 4294967294, %s3939_s21  }
 0x4ef   : > { %s2947_s11 = sand.u32 1, %s6206_s26  }
 0x4f0   : > { %s2948_s14 = scalar_lea.sflag [#allocation9], %s2947_s11 }
 0x4f1   : > { %3922 = dma.done.wait (%p3646_p0), %s2948_s14, 32  }
 0x4f2   : > { %3924 = vsyncadd (%p3646_p0), %s2948_s14, 4294967264  ;;  %p23_p11 = scmp.ge.s32.totalorder %s4038_s30, 4   ;;  %s6207_s18 = smov %s3931_s19 }
 0x4f3   : > { %s6208_s19 = smov %s3935_s20  ;;  %s6209_s20 = smov %s4058_s13 }
 0x4f4   : > { %s6210_s21 = smov %s4038_s30  ;;  %25 = sbr.rel (!%p23_p11) target bundleno = 8 (0x8), region = 113 }
 0x4f9   :  { %2960 = vsyncpa [#allocation3], 1 }
 0x4fa   :  { %2962 = vsyncpa [#allocation3 + $0x1], 1 }
 0x4fb   :  { %2963 = vsyncpa [#allocation6], 1 }
 0x4fc   :  { %2964 = vsyncpa [#allocation4], 1 }
 0x4fd   :  { %2966 = vsyncpa [#allocation4 + $0x1], 1 }
 0x4fe   :  { %2967 = vsyncpa [#allocation9], 1 }
 0x4ff   :  { %2969 = vsyncpa [#allocation9 + $0x1], 1 }

</bundles_post_ra>
